<compile_context>
chip_gen: v7x
topology: tpu7x:2x2x1
jax: 0.10.0
libtpu: 0.0.40
codegen_flags: <defaults>
</compile_context>

<pallas_src>
from functools import partial

import jax
import jax.numpy as jnp
from jax import lax
from jax.experimental import pallas as pl
from jax.experimental.pallas import tpu as pltpu


# ---------------------------------------------------------------------------
# Single fused kernel: whole discriminator forward for one sample.
# ---------------------------------------------------------------------------
def _fused_d_kernel(x_ref, bm1_ref, bm2_ref, bm3_ref, bm4_ref, bm5_ref,
                    bias1_ref, w6_ref, b6_ref, out_ref,
                    *, dims, eps=1e-5, slope=0.2):
    bm_refs = (bm1_ref, bm2_ref, bm3_ref, bm4_ref, bm5_ref)

    y = x_ref[0]                                     # (H1, W1) bf16
    acc = None
    for li, (hin, cin, win, ho, cout, wo) in enumerate(dims):
        bref = bm_refs[li]
        cw = cin * win
        owo = cout * wo

        # Row-tap selection matrices T_i (ho, hin), generated from iota.
        oh_i = lax.broadcasted_iota(jnp.int32, (ho, hin), 0)
        h_i = lax.broadcasted_iota(jnp.int32, (ho, hin), 1)

        acc = jnp.zeros((ho, owo), jnp.float32)
        for i in range(4):
            t = jnp.where(h_i == 2 * oh_i + (i - 1), 1.0, 0.0)
            t = t.astype(jnp.bfloat16)
            rows = jnp.dot(t, y, preferred_element_type=jnp.float32)
            rows = rows.astype(jnp.bfloat16)          # exact: pure row selection
            acc = acc + jnp.dot(rows, bref[i * cw:(i + 1) * cw, :],
                                preferred_element_type=jnp.float32)

        if li == 0:
            # conv1: bias (no InstanceNorm follows).
            acc = acc + bias1_ref[...]
        else:
            # InstanceNorm2d(affine=False): per-channel stats over (ho, wo).
            # Channel reduce / broadcast done with 0/1 indicator matmuls so the
            # (channel, column)-interleaved lane layout never needs a reshape.
            p_i = lax.broadcasted_iota(jnp.int32, (owo, cout), 0)
            o_i = lax.broadcasted_iota(jnp.int32, (owo, cout), 1)
            e = jnp.where((p_i >= o_i * wo) & (p_i < (o_i + 1) * wo), 1.0, 0.0)
            ot_i = lax.broadcasted_iota(jnp.int32, (cout, owo), 0)
            pt_i = lax.broadcasted_iota(jnp.int32, (cout, owo), 1)
            et = jnp.where((pt_i >= ot_i * wo) & (pt_i < (ot_i + 1) * wo),
                           1.0, 0.0)

            inv = 1.0 / float(ho * wo)
            s1 = jnp.dot(jnp.sum(acc, axis=0, keepdims=True), e,
                         preferred_element_type=jnp.float32)        # (1, cout)
            s2 = jnp.dot(jnp.sum(acc * acc, axis=0, keepdims=True), e,
                         preferred_element_type=jnp.float32)        # (1, cout)
            mean = s1 * inv
            var = jnp.maximum(s2 * inv - mean * mean, 0.0)
            scl = lax.rsqrt(var + eps)
            mean_l = jnp.dot(mean, et, preferred_element_type=jnp.float32)
            scl_l = jnp.dot(scl, et, preferred_element_type=jnp.float32)
            acc = (acc - mean_l) * scl_l

        acc = jnp.where(acc > 0, acc, slope * acc)    # LeakyReLU(0.2)
        y = acc.astype(jnp.bfloat16)                  # feed next layer (bf16)

    # conv6: (2,3) valid conv over the resident (C5, 2, 3) activation.
    prod = acc * w6_ref[...]                          # (2, C5*3) f32
    tot = jnp.sum(jnp.sum(prod, axis=1, keepdims=True), axis=0, keepdims=True)
    out_ref[0] = tot + b6_ref[...]                    # (1, 1)


# ---------------------------------------------------------------------------
# Host-side weight preprocessing (tiny; constant-folded under jit).
# ---------------------------------------------------------------------------
def _expand_conv_w(w, win):
    """(O, C, 4, 4) conv weight (stride 2, pad 1) -> stacked (4*C*win, O*wo)."""
    o, c, kh, kw = w.shape
    wo = (win + 2 - kw) // 2 + 1
    wi = jnp.arange(win)
    owi = jnp.arange(wo)
    j = wi[:, None] - 2 * owi[None, :] + 1            # tap index along W
    valid = (j >= 0) & (j < kw)                       # encodes W zero padding
    jc = jnp.clip(j, 0, kw - 1)
    sel = w[:, :, :, jc]                              # (O, C, KH, win, wo)
    sel = jnp.where(valid[None, None, None], sel, 0.0)
    b = jnp.transpose(sel, (2, 1, 3, 0, 4)).reshape(kh * c * win, o * wo)
    return b.astype(jnp.bfloat16), wo


# ---------------------------------------------------------------------------
# Discriminator forward (matches D.forward).
# ---------------------------------------------------------------------------
def d_forward(x, params, *, eps=1e-5, slope=0.2):
    n = x.shape[0]
    # nn.ConstantPad2d((1, 2, 0, 0)): pad W by (left=1, right=2).
    xp = jnp.pad(x[:, 0, :, :], ((0, 0), (0, 0), (1, 2)))
    h1, w1 = xp.shape[1], xp.shape[2]
    xp = xp.astype(jnp.bfloat16)

    dims, b_mats = [], []
    hin, cin, win = h1, 1, w1
    for name in ("conv1", "conv2", "conv3", "conv4", "conv5"):
        w, _ = params[name]
        cout, c, kh, kw = w.shape
        assert c == cin and (kh, kw) == (4, 4)
        b_mat, wo = _expand_conv_w(w, win)
        ho = (hin + 2 - kh) // 2 + 1
        dims.append((hin, cin, win, ho, cout, wo))
        b_mats.append(b_mat)
        hin, cin, win = ho, cout, wo

    _, b1 = params["conv1"]
    o1, wo1 = dims[0][4], dims[0][5]
    bias1 = jnp.repeat(b1, wo1).reshape(1, o1 * wo1).astype(jnp.float32)

    w6, b6 = params["conv6"]
    o6, c6, k6h, k6w = w6.shape
    # TODO(synk): the fused conv6 epilogue assumes conv5's output spatial size
    # equals conv6's (2, 3) kernel (true for this architecture's intended inputs).
    assert o6 == 1 and c6 == cin and (k6h, k6w) == (hin, win)
    w6arr = jnp.transpose(w6[0], (1, 0, 2)).reshape(k6h, c6 * k6w)
    w6arr = w6arr.astype(jnp.float32)
    b6arr = b6.reshape(1, 1).astype(jnp.float32)

    kernel = partial(_fused_d_kernel, dims=tuple(dims), eps=eps, slope=slope)

    in_specs = [pl.BlockSpec((1, h1, w1), lambda i: (i, 0, 0))]
    in_specs += [pl.BlockSpec(bm.shape, lambda i: (0, 0)) for bm in b_mats]
    in_specs += [pl.BlockSpec(bias1.shape, lambda i: (0, 0)),
                 pl.BlockSpec(w6arr.shape, lambda i: (0, 0)),
                 pl.BlockSpec((1, 1), lambda i: (0, 0))]

    out = pl.pallas_call(
        kernel,
        out_shape=jax.ShapeDtypeStruct((n, 1, 1), jnp.float32),
        grid=(n,),
        in_specs=in_specs,
        out_specs=pl.BlockSpec((1, 1, 1), lambda i: (i, 0, 0)),
        compiler_params=pltpu.CompilerParams(
            dimension_semantics=("parallel",)),
    )(xp, *b_mats, bias1, w6arr, b6arr)
    return out.reshape(n, 1, 1, 1)


def init_params(key, init_channels=4):
    """Deterministic synthetic init (normal(0, 0.02) weights, zero biases)."""
    c = init_channels
    shapes = {
        "conv1": (c,      1,      4, 4),
        "conv2": (c * 2,  c,      4, 4),
        "conv3": (c * 4,  c * 2,  4, 4),
        "conv4": (c * 8,  c * 4,  4, 4),
        "conv5": (c * 16, c * 8,  4, 4),
        "conv6": (1,      c * 16, 2, 3),
    }
    params = {}
    for name, shp in shapes.items():
        key, sub = jax.random.split(key)
        w = 0.02 * jax.random.normal(sub, shp, dtype=jnp.float32)
        b = jnp.zeros((shp[0],), dtype=jnp.float32)
        params[name] = (w, b)
    return params


if __name__ == "__main__":
    key = jax.random.PRNGKey(0)
    pkey, xkey = jax.random.split(key)

    init_channels = 4                       # small, architecture-consistent
    params = init_params(pkey, init_channels)

    # Input chosen so every conv produces valid spatial dims:
    # (2,1,64,93) -pad-> 64x96 -> 32x48 -> 16x24 -> 8x12 -> 4x6 -> 2x3 -> 1x1
    x = jax.random.normal(xkey, (2, 1, 64, 93), dtype=jnp.float32)

    fwd = jax.jit(lambda x: d_forward(x, params))
    out = fwd(x)
    jax.block_until_ready(out)

    assert out.shape == (2, 1, 1, 1), out.shape
    assert bool(jnp.all(jnp.isfinite(out)))
    print("KERNEL_OK")
</pallas_src>

<mosaic_0001>
module attributes {stable_mosaic.version = 11 : i64} {
  func.func @_fused_d_kernel(%arg0: i32, %arg1: memref<1x64x96xbf16, #tpu.memory_space<vmem>>, %arg2: memref<384x192xbf16, #tpu.memory_space<vmem>>, %arg3: memref<768x192xbf16, #tpu.memory_space<vmem>>, %arg4: memref<768x192xbf16, #tpu.memory_space<vmem>>, %arg5: memref<768x192xbf16, #tpu.memory_space<vmem>>, %arg6: memref<768x192xbf16, #tpu.memory_space<vmem>>, %arg7: memref<1x192xf32, #tpu.memory_space<vmem>>, %arg8: memref<2x192xf32, #tpu.memory_space<vmem>>, %arg9: memref<1x1xf32, #tpu.memory_space<vmem>>, %arg10: memref<1x1x1xf32, #tpu.memory_space<vmem>>) attributes {dimension_semantics = [#tpu.dimension_semantics<parallel>], iteration_bounds = array<i64: 2>, scalar_prefetch = 0 : i64, scratch_operands = 0 : i64, tpu.core_type = #tpu.core_type<tc>, window_params = [{transform_indices = @transform_0, window_bounds = array<i64: 1, 64, 96>}, {pipeline_mode = #tpu.pipeline_mode<synchronous>, transform_indices = @transform_1, window_bounds = array<i64: 384, 192>}, {pipeline_mode = #tpu.pipeline_mode<synchronous>, transform_indices = @transform_2, window_bounds = array<i64: 768, 192>}, {pipeline_mode = #tpu.pipeline_mode<synchronous>, transform_indices = @transform_3, window_bounds = array<i64: 768, 192>}, {pipeline_mode = #tpu.pipeline_mode<synchronous>, transform_indices = @transform_4, window_bounds = array<i64: 768, 192>}, {pipeline_mode = #tpu.pipeline_mode<synchronous>, transform_indices = @transform_5, window_bounds = array<i64: 768, 192>}, {pipeline_mode = #tpu.pipeline_mode<synchronous>, transform_indices = @transform_6, window_bounds = array<i64: 1, 192>}, {pipeline_mode = #tpu.pipeline_mode<synchronous>, transform_indices = @transform_7, window_bounds = array<i64: 2, 192>}, {pipeline_mode = #tpu.pipeline_mode<synchronous>, transform_indices = @transform_8, window_bounds = array<i64: 1, 1>}, {transform_indices = @transform_9, window_bounds = array<i64: 1, 1, 1>}]} {
    %c0 = arith.constant 0 : index
    %c0_0 = arith.constant 0 : index
    %c0_1 = arith.constant 0 : index
    %0 = vector.load %arg1[%c0, %c0_0, %c0_1] : memref<1x64x96xbf16, #tpu.memory_space<vmem>>, vector<1x64x96xbf16>
    %1 = vector.shape_cast %0 : vector<1x64x96xbf16> to vector<64x96xbf16>
    %2 = tpu.iota {dimensions = array<i32: 0>} : vector<32x64xi32>
    %3 = tpu.iota {dimensions = array<i32: 1>} : vector<32x64xi32>
    %cst = arith.constant 0.000000e+00 : f32
    %4 = vector.broadcast %cst : f32 to vector<32x192xf32>
    %c2_i32 = arith.constant 2 : i32
    %5 = vector.broadcast %c2_i32 : i32 to vector<32x64xi32>
    %6 = arith.muli %5, %2 : vector<32x64xi32>
    %c-1_i32 = arith.constant -1 : i32
    %7 = vector.broadcast %c-1_i32 : i32 to vector<32x64xi32>
    %8 = arith.addi %6, %7 : vector<32x64xi32>
    %9 = arith.cmpi eq, %3, %8 : vector<32x64xi32>
    %cst_2 = arith.constant 1.000000e+00 : f32
    %cst_3 = arith.constant 0.000000e+00 : f32
    %10 = vector.broadcast %cst_2 : f32 to vector<32x64xf32>
    %11 = vector.broadcast %cst_3 : f32 to vector<32x64xf32>
    %12 = arith.select %9, %10, %11 : vector<32x64xi1>, vector<32x64xf32>
    %13 = arith.truncf %12 : vector<32x64xf32> to vector<32x64xbf16>
    %cst_4 = arith.constant dense<0.000000e+00> : vector<32x96xf32>
    %14 = tpu.matmul %13, %1, %cst_4 {dimension_numbers = #tpu.dot_dimension_numbers<[1], [0], [0], [1], [0, 0, 1, 1], [], []>} : vector<32x64xbf16>, vector<64x96xbf16>, vector<32x96xf32> -> vector<32x96xf32>
    %15 = arith.truncf %14 : vector<32x96xf32> to vector<32x96xbf16>
    %c0_5 = arith.constant 0 : index
    %c0_6 = arith.constant 0 : index
    %16 = vector.load %arg2[%c0_5, %c0_6] : memref<384x192xbf16, #tpu.memory_space<vmem>>, vector<96x192xbf16>
    %cst_7 = arith.constant dense<0.000000e+00> : vector<32x192xf32>
    %17 = tpu.matmul %15, %16, %cst_7 {dimension_numbers = #tpu.dot_dimension_numbers<[1], [0], [0], [1], [0, 0, 1, 1], [], []>} : vector<32x96xbf16>, vector<96x192xbf16>, vector<32x192xf32> -> vector<32x192xf32>
    %18 = arith.addf %4, %17 : vector<32x192xf32>
    %c2_i32_8 = arith.constant 2 : i32
    %19 = vector.broadcast %c2_i32_8 : i32 to vector<32x64xi32>
    %20 = arith.muli %19, %2 : vector<32x64xi32>
    %c0_i32 = arith.constant 0 : i32
    %21 = vector.broadcast %c0_i32 : i32 to vector<32x64xi32>
    %22 = arith.addi %20, %21 : vector<32x64xi32>
    %23 = arith.cmpi eq, %3, %22 : vector<32x64xi32>
    %cst_9 = arith.constant 1.000000e+00 : f32
    %cst_10 = arith.constant 0.000000e+00 : f32
    %24 = vector.broadcast %cst_9 : f32 to vector<32x64xf32>
    %25 = vector.broadcast %cst_10 : f32 to vector<32x64xf32>
    %26 = arith.select %23, %24, %25 : vector<32x64xi1>, vector<32x64xf32>
    %27 = arith.truncf %26 : vector<32x64xf32> to vector<32x64xbf16>
    %cst_11 = arith.constant dense<0.000000e+00> : vector<32x96xf32>
    %28 = tpu.matmul %27, %1, %cst_11 {dimension_numbers = #tpu.dot_dimension_numbers<[1], [0], [0], [1], [0, 0, 1, 1], [], []>} : vector<32x64xbf16>, vector<64x96xbf16>, vector<32x96xf32> -> vector<32x96xf32>
    %29 = arith.truncf %28 : vector<32x96xf32> to vector<32x96xbf16>
    %c96 = arith.constant 96 : index
    %c0_12 = arith.constant 0 : index
    %30 = vector.load %arg2[%c96, %c0_12] : memref<384x192xbf16, #tpu.memory_space<vmem>>, vector<96x192xbf16>
    %cst_13 = arith.constant dense<0.000000e+00> : vector<32x192xf32>
    %31 = tpu.matmul %29, %30, %cst_13 {dimension_numbers = #tpu.dot_dimension_numbers<[1], [0], [0], [1], [0, 0, 1, 1], [], []>} : vector<32x96xbf16>, vector<96x192xbf16>, vector<32x192xf32> -> vector<32x192xf32>
    %32 = arith.addf %18, %31 : vector<32x192xf32>
    %c2_i32_14 = arith.constant 2 : i32
    %33 = vector.broadcast %c2_i32_14 : i32 to vector<32x64xi32>
    %34 = arith.muli %33, %2 : vector<32x64xi32>
    %c1_i32 = arith.constant 1 : i32
    %35 = vector.broadcast %c1_i32 : i32 to vector<32x64xi32>
    %36 = arith.addi %34, %35 : vector<32x64xi32>
    %37 = arith.cmpi eq, %3, %36 : vector<32x64xi32>
    %cst_15 = arith.constant 1.000000e+00 : f32
    %cst_16 = arith.constant 0.000000e+00 : f32
    %38 = vector.broadcast %cst_15 : f32 to vector<32x64xf32>
    %39 = vector.broadcast %cst_16 : f32 to vector<32x64xf32>
    %40 = arith.select %37, %38, %39 : vector<32x64xi1>, vector<32x64xf32>
    %41 = arith.truncf %40 : vector<32x64xf32> to vector<32x64xbf16>
    %cst_17 = arith.constant dense<0.000000e+00> : vector<32x96xf32>
    %42 = tpu.matmul %41, %1, %cst_17 {dimension_numbers = #tpu.dot_dimension_numbers<[1], [0], [0], [1], [0, 0, 1, 1], [], []>} : vector<32x64xbf16>, vector<64x96xbf16>, vector<32x96xf32> -> vector<32x96xf32>
    %43 = arith.truncf %42 : vector<32x96xf32> to vector<32x96xbf16>
    %c192 = arith.constant 192 : index
    %c0_18 = arith.constant 0 : index
    %44 = vector.load %arg2[%c192, %c0_18] : memref<384x192xbf16, #tpu.memory_space<vmem>>, vector<96x192xbf16>
    %cst_19 = arith.constant dense<0.000000e+00> : vector<32x192xf32>
    %45 = tpu.matmul %43, %44, %cst_19 {dimension_numbers = #tpu.dot_dimension_numbers<[1], [0], [0], [1], [0, 0, 1, 1], [], []>} : vector<32x96xbf16>, vector<96x192xbf16>, vector<32x192xf32> -> vector<32x192xf32>
    %46 = arith.addf %32, %45 : vector<32x192xf32>
    %c2_i32_20 = arith.constant 2 : i32
    %47 = vector.broadcast %c2_i32_20 : i32 to vector<32x64xi32>
    %48 = arith.muli %47, %2 : vector<32x64xi32>
    %c2_i32_21 = arith.constant 2 : i32
    %49 = vector.broadcast %c2_i32_21 : i32 to vector<32x64xi32>
    %50 = arith.addi %48, %49 : vector<32x64xi32>
    %51 = arith.cmpi eq, %3, %50 : vector<32x64xi32>
    %cst_22 = arith.constant 1.000000e+00 : f32
    %cst_23 = arith.constant 0.000000e+00 : f32
    %52 = vector.broadcast %cst_22 : f32 to vector<32x64xf32>
    %53 = vector.broadcast %cst_23 : f32 to vector<32x64xf32>
    %54 = arith.select %51, %52, %53 : vector<32x64xi1>, vector<32x64xf32>
    %55 = arith.truncf %54 : vector<32x64xf32> to vector<32x64xbf16>
    %cst_24 = arith.constant dense<0.000000e+00> : vector<32x96xf32>
    %56 = tpu.matmul %55, %1, %cst_24 {dimension_numbers = #tpu.dot_dimension_numbers<[1], [0], [0], [1], [0, 0, 1, 1], [], []>} : vector<32x64xbf16>, vector<64x96xbf16>, vector<32x96xf32> -> vector<32x96xf32>
    %57 = arith.truncf %56 : vector<32x96xf32> to vector<32x96xbf16>
    %c288 = arith.constant 288 : index
    %c0_25 = arith.constant 0 : index
    %58 = vector.load %arg2[%c288, %c0_25] : memref<384x192xbf16, #tpu.memory_space<vmem>>, vector<96x192xbf16>
    %cst_26 = arith.constant dense<0.000000e+00> : vector<32x192xf32>
    %59 = tpu.matmul %57, %58, %cst_26 {dimension_numbers = #tpu.dot_dimension_numbers<[1], [0], [0], [1], [0, 0, 1, 1], [], []>} : vector<32x96xbf16>, vector<96x192xbf16>, vector<32x192xf32> -> vector<32x192xf32>
    %60 = arith.addf %46, %59 : vector<32x192xf32>
    %c0_27 = arith.constant 0 : index
    %c0_28 = arith.constant 0 : index
    %61 = vector.load %arg7[%c0_27, %c0_28] : memref<1x192xf32, #tpu.memory_space<vmem>>, vector<1x192xf32>
    %62 = vector.broadcast %61 : vector<1x192xf32> to vector<32x192xf32>
    %63 = arith.addf %60, %62 : vector<32x192xf32>
    %cst_29 = arith.constant 0.000000e+00 : f32
    %64 = vector.broadcast %cst_29 : f32 to vector<32x192xf32>
    %65 = arith.cmpf ogt, %63, %64 : vector<32x192xf32>
    %cst_30 = arith.constant 2.000000e-01 : f32
    %66 = vector.broadcast %cst_30 : f32 to vector<32x192xf32>
    %67 = arith.mulf %66, %63 : vector<32x192xf32>
    %68 = arith.select %65, %63, %67 : vector<32x192xi1>, vector<32x192xf32>
    %69 = arith.truncf %68 : vector<32x192xf32> to vector<32x192xbf16>
    %70 = tpu.iota {dimensions = array<i32: 0>} : vector<16x32xi32>
    %71 = tpu.iota {dimensions = array<i32: 1>} : vector<16x32xi32>
    %cst_31 = arith.constant 0.000000e+00 : f32
    %72 = vector.broadcast %cst_31 : f32 to vector<16x192xf32>
    %c2_i32_32 = arith.constant 2 : i32
    %73 = vector.broadcast %c2_i32_32 : i32 to vector<16x32xi32>
    %74 = arith.muli %73, %70 : vector<16x32xi32>
    %c-1_i32_33 = arith.constant -1 : i32
    %75 = vector.broadcast %c-1_i32_33 : i32 to vector<16x32xi32>
    %76 = arith.addi %74, %75 : vector<16x32xi32>
    %77 = arith.cmpi eq, %71, %76 : vector<16x32xi32>
    %cst_34 = arith.constant 1.000000e+00 : f32
    %cst_35 = arith.constant 0.000000e+00 : f32
    %78 = vector.broadcast %cst_34 : f32 to vector<16x32xf32>
    %79 = vector.broadcast %cst_35 : f32 to vector<16x32xf32>
    %80 = arith.select %77, %78, %79 : vector<16x32xi1>, vector<16x32xf32>
    %81 = arith.truncf %80 : vector<16x32xf32> to vector<16x32xbf16>
    %cst_36 = arith.constant dense<0.000000e+00> : vector<16x192xf32>
    %82 = tpu.matmul %81, %69, %cst_36 {dimension_numbers = #tpu.dot_dimension_numbers<[1], [0], [0], [1], [0, 0, 1, 1], [], []>} : vector<16x32xbf16>, vector<32x192xbf16>, vector<16x192xf32> -> vector<16x192xf32>
    %83 = arith.truncf %82 : vector<16x192xf32> to vector<16x192xbf16>
    %c0_37 = arith.constant 0 : index
    %c0_38 = arith.constant 0 : index
    %84 = vector.load %arg3[%c0_37, %c0_38] : memref<768x192xbf16, #tpu.memory_space<vmem>>, vector<192x192xbf16>
    %cst_39 = arith.constant dense<0.000000e+00> : vector<16x192xf32>
    %85 = tpu.matmul %83, %84, %cst_39 {dimension_numbers = #tpu.dot_dimension_numbers<[1], [0], [0], [1], [0, 0, 1, 1], [], []>} : vector<16x192xbf16>, vector<192x192xbf16>, vector<16x192xf32> -> vector<16x192xf32>
    %86 = arith.addf %72, %85 : vector<16x192xf32>
    %c2_i32_40 = arith.constant 2 : i32
    %87 = vector.broadcast %c2_i32_40 : i32 to vector<16x32xi32>
    %88 = arith.muli %87, %70 : vector<16x32xi32>
    %c0_i32_41 = arith.constant 0 : i32
    %89 = vector.broadcast %c0_i32_41 : i32 to vector<16x32xi32>
    %90 = arith.addi %88, %89 : vector<16x32xi32>
    %91 = arith.cmpi eq, %71, %90 : vector<16x32xi32>
    %cst_42 = arith.constant 1.000000e+00 : f32
    %cst_43 = arith.constant 0.000000e+00 : f32
    %92 = vector.broadcast %cst_42 : f32 to vector<16x32xf32>
    %93 = vector.broadcast %cst_43 : f32 to vector<16x32xf32>
    %94 = arith.select %91, %92, %93 : vector<16x32xi1>, vector<16x32xf32>
    %95 = arith.truncf %94 : vector<16x32xf32> to vector<16x32xbf16>
    %cst_44 = arith.constant dense<0.000000e+00> : vector<16x192xf32>
    %96 = tpu.matmul %95, %69, %cst_44 {dimension_numbers = #tpu.dot_dimension_numbers<[1], [0], [0], [1], [0, 0, 1, 1], [], []>} : vector<16x32xbf16>, vector<32x192xbf16>, vector<16x192xf32> -> vector<16x192xf32>
    %97 = arith.truncf %96 : vector<16x192xf32> to vector<16x192xbf16>
    %c192_45 = arith.constant 192 : index
    %c0_46 = arith.constant 0 : index
    %98 = vector.load %arg3[%c192_45, %c0_46] : memref<768x192xbf16, #tpu.memory_space<vmem>>, vector<192x192xbf16>
    %cst_47 = arith.constant dense<0.000000e+00> : vector<16x192xf32>
    %99 = tpu.matmul %97, %98, %cst_47 {dimension_numbers = #tpu.dot_dimension_numbers<[1], [0], [0], [1], [0, 0, 1, 1], [], []>} : vector<16x192xbf16>, vector<192x192xbf16>, vector<16x192xf32> -> vector<16x192xf32>
    %100 = arith.addf %86, %99 : vector<16x192xf32>
    %c2_i32_48 = arith.constant 2 : i32
    %101 = vector.broadcast %c2_i32_48 : i32 to vector<16x32xi32>
    %102 = arith.muli %101, %70 : vector<16x32xi32>
    %c1_i32_49 = arith.constant 1 : i32
    %103 = vector.broadcast %c1_i32_49 : i32 to vector<16x32xi32>
    %104 = arith.addi %102, %103 : vector<16x32xi32>
    %105 = arith.cmpi eq, %71, %104 : vector<16x32xi32>
    %cst_50 = arith.constant 1.000000e+00 : f32
    %cst_51 = arith.constant 0.000000e+00 : f32
    %106 = vector.broadcast %cst_50 : f32 to vector<16x32xf32>
    %107 = vector.broadcast %cst_51 : f32 to vector<16x32xf32>
    %108 = arith.select %105, %106, %107 : vector<16x32xi1>, vector<16x32xf32>
    %109 = arith.truncf %108 : vector<16x32xf32> to vector<16x32xbf16>
    %cst_52 = arith.constant dense<0.000000e+00> : vector<16x192xf32>
    %110 = tpu.matmul %109, %69, %cst_52 {dimension_numbers = #tpu.dot_dimension_numbers<[1], [0], [0], [1], [0, 0, 1, 1], [], []>} : vector<16x32xbf16>, vector<32x192xbf16>, vector<16x192xf32> -> vector<16x192xf32>
    %111 = arith.truncf %110 : vector<16x192xf32> to vector<16x192xbf16>
    %c384 = arith.constant 384 : index
    %c0_53 = arith.constant 0 : index
    %112 = vector.load %arg3[%c384, %c0_53] : memref<768x192xbf16, #tpu.memory_space<vmem>>, vector<192x192xbf16>
    %cst_54 = arith.constant dense<0.000000e+00> : vector<16x192xf32>
    %113 = tpu.matmul %111, %112, %cst_54 {dimension_numbers = #tpu.dot_dimension_numbers<[1], [0], [0], [1], [0, 0, 1, 1], [], []>} : vector<16x192xbf16>, vector<192x192xbf16>, vector<16x192xf32> -> vector<16x192xf32>
    %114 = arith.addf %100, %113 : vector<16x192xf32>
    %c2_i32_55 = arith.constant 2 : i32
    %115 = vector.broadcast %c2_i32_55 : i32 to vector<16x32xi32>
    %116 = arith.muli %115, %70 : vector<16x32xi32>
    %c2_i32_56 = arith.constant 2 : i32
    %117 = vector.broadcast %c2_i32_56 : i32 to vector<16x32xi32>
    %118 = arith.addi %116, %117 : vector<16x32xi32>
    %119 = arith.cmpi eq, %71, %118 : vector<16x32xi32>
    %cst_57 = arith.constant 1.000000e+00 : f32
    %cst_58 = arith.constant 0.000000e+00 : f32
    %120 = vector.broadcast %cst_57 : f32 to vector<16x32xf32>
    %121 = vector.broadcast %cst_58 : f32 to vector<16x32xf32>
    %122 = arith.select %119, %120, %121 : vector<16x32xi1>, vector<16x32xf32>
    %123 = arith.truncf %122 : vector<16x32xf32> to vector<16x32xbf16>
    %cst_59 = arith.constant dense<0.000000e+00> : vector<16x192xf32>
    %124 = tpu.matmul %123, %69, %cst_59 {dimension_numbers = #tpu.dot_dimension_numbers<[1], [0], [0], [1], [0, 0, 1, 1], [], []>} : vector<16x32xbf16>, vector<32x192xbf16>, vector<16x192xf32> -> vector<16x192xf32>
    %125 = arith.truncf %124 : vector<16x192xf32> to vector<16x192xbf16>
    %c576 = arith.constant 576 : index
    %c0_60 = arith.constant 0 : index
    %126 = vector.load %arg3[%c576, %c0_60] : memref<768x192xbf16, #tpu.memory_space<vmem>>, vector<192x192xbf16>
    %cst_61 = arith.constant dense<0.000000e+00> : vector<16x192xf32>
    %127 = tpu.matmul %125, %126, %cst_61 {dimension_numbers = #tpu.dot_dimension_numbers<[1], [0], [0], [1], [0, 0, 1, 1], [], []>} : vector<16x192xbf16>, vector<192x192xbf16>, vector<16x192xf32> -> vector<16x192xf32>
    %128 = arith.addf %114, %127 : vector<16x192xf32>
    %129 = tpu.iota {dimensions = array<i32: 0>} : vector<192x8xi32>
    %130 = tpu.iota {dimensions = array<i32: 1>} : vector<192x8xi32>
    %c24_i32 = arith.constant 24 : i32
    %131 = vector.broadcast %c24_i32 : i32 to vector<192x8xi32>
    %132 = arith.muli %130, %131 : vector<192x8xi32>
    %133 = arith.cmpi sge, %129, %132 : vector<192x8xi32>
    %c1_i32_62 = arith.constant 1 : i32
    %134 = vector.broadcast %c1_i32_62 : i32 to vector<192x8xi32>
    %135 = arith.addi %130, %134 : vector<192x8xi32>
    %c24_i32_63 = arith.constant 24 : i32
    %136 = vector.broadcast %c24_i32_63 : i32 to vector<192x8xi32>
    %137 = arith.muli %135, %136 : vector<192x8xi32>
    %138 = arith.cmpi slt, %129, %137 : vector<192x8xi32>
    %139 = arith.andi %133, %138 : vector<192x8xi1>
    %cst_64 = arith.constant 1.000000e+00 : f32
    %cst_65 = arith.constant 0.000000e+00 : f32
    %140 = vector.broadcast %cst_64 : f32 to vector<192x8xf32>
    %141 = vector.broadcast %cst_65 : f32 to vector<192x8xf32>
    %142 = arith.select %139, %140, %141 : vector<192x8xi1>, vector<192x8xf32>
    %143 = tpu.iota {dimensions = array<i32: 0>} : vector<8x192xi32>
    %144 = tpu.iota {dimensions = array<i32: 1>} : vector<8x192xi32>
    %c24_i32_66 = arith.constant 24 : i32
    %145 = vector.broadcast %c24_i32_66 : i32 to vector<8x192xi32>
    %146 = arith.muli %143, %145 : vector<8x192xi32>
    %147 = arith.cmpi sge, %144, %146 : vector<8x192xi32>
    %c1_i32_67 = arith.constant 1 : i32
    %148 = vector.broadcast %c1_i32_67 : i32 to vector<8x192xi32>
    %149 = arith.addi %143, %148 : vector<8x192xi32>
    %c24_i32_68 = arith.constant 24 : i32
    %150 = vector.broadcast %c24_i32_68 : i32 to vector<8x192xi32>
    %151 = arith.muli %149, %150 : vector<8x192xi32>
    %152 = arith.cmpi slt, %144, %151 : vector<8x192xi32>
    %153 = arith.andi %147, %152 : vector<8x192xi1>
    %cst_69 = arith.constant 1.000000e+00 : f32
    %cst_70 = arith.constant 0.000000e+00 : f32
    %154 = vector.broadcast %cst_69 : f32 to vector<8x192xf32>
    %155 = vector.broadcast %cst_70 : f32 to vector<8x192xf32>
    %156 = arith.select %153, %154, %155 : vector<8x192xi1>, vector<8x192xf32>
    %cst_71 = arith.constant dense<0.000000e+00> : vector<192xf32>
    %157 = vector.multi_reduction <add>, %128, %cst_71 [0] : vector<16x192xf32> to vector<192xf32>
    %158 = vector.shape_cast %157 : vector<192xf32> to vector<1x192xf32>
    %cst_72 = arith.constant dense<0.000000e+00> : vector<1x8xf32>
    %159 = tpu.matmul %158, %142, %cst_72 {dimension_numbers = #tpu.dot_dimension_numbers<[1], [0], [0], [1], [0, 0, 1, 1], [], []>} : vector<1x192xf32>, vector<192x8xf32>, vector<1x8xf32> -> vector<1x8xf32>
    %160 = arith.mulf %128, %128 : vector<16x192xf32>
    %cst_73 = arith.constant dense<0.000000e+00> : vector<192xf32>
    %161 = vector.multi_reduction <add>, %160, %cst_73 [0] : vector<16x192xf32> to vector<192xf32>
    %162 = vector.shape_cast %161 : vector<192xf32> to vector<1x192xf32>
    %cst_74 = arith.constant dense<0.000000e+00> : vector<1x8xf32>
    %163 = tpu.matmul %162, %142, %cst_74 {dimension_numbers = #tpu.dot_dimension_numbers<[1], [0], [0], [1], [0, 0, 1, 1], [], []>} : vector<1x192xf32>, vector<192x8xf32>, vector<1x8xf32> -> vector<1x8xf32>
    %cst_75 = arith.constant 0.00260416674 : f32
    %164 = vector.broadcast %cst_75 : f32 to vector<1x8xf32>
    %165 = arith.mulf %159, %164 : vector<1x8xf32>
    %cst_76 = arith.constant 0.00260416674 : f32
    %166 = vector.broadcast %cst_76 : f32 to vector<1x8xf32>
    %167 = arith.mulf %163, %166 : vector<1x8xf32>
    %168 = arith.mulf %165, %165 : vector<1x8xf32>
    %169 = arith.subf %167, %168 : vector<1x8xf32>
    %cst_77 = arith.constant 0.000000e+00 : f32
    %170 = vector.broadcast %cst_77 : f32 to vector<1x8xf32>
    %171 = arith.maximumf %169, %170 : vector<1x8xf32>
    %cst_78 = arith.constant 9.99999974E-6 : f32
    %172 = vector.broadcast %cst_78 : f32 to vector<1x8xf32>
    %173 = arith.addf %171, %172 : vector<1x8xf32>
    %174 = math.rsqrt %173 : vector<1x8xf32>
    %cst_79 = arith.constant dense<0.000000e+00> : vector<1x192xf32>
    %175 = tpu.matmul %165, %156, %cst_79 {dimension_numbers = #tpu.dot_dimension_numbers<[1], [0], [0], [1], [0, 0, 1, 1], [], []>} : vector<1x8xf32>, vector<8x192xf32>, vector<1x192xf32> -> vector<1x192xf32>
    %cst_80 = arith.constant dense<0.000000e+00> : vector<1x192xf32>
    %176 = tpu.matmul %174, %156, %cst_80 {dimension_numbers = #tpu.dot_dimension_numbers<[1], [0], [0], [1], [0, 0, 1, 1], [], []>} : vector<1x8xf32>, vector<8x192xf32>, vector<1x192xf32> -> vector<1x192xf32>
    %177 = vector.broadcast %175 : vector<1x192xf32> to vector<16x192xf32>
    %178 = arith.subf %128, %177 : vector<16x192xf32>
    %179 = vector.broadcast %176 : vector<1x192xf32> to vector<16x192xf32>
    %180 = arith.mulf %178, %179 : vector<16x192xf32>
    %cst_81 = arith.constant 0.000000e+00 : f32
    %181 = vector.broadcast %cst_81 : f32 to vector<16x192xf32>
    %182 = arith.cmpf ogt, %180, %181 : vector<16x192xf32>
    %cst_82 = arith.constant 2.000000e-01 : f32
    %183 = vector.broadcast %cst_82 : f32 to vector<16x192xf32>
    %184 = arith.mulf %183, %180 : vector<16x192xf32>
    %185 = arith.select %182, %180, %184 : vector<16x192xi1>, vector<16x192xf32>
    %186 = arith.truncf %185 : vector<16x192xf32> to vector<16x192xbf16>
    %187 = tpu.iota {dimensions = array<i32: 0>} : vector<8x16xi32>
    %188 = tpu.iota {dimensions = array<i32: 1>} : vector<8x16xi32>
    %cst_83 = arith.constant 0.000000e+00 : f32
    %189 = vector.broadcast %cst_83 : f32 to vector<8x192xf32>
    %c2_i32_84 = arith.constant 2 : i32
    %190 = vector.broadcast %c2_i32_84 : i32 to vector<8x16xi32>
    %191 = arith.muli %190, %187 : vector<8x16xi32>
    %c-1_i32_85 = arith.constant -1 : i32
    %192 = vector.broadcast %c-1_i32_85 : i32 to vector<8x16xi32>
    %193 = arith.addi %191, %192 : vector<8x16xi32>
    %194 = arith.cmpi eq, %188, %193 : vector<8x16xi32>
    %cst_86 = arith.constant 1.000000e+00 : f32
    %cst_87 = arith.constant 0.000000e+00 : f32
    %195 = vector.broadcast %cst_86 : f32 to vector<8x16xf32>
    %196 = vector.broadcast %cst_87 : f32 to vector<8x16xf32>
    %197 = arith.select %194, %195, %196 : vector<8x16xi1>, vector<8x16xf32>
    %198 = arith.truncf %197 : vector<8x16xf32> to vector<8x16xbf16>
    %cst_88 = arith.constant dense<0.000000e+00> : vector<8x192xf32>
    %199 = tpu.matmul %198, %186, %cst_88 {dimension_numbers = #tpu.dot_dimension_numbers<[1], [0], [0], [1], [0, 0, 1, 1], [], []>} : vector<8x16xbf16>, vector<16x192xbf16>, vector<8x192xf32> -> vector<8x192xf32>
    %200 = arith.truncf %199 : vector<8x192xf32> to vector<8x192xbf16>
    %c0_89 = arith.constant 0 : index
    %c0_90 = arith.constant 0 : index
    %201 = vector.load %arg4[%c0_89, %c0_90] : memref<768x192xbf16, #tpu.memory_space<vmem>>, vector<192x192xbf16>
    %cst_91 = arith.constant dense<0.000000e+00> : vector<8x192xf32>
    %202 = tpu.matmul %200, %201, %cst_91 {dimension_numbers = #tpu.dot_dimension_numbers<[1], [0], [0], [1], [0, 0, 1, 1], [], []>} : vector<8x192xbf16>, vector<192x192xbf16>, vector<8x192xf32> -> vector<8x192xf32>
    %203 = arith.addf %189, %202 : vector<8x192xf32>
    %c2_i32_92 = arith.constant 2 : i32
    %204 = vector.broadcast %c2_i32_92 : i32 to vector<8x16xi32>
    %205 = arith.muli %204, %187 : vector<8x16xi32>
    %c0_i32_93 = arith.constant 0 : i32
    %206 = vector.broadcast %c0_i32_93 : i32 to vector<8x16xi32>
    %207 = arith.addi %205, %206 : vector<8x16xi32>
    %208 = arith.cmpi eq, %188, %207 : vector<8x16xi32>
    %cst_94 = arith.constant 1.000000e+00 : f32
    %cst_95 = arith.constant 0.000000e+00 : f32
    %209 = vector.broadcast %cst_94 : f32 to vector<8x16xf32>
    %210 = vector.broadcast %cst_95 : f32 to vector<8x16xf32>
    %211 = arith.select %208, %209, %210 : vector<8x16xi1>, vector<8x16xf32>
    %212 = arith.truncf %211 : vector<8x16xf32> to vector<8x16xbf16>
    %cst_96 = arith.constant dense<0.000000e+00> : vector<8x192xf32>
    %213 = tpu.matmul %212, %186, %cst_96 {dimension_numbers = #tpu.dot_dimension_numbers<[1], [0], [0], [1], [0, 0, 1, 1], [], []>} : vector<8x16xbf16>, vector<16x192xbf16>, vector<8x192xf32> -> vector<8x192xf32>
    %214 = arith.truncf %213 : vector<8x192xf32> to vector<8x192xbf16>
    %c192_97 = arith.constant 192 : index
    %c0_98 = arith.constant 0 : index
    %215 = vector.load %arg4[%c192_97, %c0_98] : memref<768x192xbf16, #tpu.memory_space<vmem>>, vector<192x192xbf16>
    %cst_99 = arith.constant dense<0.000000e+00> : vector<8x192xf32>
    %216 = tpu.matmul %214, %215, %cst_99 {dimension_numbers = #tpu.dot_dimension_numbers<[1], [0], [0], [1], [0, 0, 1, 1], [], []>} : vector<8x192xbf16>, vector<192x192xbf16>, vector<8x192xf32> -> vector<8x192xf32>
    %217 = arith.addf %203, %216 : vector<8x192xf32>
    %c2_i32_100 = arith.constant 2 : i32
    %218 = vector.broadcast %c2_i32_100 : i32 to vector<8x16xi32>
    %219 = arith.muli %218, %187 : vector<8x16xi32>
    %c1_i32_101 = arith.constant 1 : i32
    %220 = vector.broadcast %c1_i32_101 : i32 to vector<8x16xi32>
    %221 = arith.addi %219, %220 : vector<8x16xi32>
    %222 = arith.cmpi eq, %188, %221 : vector<8x16xi32>
    %cst_102 = arith.constant 1.000000e+00 : f32
    %cst_103 = arith.constant 0.000000e+00 : f32
    %223 = vector.broadcast %cst_102 : f32 to vector<8x16xf32>
    %224 = vector.broadcast %cst_103 : f32 to vector<8x16xf32>
    %225 = arith.select %222, %223, %224 : vector<8x16xi1>, vector<8x16xf32>
    %226 = arith.truncf %225 : vector<8x16xf32> to vector<8x16xbf16>
    %cst_104 = arith.constant dense<0.000000e+00> : vector<8x192xf32>
    %227 = tpu.matmul %226, %186, %cst_104 {dimension_numbers = #tpu.dot_dimension_numbers<[1], [0], [0], [1], [0, 0, 1, 1], [], []>} : vector<8x16xbf16>, vector<16x192xbf16>, vector<8x192xf32> -> vector<8x192xf32>
    %228 = arith.truncf %227 : vector<8x192xf32> to vector<8x192xbf16>
    %c384_105 = arith.constant 384 : index
    %c0_106 = arith.constant 0 : index
    %229 = vector.load %arg4[%c384_105, %c0_106] : memref<768x192xbf16, #tpu.memory_space<vmem>>, vector<192x192xbf16>
    %cst_107 = arith.constant dense<0.000000e+00> : vector<8x192xf32>
    %230 = tpu.matmul %228, %229, %cst_107 {dimension_numbers = #tpu.dot_dimension_numbers<[1], [0], [0], [1], [0, 0, 1, 1], [], []>} : vector<8x192xbf16>, vector<192x192xbf16>, vector<8x192xf32> -> vector<8x192xf32>
    %231 = arith.addf %217, %230 : vector<8x192xf32>
    %c2_i32_108 = arith.constant 2 : i32
    %232 = vector.broadcast %c2_i32_108 : i32 to vector<8x16xi32>
    %233 = arith.muli %232, %187 : vector<8x16xi32>
    %c2_i32_109 = arith.constant 2 : i32
    %234 = vector.broadcast %c2_i32_109 : i32 to vector<8x16xi32>
    %235 = arith.addi %233, %234 : vector<8x16xi32>
    %236 = arith.cmpi eq, %188, %235 : vector<8x16xi32>
    %cst_110 = arith.constant 1.000000e+00 : f32
    %cst_111 = arith.constant 0.000000e+00 : f32
    %237 = vector.broadcast %cst_110 : f32 to vector<8x16xf32>
    %238 = vector.broadcast %cst_111 : f32 to vector<8x16xf32>
    %239 = arith.select %236, %237, %238 : vector<8x16xi1>, vector<8x16xf32>
    %240 = arith.truncf %239 : vector<8x16xf32> to vector<8x16xbf16>
    %cst_112 = arith.constant dense<0.000000e+00> : vector<8x192xf32>
    %241 = tpu.matmul %240, %186, %cst_112 {dimension_numbers = #tpu.dot_dimension_numbers<[1], [0], [0], [1], [0, 0, 1, 1], [], []>} : vector<8x16xbf16>, vector<16x192xbf16>, vector<8x192xf32> -> vector<8x192xf32>
    %242 = arith.truncf %241 : vector<8x192xf32> to vector<8x192xbf16>
    %c576_113 = arith.constant 576 : index
    %c0_114 = arith.constant 0 : index
    %243 = vector.load %arg4[%c576_113, %c0_114] : memref<768x192xbf16, #tpu.memory_space<vmem>>, vector<192x192xbf16>
    %cst_115 = arith.constant dense<0.000000e+00> : vector<8x192xf32>
    %244 = tpu.matmul %242, %243, %cst_115 {dimension_numbers = #tpu.dot_dimension_numbers<[1], [0], [0], [1], [0, 0, 1, 1], [], []>} : vector<8x192xbf16>, vector<192x192xbf16>, vector<8x192xf32> -> vector<8x192xf32>
    %245 = arith.addf %231, %244 : vector<8x192xf32>
    %246 = tpu.iota {dimensions = array<i32: 0>} : vector<192x16xi32>
    %247 = tpu.iota {dimensions = array<i32: 1>} : vector<192x16xi32>
    %c12_i32 = arith.constant 12 : i32
    %248 = vector.broadcast %c12_i32 : i32 to vector<192x16xi32>
    %249 = arith.muli %247, %248 : vector<192x16xi32>
    %250 = arith.cmpi sge, %246, %249 : vector<192x16xi32>
    %c1_i32_116 = arith.constant 1 : i32
    %251 = vector.broadcast %c1_i32_116 : i32 to vector<192x16xi32>
    %252 = arith.addi %247, %251 : vector<192x16xi32>
    %c12_i32_117 = arith.constant 12 : i32
    %253 = vector.broadcast %c12_i32_117 : i32 to vector<192x16xi32>
    %254 = arith.muli %252, %253 : vector<192x16xi32>
    %255 = arith.cmpi slt, %246, %254 : vector<192x16xi32>
    %256 = arith.andi %250, %255 : vector<192x16xi1>
    %cst_118 = arith.constant 1.000000e+00 : f32
    %cst_119 = arith.constant 0.000000e+00 : f32
    %257 = vector.broadcast %cst_118 : f32 to vector<192x16xf32>
    %258 = vector.broadcast %cst_119 : f32 to vector<192x16xf32>
    %259 = arith.select %256, %257, %258 : vector<192x16xi1>, vector<192x16xf32>
    %260 = tpu.iota {dimensions = array<i32: 0>} : vector<16x192xi32>
    %261 = tpu.iota {dimensions = array<i32: 1>} : vector<16x192xi32>
    %c12_i32_120 = arith.constant 12 : i32
    %262 = vector.broadcast %c12_i32_120 : i32 to vector<16x192xi32>
    %263 = arith.muli %260, %262 : vector<16x192xi32>
    %264 = arith.cmpi sge, %261, %263 : vector<16x192xi32>
    %c1_i32_121 = arith.constant 1 : i32
    %265 = vector.broadcast %c1_i32_121 : i32 to vector<16x192xi32>
    %266 = arith.addi %260, %265 : vector<16x192xi32>
    %c12_i32_122 = arith.constant 12 : i32
    %267 = vector.broadcast %c12_i32_122 : i32 to vector<16x192xi32>
    %268 = arith.muli %266, %267 : vector<16x192xi32>
    %269 = arith.cmpi slt, %261, %268 : vector<16x192xi32>
    %270 = arith.andi %264, %269 : vector<16x192xi1>
    %cst_123 = arith.constant 1.000000e+00 : f32
    %cst_124 = arith.constant 0.000000e+00 : f32
    %271 = vector.broadcast %cst_123 : f32 to vector<16x192xf32>
    %272 = vector.broadcast %cst_124 : f32 to vector<16x192xf32>
    %273 = arith.select %270, %271, %272 : vector<16x192xi1>, vector<16x192xf32>
    %cst_125 = arith.constant dense<0.000000e+00> : vector<192xf32>
    %274 = vector.multi_reduction <add>, %245, %cst_125 [0] : vector<8x192xf32> to vector<192xf32>
    %275 = vector.shape_cast %274 : vector<192xf32> to vector<1x192xf32>
    %cst_126 = arith.constant dense<0.000000e+00> : vector<1x16xf32>
    %276 = tpu.matmul %275, %259, %cst_126 {dimension_numbers = #tpu.dot_dimension_numbers<[1], [0], [0], [1], [0, 0, 1, 1], [], []>} : vector<1x192xf32>, vector<192x16xf32>, vector<1x16xf32> -> vector<1x16xf32>
    %277 = arith.mulf %245, %245 : vector<8x192xf32>
    %cst_127 = arith.constant dense<0.000000e+00> : vector<192xf32>
    %278 = vector.multi_reduction <add>, %277, %cst_127 [0] : vector<8x192xf32> to vector<192xf32>
    %279 = vector.shape_cast %278 : vector<192xf32> to vector<1x192xf32>
    %cst_128 = arith.constant dense<0.000000e+00> : vector<1x16xf32>
    %280 = tpu.matmul %279, %259, %cst_128 {dimension_numbers = #tpu.dot_dimension_numbers<[1], [0], [0], [1], [0, 0, 1, 1], [], []>} : vector<1x192xf32>, vector<192x16xf32>, vector<1x16xf32> -> vector<1x16xf32>
    %cst_129 = arith.constant 0.010416667 : f32
    %281 = vector.broadcast %cst_129 : f32 to vector<1x16xf32>
    %282 = arith.mulf %276, %281 : vector<1x16xf32>
    %cst_130 = arith.constant 0.010416667 : f32
    %283 = vector.broadcast %cst_130 : f32 to vector<1x16xf32>
    %284 = arith.mulf %280, %283 : vector<1x16xf32>
    %285 = arith.mulf %282, %282 : vector<1x16xf32>
    %286 = arith.subf %284, %285 : vector<1x16xf32>
    %cst_131 = arith.constant 0.000000e+00 : f32
    %287 = vector.broadcast %cst_131 : f32 to vector<1x16xf32>
    %288 = arith.maximumf %286, %287 : vector<1x16xf32>
    %cst_132 = arith.constant 9.99999974E-6 : f32
    %289 = vector.broadcast %cst_132 : f32 to vector<1x16xf32>
    %290 = arith.addf %288, %289 : vector<1x16xf32>
    %291 = math.rsqrt %290 : vector<1x16xf32>
    %cst_133 = arith.constant dense<0.000000e+00> : vector<1x192xf32>
    %292 = tpu.matmul %282, %273, %cst_133 {dimension_numbers = #tpu.dot_dimension_numbers<[1], [0], [0], [1], [0, 0, 1, 1], [], []>} : vector<1x16xf32>, vector<16x192xf32>, vector<1x192xf32> -> vector<1x192xf32>
    %cst_134 = arith.constant dense<0.000000e+00> : vector<1x192xf32>
    %293 = tpu.matmul %291, %273, %cst_134 {dimension_numbers = #tpu.dot_dimension_numbers<[1], [0], [0], [1], [0, 0, 1, 1], [], []>} : vector<1x16xf32>, vector<16x192xf32>, vector<1x192xf32> -> vector<1x192xf32>
    %294 = vector.broadcast %292 : vector<1x192xf32> to vector<8x192xf32>
    %295 = arith.subf %245, %294 : vector<8x192xf32>
    %296 = vector.broadcast %293 : vector<1x192xf32> to vector<8x192xf32>
    %297 = arith.mulf %295, %296 : vector<8x192xf32>
    %cst_135 = arith.constant 0.000000e+00 : f32
    %298 = vector.broadcast %cst_135 : f32 to vector<8x192xf32>
    %299 = arith.cmpf ogt, %297, %298 : vector<8x192xf32>
    %cst_136 = arith.constant 2.000000e-01 : f32
    %300 = vector.broadcast %cst_136 : f32 to vector<8x192xf32>
    %301 = arith.mulf %300, %297 : vector<8x192xf32>
    %302 = arith.select %299, %297, %301 : vector<8x192xi1>, vector<8x192xf32>
    %303 = arith.truncf %302 : vector<8x192xf32> to vector<8x192xbf16>
    %304 = tpu.iota {dimensions = array<i32: 0>} : vector<4x8xi32>
    %305 = tpu.iota {dimensions = array<i32: 1>} : vector<4x8xi32>
    %cst_137 = arith.constant 0.000000e+00 : f32
    %306 = vector.broadcast %cst_137 : f32 to vector<4x192xf32>
    %c2_i32_138 = arith.constant 2 : i32
    %307 = vector.broadcast %c2_i32_138 : i32 to vector<4x8xi32>
    %308 = arith.muli %307, %304 : vector<4x8xi32>
    %c-1_i32_139 = arith.constant -1 : i32
    %309 = vector.broadcast %c-1_i32_139 : i32 to vector<4x8xi32>
    %310 = arith.addi %308, %309 : vector<4x8xi32>
    %311 = arith.cmpi eq, %305, %310 : vector<4x8xi32>
    %cst_140 = arith.constant 1.000000e+00 : f32
    %cst_141 = arith.constant 0.000000e+00 : f32
    %312 = vector.broadcast %cst_140 : f32 to vector<4x8xf32>
    %313 = vector.broadcast %cst_141 : f32 to vector<4x8xf32>
    %314 = arith.select %311, %312, %313 : vector<4x8xi1>, vector<4x8xf32>
    %315 = arith.truncf %314 : vector<4x8xf32> to vector<4x8xbf16>
    %cst_142 = arith.constant dense<0.000000e+00> : vector<4x192xf32>
    %316 = tpu.matmul %315, %303, %cst_142 {dimension_numbers = #tpu.dot_dimension_numbers<[1], [0], [0], [1], [0, 0, 1, 1], [], []>} : vector<4x8xbf16>, vector<8x192xbf16>, vector<4x192xf32> -> vector<4x192xf32>
    %317 = arith.truncf %316 : vector<4x192xf32> to vector<4x192xbf16>
    %c0_143 = arith.constant 0 : index
    %c0_144 = arith.constant 0 : index
    %318 = vector.load %arg5[%c0_143, %c0_144] : memref<768x192xbf16, #tpu.memory_space<vmem>>, vector<192x192xbf16>
    %cst_145 = arith.constant dense<0.000000e+00> : vector<4x192xf32>
    %319 = tpu.matmul %317, %318, %cst_145 {dimension_numbers = #tpu.dot_dimension_numbers<[1], [0], [0], [1], [0, 0, 1, 1], [], []>} : vector<4x192xbf16>, vector<192x192xbf16>, vector<4x192xf32> -> vector<4x192xf32>
    %320 = arith.addf %306, %319 : vector<4x192xf32>
    %c2_i32_146 = arith.constant 2 : i32
    %321 = vector.broadcast %c2_i32_146 : i32 to vector<4x8xi32>
    %322 = arith.muli %321, %304 : vector<4x8xi32>
    %c0_i32_147 = arith.constant 0 : i32
    %323 = vector.broadcast %c0_i32_147 : i32 to vector<4x8xi32>
    %324 = arith.addi %322, %323 : vector<4x8xi32>
    %325 = arith.cmpi eq, %305, %324 : vector<4x8xi32>
    %cst_148 = arith.constant 1.000000e+00 : f32
    %cst_149 = arith.constant 0.000000e+00 : f32
    %326 = vector.broadcast %cst_148 : f32 to vector<4x8xf32>
    %327 = vector.broadcast %cst_149 : f32 to vector<4x8xf32>
    %328 = arith.select %325, %326, %327 : vector<4x8xi1>, vector<4x8xf32>
    %329 = arith.truncf %328 : vector<4x8xf32> to vector<4x8xbf16>
    %cst_150 = arith.constant dense<0.000000e+00> : vector<4x192xf32>
    %330 = tpu.matmul %329, %303, %cst_150 {dimension_numbers = #tpu.dot_dimension_numbers<[1], [0], [0], [1], [0, 0, 1, 1], [], []>} : vector<4x8xbf16>, vector<8x192xbf16>, vector<4x192xf32> -> vector<4x192xf32>
    %331 = arith.truncf %330 : vector<4x192xf32> to vector<4x192xbf16>
    %c192_151 = arith.constant 192 : index
    %c0_152 = arith.constant 0 : index
    %332 = vector.load %arg5[%c192_151, %c0_152] : memref<768x192xbf16, #tpu.memory_space<vmem>>, vector<192x192xbf16>
    %cst_153 = arith.constant dense<0.000000e+00> : vector<4x192xf32>
    %333 = tpu.matmul %331, %332, %cst_153 {dimension_numbers = #tpu.dot_dimension_numbers<[1], [0], [0], [1], [0, 0, 1, 1], [], []>} : vector<4x192xbf16>, vector<192x192xbf16>, vector<4x192xf32> -> vector<4x192xf32>
    %334 = arith.addf %320, %333 : vector<4x192xf32>
    %c2_i32_154 = arith.constant 2 : i32
    %335 = vector.broadcast %c2_i32_154 : i32 to vector<4x8xi32>
    %336 = arith.muli %335, %304 : vector<4x8xi32>
    %c1_i32_155 = arith.constant 1 : i32
    %337 = vector.broadcast %c1_i32_155 : i32 to vector<4x8xi32>
    %338 = arith.addi %336, %337 : vector<4x8xi32>
    %339 = arith.cmpi eq, %305, %338 : vector<4x8xi32>
    %cst_156 = arith.constant 1.000000e+00 : f32
    %cst_157 = arith.constant 0.000000e+00 : f32
    %340 = vector.broadcast %cst_156 : f32 to vector<4x8xf32>
    %341 = vector.broadcast %cst_157 : f32 to vector<4x8xf32>
    %342 = arith.select %339, %340, %341 : vector<4x8xi1>, vector<4x8xf32>
    %343 = arith.truncf %342 : vector<4x8xf32> to vector<4x8xbf16>
    %cst_158 = arith.constant dense<0.000000e+00> : vector<4x192xf32>
    %344 = tpu.matmul %343, %303, %cst_158 {dimension_numbers = #tpu.dot_dimension_numbers<[1], [0], [0], [1], [0, 0, 1, 1], [], []>} : vector<4x8xbf16>, vector<8x192xbf16>, vector<4x192xf32> -> vector<4x192xf32>
    %345 = arith.truncf %344 : vector<4x192xf32> to vector<4x192xbf16>
    %c384_159 = arith.constant 384 : index
    %c0_160 = arith.constant 0 : index
    %346 = vector.load %arg5[%c384_159, %c0_160] : memref<768x192xbf16, #tpu.memory_space<vmem>>, vector<192x192xbf16>
    %cst_161 = arith.constant dense<0.000000e+00> : vector<4x192xf32>
    %347 = tpu.matmul %345, %346, %cst_161 {dimension_numbers = #tpu.dot_dimension_numbers<[1], [0], [0], [1], [0, 0, 1, 1], [], []>} : vector<4x192xbf16>, vector<192x192xbf16>, vector<4x192xf32> -> vector<4x192xf32>
    %348 = arith.addf %334, %347 : vector<4x192xf32>
    %c2_i32_162 = arith.constant 2 : i32
    %349 = vector.broadcast %c2_i32_162 : i32 to vector<4x8xi32>
    %350 = arith.muli %349, %304 : vector<4x8xi32>
    %c2_i32_163 = arith.constant 2 : i32
    %351 = vector.broadcast %c2_i32_163 : i32 to vector<4x8xi32>
    %352 = arith.addi %350, %351 : vector<4x8xi32>
    %353 = arith.cmpi eq, %305, %352 : vector<4x8xi32>
    %cst_164 = arith.constant 1.000000e+00 : f32
    %cst_165 = arith.constant 0.000000e+00 : f32
    %354 = vector.broadcast %cst_164 : f32 to vector<4x8xf32>
    %355 = vector.broadcast %cst_165 : f32 to vector<4x8xf32>
    %356 = arith.select %353, %354, %355 : vector<4x8xi1>, vector<4x8xf32>
    %357 = arith.truncf %356 : vector<4x8xf32> to vector<4x8xbf16>
    %cst_166 = arith.constant dense<0.000000e+00> : vector<4x192xf32>
    %358 = tpu.matmul %357, %303, %cst_166 {dimension_numbers = #tpu.dot_dimension_numbers<[1], [0], [0], [1], [0, 0, 1, 1], [], []>} : vector<4x8xbf16>, vector<8x192xbf16>, vector<4x192xf32> -> vector<4x192xf32>
    %359 = arith.truncf %358 : vector<4x192xf32> to vector<4x192xbf16>
    %c576_167 = arith.constant 576 : index
    %c0_168 = arith.constant 0 : index
    %360 = vector.load %arg5[%c576_167, %c0_168] : memref<768x192xbf16, #tpu.memory_space<vmem>>, vector<192x192xbf16>
    %cst_169 = arith.constant dense<0.000000e+00> : vector<4x192xf32>
    %361 = tpu.matmul %359, %360, %cst_169 {dimension_numbers = #tpu.dot_dimension_numbers<[1], [0], [0], [1], [0, 0, 1, 1], [], []>} : vector<4x192xbf16>, vector<192x192xbf16>, vector<4x192xf32> -> vector<4x192xf32>
    %362 = arith.addf %348, %361 : vector<4x192xf32>
    %363 = tpu.iota {dimensions = array<i32: 0>} : vector<192x32xi32>
    %364 = tpu.iota {dimensions = array<i32: 1>} : vector<192x32xi32>
    %c6_i32 = arith.constant 6 : i32
    %365 = vector.broadcast %c6_i32 : i32 to vector<192x32xi32>
    %366 = arith.muli %364, %365 : vector<192x32xi32>
    %367 = arith.cmpi sge, %363, %366 : vector<192x32xi32>
    %c1_i32_170 = arith.constant 1 : i32
    %368 = vector.broadcast %c1_i32_170 : i32 to vector<192x32xi32>
    %369 = arith.addi %364, %368 : vector<192x32xi32>
    %c6_i32_171 = arith.constant 6 : i32
    %370 = vector.broadcast %c6_i32_171 : i32 to vector<192x32xi32>
    %371 = arith.muli %369, %370 : vector<192x32xi32>
    %372 = arith.cmpi slt, %363, %371 : vector<192x32xi32>
    %373 = arith.andi %367, %372 : vector<192x32xi1>
    %cst_172 = arith.constant 1.000000e+00 : f32
    %cst_173 = arith.constant 0.000000e+00 : f32
    %374 = vector.broadcast %cst_172 : f32 to vector<192x32xf32>
    %375 = vector.broadcast %cst_173 : f32 to vector<192x32xf32>
    %376 = arith.select %373, %374, %375 : vector<192x32xi1>, vector<192x32xf32>
    %377 = tpu.iota {dimensions = array<i32: 0>} : vector<32x192xi32>
    %378 = tpu.iota {dimensions = array<i32: 1>} : vector<32x192xi32>
    %c6_i32_174 = arith.constant 6 : i32
    %379 = vector.broadcast %c6_i32_174 : i32 to vector<32x192xi32>
    %380 = arith.muli %377, %379 : vector<32x192xi32>
    %381 = arith.cmpi sge, %378, %380 : vector<32x192xi32>
    %c1_i32_175 = arith.constant 1 : i32
    %382 = vector.broadcast %c1_i32_175 : i32 to vector<32x192xi32>
    %383 = arith.addi %377, %382 : vector<32x192xi32>
    %c6_i32_176 = arith.constant 6 : i32
    %384 = vector.broadcast %c6_i32_176 : i32 to vector<32x192xi32>
    %385 = arith.muli %383, %384 : vector<32x192xi32>
    %386 = arith.cmpi slt, %378, %385 : vector<32x192xi32>
    %387 = arith.andi %381, %386 : vector<32x192xi1>
    %cst_177 = arith.constant 1.000000e+00 : f32
    %cst_178 = arith.constant 0.000000e+00 : f32
    %388 = vector.broadcast %cst_177 : f32 to vector<32x192xf32>
    %389 = vector.broadcast %cst_178 : f32 to vector<32x192xf32>
    %390 = arith.select %387, %388, %389 : vector<32x192xi1>, vector<32x192xf32>
    %cst_179 = arith.constant dense<0.000000e+00> : vector<192xf32>
    %391 = vector.multi_reduction <add>, %362, %cst_179 [0] : vector<4x192xf32> to vector<192xf32>
    %392 = vector.shape_cast %391 : vector<192xf32> to vector<1x192xf32>
    %cst_180 = arith.constant dense<0.000000e+00> : vector<1x32xf32>
    %393 = tpu.matmul %392, %376, %cst_180 {dimension_numbers = #tpu.dot_dimension_numbers<[1], [0], [0], [1], [0, 0, 1, 1], [], []>} : vector<1x192xf32>, vector<192x32xf32>, vector<1x32xf32> -> vector<1x32xf32>
    %394 = arith.mulf %362, %362 : vector<4x192xf32>
    %cst_181 = arith.constant dense<0.000000e+00> : vector<192xf32>
    %395 = vector.multi_reduction <add>, %394, %cst_181 [0] : vector<4x192xf32> to vector<192xf32>
    %396 = vector.shape_cast %395 : vector<192xf32> to vector<1x192xf32>
    %cst_182 = arith.constant dense<0.000000e+00> : vector<1x32xf32>
    %397 = tpu.matmul %396, %376, %cst_182 {dimension_numbers = #tpu.dot_dimension_numbers<[1], [0], [0], [1], [0, 0, 1, 1], [], []>} : vector<1x192xf32>, vector<192x32xf32>, vector<1x32xf32> -> vector<1x32xf32>
    %cst_183 = arith.constant 0.0416666679 : f32
    %398 = vector.broadcast %cst_183 : f32 to vector<1x32xf32>
    %399 = arith.mulf %393, %398 : vector<1x32xf32>
    %cst_184 = arith.constant 0.0416666679 : f32
    %400 = vector.broadcast %cst_184 : f32 to vector<1x32xf32>
    %401 = arith.mulf %397, %400 : vector<1x32xf32>
    %402 = arith.mulf %399, %399 : vector<1x32xf32>
    %403 = arith.subf %401, %402 : vector<1x32xf32>
    %cst_185 = arith.constant 0.000000e+00 : f32
    %404 = vector.broadcast %cst_185 : f32 to vector<1x32xf32>
    %405 = arith.maximumf %403, %404 : vector<1x32xf32>
    %cst_186 = arith.constant 9.99999974E-6 : f32
    %406 = vector.broadcast %cst_186 : f32 to vector<1x32xf32>
    %407 = arith.addf %405, %406 : vector<1x32xf32>
    %408 = math.rsqrt %407 : vector<1x32xf32>
    %cst_187 = arith.constant dense<0.000000e+00> : vector<1x192xf32>
    %409 = tpu.matmul %399, %390, %cst_187 {dimension_numbers = #tpu.dot_dimension_numbers<[1], [0], [0], [1], [0, 0, 1, 1], [], []>} : vector<1x32xf32>, vector<32x192xf32>, vector<1x192xf32> -> vector<1x192xf32>
    %cst_188 = arith.constant dense<0.000000e+00> : vector<1x192xf32>
    %410 = tpu.matmul %408, %390, %cst_188 {dimension_numbers = #tpu.dot_dimension_numbers<[1], [0], [0], [1], [0, 0, 1, 1], [], []>} : vector<1x32xf32>, vector<32x192xf32>, vector<1x192xf32> -> vector<1x192xf32>
    %411 = vector.broadcast %409 : vector<1x192xf32> to vector<4x192xf32>
    %412 = arith.subf %362, %411 : vector<4x192xf32>
    %413 = vector.broadcast %410 : vector<1x192xf32> to vector<4x192xf32>
    %414 = arith.mulf %412, %413 : vector<4x192xf32>
    %cst_189 = arith.constant 0.000000e+00 : f32
    %415 = vector.broadcast %cst_189 : f32 to vector<4x192xf32>
    %416 = arith.cmpf ogt, %414, %415 : vector<4x192xf32>
    %cst_190 = arith.constant 2.000000e-01 : f32
    %417 = vector.broadcast %cst_190 : f32 to vector<4x192xf32>
    %418 = arith.mulf %417, %414 : vector<4x192xf32>
    %419 = arith.select %416, %414, %418 : vector<4x192xi1>, vector<4x192xf32>
    %420 = arith.truncf %419 : vector<4x192xf32> to vector<4x192xbf16>
    %421 = tpu.iota {dimensions = array<i32: 0>} : vector<2x4xi32>
    %422 = tpu.iota {dimensions = array<i32: 1>} : vector<2x4xi32>
    %cst_191 = arith.constant 0.000000e+00 : f32
    %423 = vector.broadcast %cst_191 : f32 to vector<2x192xf32>
    %c2_i32_192 = arith.constant 2 : i32
    %424 = vector.broadcast %c2_i32_192 : i32 to vector<2x4xi32>
    %425 = arith.muli %424, %421 : vector<2x4xi32>
    %c-1_i32_193 = arith.constant -1 : i32
    %426 = vector.broadcast %c-1_i32_193 : i32 to vector<2x4xi32>
    %427 = arith.addi %425, %426 : vector<2x4xi32>
    %428 = arith.cmpi eq, %422, %427 : vector<2x4xi32>
    %cst_194 = arith.constant 1.000000e+00 : f32
    %cst_195 = arith.constant 0.000000e+00 : f32
    %429 = vector.broadcast %cst_194 : f32 to vector<2x4xf32>
    %430 = vector.broadcast %cst_195 : f32 to vector<2x4xf32>
    %431 = arith.select %428, %429, %430 : vector<2x4xi1>, vector<2x4xf32>
    %432 = arith.truncf %431 : vector<2x4xf32> to vector<2x4xbf16>
    %cst_196 = arith.constant dense<0.000000e+00> : vector<2x192xf32>
    %433 = tpu.matmul %432, %420, %cst_196 {dimension_numbers = #tpu.dot_dimension_numbers<[1], [0], [0], [1], [0, 0, 1, 1], [], []>} : vector<2x4xbf16>, vector<4x192xbf16>, vector<2x192xf32> -> vector<2x192xf32>
    %434 = arith.truncf %433 : vector<2x192xf32> to vector<2x192xbf16>
    %c0_197 = arith.constant 0 : index
    %c0_198 = arith.constant 0 : index
    %435 = vector.load %arg6[%c0_197, %c0_198] : memref<768x192xbf16, #tpu.memory_space<vmem>>, vector<192x192xbf16>
    %cst_199 = arith.constant dense<0.000000e+00> : vector<2x192xf32>
    %436 = tpu.matmul %434, %435, %cst_199 {dimension_numbers = #tpu.dot_dimension_numbers<[1], [0], [0], [1], [0, 0, 1, 1], [], []>} : vector<2x192xbf16>, vector<192x192xbf16>, vector<2x192xf32> -> vector<2x192xf32>
    %437 = arith.addf %423, %436 : vector<2x192xf32>
    %c2_i32_200 = arith.constant 2 : i32
    %438 = vector.broadcast %c2_i32_200 : i32 to vector<2x4xi32>
    %439 = arith.muli %438, %421 : vector<2x4xi32>
    %c0_i32_201 = arith.constant 0 : i32
    %440 = vector.broadcast %c0_i32_201 : i32 to vector<2x4xi32>
    %441 = arith.addi %439, %440 : vector<2x4xi32>
    %442 = arith.cmpi eq, %422, %441 : vector<2x4xi32>
    %cst_202 = arith.constant 1.000000e+00 : f32
    %cst_203 = arith.constant 0.000000e+00 : f32
    %443 = vector.broadcast %cst_202 : f32 to vector<2x4xf32>
    %444 = vector.broadcast %cst_203 : f32 to vector<2x4xf32>
    %445 = arith.select %442, %443, %444 : vector<2x4xi1>, vector<2x4xf32>
    %446 = arith.truncf %445 : vector<2x4xf32> to vector<2x4xbf16>
    %cst_204 = arith.constant dense<0.000000e+00> : vector<2x192xf32>
    %447 = tpu.matmul %446, %420, %cst_204 {dimension_numbers = #tpu.dot_dimension_numbers<[1], [0], [0], [1], [0, 0, 1, 1], [], []>} : vector<2x4xbf16>, vector<4x192xbf16>, vector<2x192xf32> -> vector<2x192xf32>
    %448 = arith.truncf %447 : vector<2x192xf32> to vector<2x192xbf16>
    %c192_205 = arith.constant 192 : index
    %c0_206 = arith.constant 0 : index
    %449 = vector.load %arg6[%c192_205, %c0_206] : memref<768x192xbf16, #tpu.memory_space<vmem>>, vector<192x192xbf16>
    %cst_207 = arith.constant dense<0.000000e+00> : vector<2x192xf32>
    %450 = tpu.matmul %448, %449, %cst_207 {dimension_numbers = #tpu.dot_dimension_numbers<[1], [0], [0], [1], [0, 0, 1, 1], [], []>} : vector<2x192xbf16>, vector<192x192xbf16>, vector<2x192xf32> -> vector<2x192xf32>
    %451 = arith.addf %437, %450 : vector<2x192xf32>
    %c2_i32_208 = arith.constant 2 : i32
    %452 = vector.broadcast %c2_i32_208 : i32 to vector<2x4xi32>
    %453 = arith.muli %452, %421 : vector<2x4xi32>
    %c1_i32_209 = arith.constant 1 : i32
    %454 = vector.broadcast %c1_i32_209 : i32 to vector<2x4xi32>
    %455 = arith.addi %453, %454 : vector<2x4xi32>
    %456 = arith.cmpi eq, %422, %455 : vector<2x4xi32>
    %cst_210 = arith.constant 1.000000e+00 : f32
    %cst_211 = arith.constant 0.000000e+00 : f32
    %457 = vector.broadcast %cst_210 : f32 to vector<2x4xf32>
    %458 = vector.broadcast %cst_211 : f32 to vector<2x4xf32>
    %459 = arith.select %456, %457, %458 : vector<2x4xi1>, vector<2x4xf32>
    %460 = arith.truncf %459 : vector<2x4xf32> to vector<2x4xbf16>
    %cst_212 = arith.constant dense<0.000000e+00> : vector<2x192xf32>
    %461 = tpu.matmul %460, %420, %cst_212 {dimension_numbers = #tpu.dot_dimension_numbers<[1], [0], [0], [1], [0, 0, 1, 1], [], []>} : vector<2x4xbf16>, vector<4x192xbf16>, vector<2x192xf32> -> vector<2x192xf32>
    %462 = arith.truncf %461 : vector<2x192xf32> to vector<2x192xbf16>
    %c384_213 = arith.constant 384 : index
    %c0_214 = arith.constant 0 : index
    %463 = vector.load %arg6[%c384_213, %c0_214] : memref<768x192xbf16, #tpu.memory_space<vmem>>, vector<192x192xbf16>
    %cst_215 = arith.constant dense<0.000000e+00> : vector<2x192xf32>
    %464 = tpu.matmul %462, %463, %cst_215 {dimension_numbers = #tpu.dot_dimension_numbers<[1], [0], [0], [1], [0, 0, 1, 1], [], []>} : vector<2x192xbf16>, vector<192x192xbf16>, vector<2x192xf32> -> vector<2x192xf32>
    %465 = arith.addf %451, %464 : vector<2x192xf32>
    %c2_i32_216 = arith.constant 2 : i32
    %466 = vector.broadcast %c2_i32_216 : i32 to vector<2x4xi32>
    %467 = arith.muli %466, %421 : vector<2x4xi32>
    %c2_i32_217 = arith.constant 2 : i32
    %468 = vector.broadcast %c2_i32_217 : i32 to vector<2x4xi32>
    %469 = arith.addi %467, %468 : vector<2x4xi32>
    %470 = arith.cmpi eq, %422, %469 : vector<2x4xi32>
    %cst_218 = arith.constant 1.000000e+00 : f32
    %cst_219 = arith.constant 0.000000e+00 : f32
    %471 = vector.broadcast %cst_218 : f32 to vector<2x4xf32>
    %472 = vector.broadcast %cst_219 : f32 to vector<2x4xf32>
    %473 = arith.select %470, %471, %472 : vector<2x4xi1>, vector<2x4xf32>
    %474 = arith.truncf %473 : vector<2x4xf32> to vector<2x4xbf16>
    %cst_220 = arith.constant dense<0.000000e+00> : vector<2x192xf32>
    %475 = tpu.matmul %474, %420, %cst_220 {dimension_numbers = #tpu.dot_dimension_numbers<[1], [0], [0], [1], [0, 0, 1, 1], [], []>} : vector<2x4xbf16>, vector<4x192xbf16>, vector<2x192xf32> -> vector<2x192xf32>
    %476 = arith.truncf %475 : vector<2x192xf32> to vector<2x192xbf16>
    %c576_221 = arith.constant 576 : index
    %c0_222 = arith.constant 0 : index
    %477 = vector.load %arg6[%c576_221, %c0_222] : memref<768x192xbf16, #tpu.memory_space<vmem>>, vector<192x192xbf16>
    %cst_223 = arith.constant dense<0.000000e+00> : vector<2x192xf32>
    %478 = tpu.matmul %476, %477, %cst_223 {dimension_numbers = #tpu.dot_dimension_numbers<[1], [0], [0], [1], [0, 0, 1, 1], [], []>} : vector<2x192xbf16>, vector<192x192xbf16>, vector<2x192xf32> -> vector<2x192xf32>
    %479 = arith.addf %465, %478 : vector<2x192xf32>
    %480 = tpu.iota {dimensions = array<i32: 0>} : vector<192x64xi32>
    %481 = tpu.iota {dimensions = array<i32: 1>} : vector<192x64xi32>
    %c3_i32 = arith.constant 3 : i32
    %482 = vector.broadcast %c3_i32 : i32 to vector<192x64xi32>
    %483 = arith.muli %481, %482 : vector<192x64xi32>
    %484 = arith.cmpi sge, %480, %483 : vector<192x64xi32>
    %c1_i32_224 = arith.constant 1 : i32
    %485 = vector.broadcast %c1_i32_224 : i32 to vector<192x64xi32>
    %486 = arith.addi %481, %485 : vector<192x64xi32>
    %c3_i32_225 = arith.constant 3 : i32
    %487 = vector.broadcast %c3_i32_225 : i32 to vector<192x64xi32>
    %488 = arith.muli %486, %487 : vector<192x64xi32>
    %489 = arith.cmpi slt, %480, %488 : vector<192x64xi32>
    %490 = arith.andi %484, %489 : vector<192x64xi1>
    %cst_226 = arith.constant 1.000000e+00 : f32
    %cst_227 = arith.constant 0.000000e+00 : f32
    %491 = vector.broadcast %cst_226 : f32 to vector<192x64xf32>
    %492 = vector.broadcast %cst_227 : f32 to vector<192x64xf32>
    %493 = arith.select %490, %491, %492 : vector<192x64xi1>, vector<192x64xf32>
    %494 = tpu.iota {dimensions = array<i32: 0>} : vector<64x192xi32>
    %495 = tpu.iota {dimensions = array<i32: 1>} : vector<64x192xi32>
    %c3_i32_228 = arith.constant 3 : i32
    %496 = vector.broadcast %c3_i32_228 : i32 to vector<64x192xi32>
    %497 = arith.muli %494, %496 : vector<64x192xi32>
    %498 = arith.cmpi sge, %495, %497 : vector<64x192xi32>
    %c1_i32_229 = arith.constant 1 : i32
    %499 = vector.broadcast %c1_i32_229 : i32 to vector<64x192xi32>
    %500 = arith.addi %494, %499 : vector<64x192xi32>
    %c3_i32_230 = arith.constant 3 : i32
    %501 = vector.broadcast %c3_i32_230 : i32 to vector<64x192xi32>
    %502 = arith.muli %500, %501 : vector<64x192xi32>
    %503 = arith.cmpi slt, %495, %502 : vector<64x192xi32>
    %504 = arith.andi %498, %503 : vector<64x192xi1>
    %cst_231 = arith.constant 1.000000e+00 : f32
    %cst_232 = arith.constant 0.000000e+00 : f32
    %505 = vector.broadcast %cst_231 : f32 to vector<64x192xf32>
    %506 = vector.broadcast %cst_232 : f32 to vector<64x192xf32>
    %507 = arith.select %504, %505, %506 : vector<64x192xi1>, vector<64x192xf32>
    %cst_233 = arith.constant dense<0.000000e+00> : vector<192xf32>
    %508 = vector.multi_reduction <add>, %479, %cst_233 [0] : vector<2x192xf32> to vector<192xf32>
    %509 = vector.shape_cast %508 : vector<192xf32> to vector<1x192xf32>
    %cst_234 = arith.constant dense<0.000000e+00> : vector<1x64xf32>
    %510 = tpu.matmul %509, %493, %cst_234 {dimension_numbers = #tpu.dot_dimension_numbers<[1], [0], [0], [1], [0, 0, 1, 1], [], []>} : vector<1x192xf32>, vector<192x64xf32>, vector<1x64xf32> -> vector<1x64xf32>
    %511 = arith.mulf %479, %479 : vector<2x192xf32>
    %cst_235 = arith.constant dense<0.000000e+00> : vector<192xf32>
    %512 = vector.multi_reduction <add>, %511, %cst_235 [0] : vector<2x192xf32> to vector<192xf32>
    %513 = vector.shape_cast %512 : vector<192xf32> to vector<1x192xf32>
    %cst_236 = arith.constant dense<0.000000e+00> : vector<1x64xf32>
    %514 = tpu.matmul %513, %493, %cst_236 {dimension_numbers = #tpu.dot_dimension_numbers<[1], [0], [0], [1], [0, 0, 1, 1], [], []>} : vector<1x192xf32>, vector<192x64xf32>, vector<1x64xf32> -> vector<1x64xf32>
    %cst_237 = arith.constant 0.166666672 : f32
    %515 = vector.broadcast %cst_237 : f32 to vector<1x64xf32>
    %516 = arith.mulf %510, %515 : vector<1x64xf32>
    %cst_238 = arith.constant 0.166666672 : f32
    %517 = vector.broadcast %cst_238 : f32 to vector<1x64xf32>
    %518 = arith.mulf %514, %517 : vector<1x64xf32>
    %519 = arith.mulf %516, %516 : vector<1x64xf32>
    %520 = arith.subf %518, %519 : vector<1x64xf32>
    %cst_239 = arith.constant 0.000000e+00 : f32
    %521 = vector.broadcast %cst_239 : f32 to vector<1x64xf32>
    %522 = arith.maximumf %520, %521 : vector<1x64xf32>
    %cst_240 = arith.constant 9.99999974E-6 : f32
    %523 = vector.broadcast %cst_240 : f32 to vector<1x64xf32>
    %524 = arith.addf %522, %523 : vector<1x64xf32>
    %525 = math.rsqrt %524 : vector<1x64xf32>
    %cst_241 = arith.constant dense<0.000000e+00> : vector<1x192xf32>
    %526 = tpu.matmul %516, %507, %cst_241 {dimension_numbers = #tpu.dot_dimension_numbers<[1], [0], [0], [1], [0, 0, 1, 1], [], []>} : vector<1x64xf32>, vector<64x192xf32>, vector<1x192xf32> -> vector<1x192xf32>
    %cst_242 = arith.constant dense<0.000000e+00> : vector<1x192xf32>
    %527 = tpu.matmul %525, %507, %cst_242 {dimension_numbers = #tpu.dot_dimension_numbers<[1], [0], [0], [1], [0, 0, 1, 1], [], []>} : vector<1x64xf32>, vector<64x192xf32>, vector<1x192xf32> -> vector<1x192xf32>
    %528 = vector.broadcast %526 : vector<1x192xf32> to vector<2x192xf32>
    %529 = arith.subf %479, %528 : vector<2x192xf32>
    %530 = vector.broadcast %527 : vector<1x192xf32> to vector<2x192xf32>
    %531 = arith.mulf %529, %530 : vector<2x192xf32>
    %cst_243 = arith.constant 0.000000e+00 : f32
    %532 = vector.broadcast %cst_243 : f32 to vector<2x192xf32>
    %533 = arith.cmpf ogt, %531, %532 : vector<2x192xf32>
    %cst_244 = arith.constant 2.000000e-01 : f32
    %534 = vector.broadcast %cst_244 : f32 to vector<2x192xf32>
    %535 = arith.mulf %534, %531 : vector<2x192xf32>
    %536 = arith.select %533, %531, %535 : vector<2x192xi1>, vector<2x192xf32>
    %c0_245 = arith.constant 0 : index
    %c0_246 = arith.constant 0 : index
    %537 = vector.load %arg8[%c0_245, %c0_246] : memref<2x192xf32, #tpu.memory_space<vmem>>, vector<2x192xf32>
    %538 = arith.mulf %536, %537 : vector<2x192xf32>
    %cst_247 = arith.constant dense<0.000000e+00> : vector<2xf32>
    %539 = vector.multi_reduction <add>, %538, %cst_247 [1] : vector<2x192xf32> to vector<2xf32>
    %540 = vector.shape_cast %539 : vector<2xf32> to vector<2x1xf32>
    %cst_248 = arith.constant dense<0.000000e+00> : vector<1xf32>
    %541 = vector.multi_reduction <add>, %540, %cst_248 [0] : vector<2x1xf32> to vector<1xf32>
    %542 = vector.shape_cast %541 : vector<1xf32> to vector<1x1xf32>
    %c0_249 = arith.constant 0 : index
    %c0_250 = arith.constant 0 : index
    %543 = vector.load %arg9[%c0_249, %c0_250] : memref<1x1xf32, #tpu.memory_space<vmem>>, vector<1x1xf32>
    %544 = arith.addf %542, %543 : vector<1x1xf32>
    %c0_251 = arith.constant 0 : index
    %c0_252 = arith.constant 0 : index
    %c0_253 = arith.constant 0 : index
    %545 = vector.load %arg10[%c0_251, %c0_252, %c0_253] : memref<1x1x1xf32, #tpu.memory_space<vmem>>, vector<1x1x1xf32>
    %546 = vector.shape_cast %545 : vector<1x1x1xf32> to vector<1x1xf32>
    %547 = vector.shape_cast %544 : vector<1x1xf32> to vector<1x1x1xf32>
    tpu.vector_store %arg10[%c0_251, %c0_252, %c0_253], %547 {strides = array<i32>} : memref<1x1x1xf32, #tpu.memory_space<vmem>>, vector<1x1x1xf32>,
    return
  }
  func.func @transform_0(%arg0: i32) -> (i32, i32, i32) {
    %c0_i32 = arith.constant 0 : i32
    %c0_i32_0 = arith.constant 0 : i32
    %c0_i32_1 = arith.constant 0 : i32
    return %arg0, %c0_i32, %c0_i32_0 : i32, i32, i32
  }
  func.func @transform_1(%arg0: i32) -> (i32, i32) {
    %c0_i32 = arith.constant 0 : i32
    %c0_i32_0 = arith.constant 0 : i32
    %c0_i32_1 = arith.constant 0 : i32
    return %c0_i32, %c0_i32_0 : i32, i32
  }
  func.func @transform_2(%arg0: i32) -> (i32, i32) {
    %c0_i32 = arith.constant 0 : i32
    %c0_i32_0 = arith.constant 0 : i32
    %c0_i32_1 = arith.constant 0 : i32
    return %c0_i32, %c0_i32_0 : i32, i32
  }
  func.func @transform_3(%arg0: i32) -> (i32, i32) {
    %c0_i32 = arith.constant 0 : i32
    %c0_i32_0 = arith.constant 0 : i32
    %c0_i32_1 = arith.constant 0 : i32
    return %c0_i32, %c0_i32_0 : i32, i32
  }
  func.func @transform_4(%arg0: i32) -> (i32, i32) {
    %c0_i32 = arith.constant 0 : i32
    %c0_i32_0 = arith.constant 0 : i32
    %c0_i32_1 = arith.constant 0 : i32
    return %c0_i32, %c0_i32_0 : i32, i32
  }
  func.func @transform_5(%arg0: i32) -> (i32, i32) {
    %c0_i32 = arith.constant 0 : i32
    %c0_i32_0 = arith.constant 0 : i32
    %c0_i32_1 = arith.constant 0 : i32
    return %c0_i32, %c0_i32_0 : i32, i32
  }
  func.func @transform_6(%arg0: i32) -> (i32, i32) {
    %c0_i32 = arith.constant 0 : i32
    %c0_i32_0 = arith.constant 0 : i32
    %c0_i32_1 = arith.constant 0 : i32
    return %c0_i32, %c0_i32_0 : i32, i32
  }
  func.func @transform_7(%arg0: i32) -> (i32, i32) {
    %c0_i32 = arith.constant 0 : i32
    %c0_i32_0 = arith.constant 0 : i32
    %c0_i32_1 = arith.constant 0 : i32
    return %c0_i32, %c0_i32_0 : i32, i32
  }
  func.func @transform_8(%arg0: i32) -> (i32, i32) {
    %c0_i32 = arith.constant 0 : i32
    %c0_i32_0 = arith.constant 0 : i32
    %c0_i32_1 = arith.constant 0 : i32
    return %c0_i32, %c0_i32_0 : i32, i32
  }
  func.func @transform_9(%arg0: i32) -> (i32, i32, i32) {
    %c0_i32 = arith.constant 0 : i32
    %c0_i32_0 = arith.constant 0 : i32
    %c0_i32_1 = arith.constant 0 : i32
    return %arg0, %c0_i32, %c0_i32_0 : i32, i32, i32
  }
}

</mosaic_0001>

<bundles_post_ra>
// kernel: _lambda_.1
= control target key start
LH: loop header
LB: loop body
LE: loop exit
PB: predicated region body
PF: predicated region fallthrough
CT: control target
= control target key end

     0   :  { %s9132_s11 = smov 0   ;;  %s13124_s0 = inlined_call_operand.vmem [shape: bf16[2,64,96], index: 0, kind: input, shape index: {}]   ;;  %s13125_s1 = inlined_call_operand.vmem [shape: bf16[384,192], index: 1, kind: input, shape index: {}]   ;;  %s13126_s2 = inlined_call_operand.vmem [shape: bf16[768,192], index: 2, kind: input, shape index: {}]   ;;  %s13127_s3 = inlined_call_operand.vmem [shape: bf16[768,192], index: 3, kind: input, shape index: {}]   ;;  %s13128_s4 = inlined_call_operand.vmem [shape: bf16[768,192], index: 4, kind: input, shape index: {}]   ;;  %s13129_s5 = inlined_call_operand.vmem [shape: bf16[768,192], index: 5, kind: input, shape index: {}]   ;;  %s13130_s6 = inlined_call_operand.vmem [shape: f32[1,192], index: 6, kind: input, shape index: {}]   ;;  %s13131_s7 = inlined_call_operand.vmem [shape: f32[2,192], index: 7, kind: input, shape index: {}]   ;;  %s13132_s8 = inlined_call_operand.<no memory space> [shape: f32[1,1], index: 8, kind: input, shape index: {}]   ;;  %s13133_s9 = inlined_call_operand.vmem [shape: f32[2,1,1], index: 9, kind: output, shape index: {}]  }
   0x1   :  { %v14_v0 = vstv %s13132_s8 }
   0x2   :  { %15 = vst [vmem:[#allocation2] sm:$0x1] %v14_v0 }
   0x3 LB: > { %s7134_s12 = sadd.s32 4294967295, %s9072_s11   ;;  %p7138_p0 = scmp.ge.s32.totalorder %s9072_s11, 1  ;;  %s9072_s11 = sphi %s9132_s11, %s21_s11  }
   0x4   : > { %p289_p1 = scmp.lt.s32.totalorder %s9072_s11, 3 }
   0x6   : > { %p290_p2 = pnand %p7138_p0, %p289_p1 }
   0x8   : > { %293 = sbr.rel (%p290_p2) target bundleno = 5131 (0x140b), region = 56 }
   0xf   : > { %p323_p3 = scmp.lt.s32.totalorder %s7134_s12, 1  ;;  %v340_v1 = vlaneseq  ;;  %v13160_v15 = vmov 0.0   ;;  %vm13137_vm2 = vcmask 523264   ;;  %v8412_v46 = vld [vmem:[%s13125_s1 + $0x64] ss:$8 sps:$4 sm:$0xff]  }
  0x10   : > { %v8410_v51 = vld [vmem:[%s13125_s1 + $0x60] ss:$8 sps:$4 sm:$0xff]   ;;  %v8415_v54 = vld [vmem:[%s13125_s1 + $0x74] ss:$8 sps:$4 sm:$0xff]   ;;  %v8413_v55 = vld [vmem:[%s13125_s1 + $0x70] ss:$8 sps:$4 sm:$0xff]  }
  0x11   : > { %s13877_s12 = smov (!%p323_p3, %s7134_s12), 1  ;;  %v9142_v2 = vshrl.u32 %v340_v1, 7  ;;  %v9152_v5 = vand.u32 127, %v340_v1  ;;  %v8418_v56 = vld [vmem:[%s13125_s1 + $0x84] ss:$8 sps:$4 sm:$0xff]   ;;  %v13158_v1 = vmov 0  }
  0x12   : > { %s7904_s8 = sshll.u32 %s13877_s12, 5  ;;  %v8416_v57 = vld [vmem:[%s13125_s1 + $0x80] ss:$8 sps:$4 sm:$0xff]   ;;  %v8421_v58 = vld [vmem:[%s13125_s1 + $0x94] ss:$8 sps:$4 sm:$0xff]   ;;  %s330_s26 = scalar_lea.vmem %s13133_s9, %s13877_s12 }
  0x13   : > { %v9146_v3 = vadd.s32 8, %v9142_v2  ;;  %v347_v4 = vmul.u32 2, %v9142_v2  ;;  %s327_s15 = scalar_lea.vmem %s13124_s0, %s7904_s8  ;;  %v9155_v6 = vadd.s32 16, %v9142_v2  ;;  %v9158_v7 = vadd.s32 24, %v9142_v2  ;;  %v8419_v59 = vld [vmem:[%s13125_s1 + $0x90] ss:$8 sps:$4 sm:$0xff]  }
  0x14   : > { %v9160_v8 = vld [vmem:[%s327_s15] sm:$0xff]   ;;  %v9163_v10 = vld [vmem:[%s327_s15 + $0x8] sm:$0xff]   ;;  %v9168_v13 = vld [vmem:[%s327_s15 + $0x10] sm:$0xff]  }
  0x15   : > { %13332 = vst [vmem:[#allocation3_spill] sm:$0xff] %v9158_v7  ;;  %v348_v9 = vmul.u32 2, %v9146_v3  ;;  %v351_v11 = vadd.s32 4294967295, %v347_v4  ;;  %7929 = vmatprep.subr.bf16.mxu0 %v9160_v8  ;;  %7953 = vmatprep.subr.bf16.mxu1 %v9160_v8  ;;  %v9172_v14 = vmul.u32 2, %v9155_v6  ;;  %v9186_v20 = vld [vmem:[%s327_s15 + $0x18] sm:$0xff]   ;;  %vm459_vm3 = vcmp.eq.s32.totalorder %v9152_v5, %v347_v4 }
  0x16   : > { %7930 = vmatpush3.bf16.msra.mxu0 %v9160_v8  ;;  %7954 = vmatpush3.bf16.msra.mxu1 %v9160_v8  ;;  %v9181_v17 = vmul.u32 2, %v9158_v7  ;;  %v777_v23 = vadd.s32 1, %v347_v4  ;;  %v9203_v25 = vsel %vm459_vm3, 1.0, %v13160_v15  ;;  %v987_v31 = vadd.s32 2, %v347_v4  ;;  %v8424_v60 = vld [vmem:[%s13125_s1 + $0xa4] ss:$8 sps:$4 sm:$0xff]  }
  0x17   : > { %v352_v12 = vadd.s32 4294967295, %v348_v9  ;;  %vm355_vm0 = vcmp.eq.s32.totalorder %v9152_v5, %v351_v11  ;;  %7931 = vmatprep.subr.bf16.mxu0 %v9163_v10  ;;  %7955 = vmatprep.subr.bf16.mxu1 %v9163_v10  ;;  %v353_v19 = vadd.s32 4294967295, %v9172_v14  ;;  %vm460_vm6 = vcmp.eq.s32.totalorder %v9152_v5, %v348_v9  ;;  %v8422_v61 = vld [vmem:[%s13125_s1 + $0xa0] ss:$8 sps:$4 sm:$0xff]   ;;  %v8427_v62 = vld [vmem:[%s13125_s1 + $0xb4] ss:$8 sps:$4 sm:$0xff]  }
  0x18   : > { %v9178_v16 = vsel %vm355_vm0, 1.0, %v13160_v15  ;;  %v354_v22 = vadd.s32 4294967295, %v9181_v17  ;;  %v778_v26 = vadd.s32 1, %v348_v9  ;;  %vm781_vm7 = vcmp.eq.s32.totalorder %v9152_v5, %v777_v23  ;;  %v8425_v63 = vld [vmem:[%s13125_s1 + $0xb0] ss:$8 sps:$4 sm:$0xff]  }
  0x19   : > { %vm356_vm1 = vcmp.eq.s32.totalorder %v9152_v5, %v352_v12  ;;  %vm357_vm4 = vcmp.eq.s32.totalorder %v9152_v5, %v353_v19  ;;  %v9208_v27 = vsel %vm781_vm7, 1.0, %v13160_v15  ;;  %v779_v28 = vadd.s32 1, %v9172_v14  ;;  %v8430_v0 = vld [vmem:[%s13125_s1 + $0x4] ss:$8 sps:$4 sm:$0xff]  }
  0x1a   : > { %v360_v18 = vsel %vm356_vm1, 1.0, %v13160_v15  ;;  %7932 = vmatpush3.bf16.msra.mxu0 %v9163_v10  ;;  %7956 = vmatpush3.bf16.msra.mxu1 %v9163_v10  ;;  %vm358_vm5 = vcmp.eq.s32.totalorder %v9152_v5, %v354_v22  ;;  %v361_v24 = vsel %vm357_vm4, 1.0, %v13160_v15  ;;  %v780_v29 = vadd.s32 1, %v9181_v17 }
  0x1b   : > { %v9189_v21 = vpack.c.bf16 %v360_v18, %v9178_v16  ;;  %7933 = vmatprep.subr.bf16.mxu0 %v9168_v13  ;;  %7957 = vmatprep.subr.bf16.mxu1 %v9168_v13  ;;  %v362_v30 = vsel %vm358_vm5, 1.0, %v13160_v15  ;;  %vm782_vm8 = vcmp.eq.s32.totalorder %v9152_v5, %v778_v26  ;;  %v988_v32 = vadd.s32 2, %v348_v9 }
  0x1c   : > { %v464_v33 = vsel %vm460_vm6, 1.0, %v13160_v15  ;;  %v786_v34 = vsel %vm782_vm8, 1.0, %v13160_v15  ;;  %vm783_vm9 = vcmp.eq.s32.totalorder %v9152_v5, %v779_v28  ;;  %vm784_vm10 = vcmp.eq.s32.totalorder %v9152_v5, %v780_v29 }
  0x1d   : > { %7937 = vmatprep.mubr.msk.bf16.mxu0 %vm13137_vm2, %v9189_v21  ;;  %v9225_v35 = vpack.c.bf16 %v786_v34, %v9208_v27  ;;  %v787_v36 = vsel %vm783_vm9, 1.0, %v13160_v15  ;;  %v788_v37 = vsel %vm784_vm10, 1.0, %v13160_v15  ;;  %vm991_vm11 = vcmp.eq.s32.totalorder %v9152_v5, %v987_v31  ;;  %v8428_v31 = vld [vmem:[%s13125_s1] ss:$8 sps:$4 sm:$0xff]   ;;  %v8433_v34 = vld [vmem:[%s13125_s1 + $0x14] ss:$8 sps:$4 sm:$0xff]  }
  0x1e   : > { %7934 = vmatpush3.bf16.msra.mxu0 %v9168_v13  ;;  %7958 = vmatpush3.bf16.msra.mxu1 %v9168_v13  ;;  %v364_v38 = vpack.c.bf16 %v362_v30, %v361_v24  ;;  %v790_v39 = vpack.c.bf16 %v788_v37, %v787_v36  ;;  %vm992_vm12 = vcmp.eq.s32.totalorder %v9152_v5, %v988_v32  ;;  %v9232_v40 = vsel %vm991_vm11, 1.0, %v13160_v15 }
  0x1f   : > { %7935 = vmatprep.subr.bf16.mxu0 %v9186_v20  ;;  %7959 = vmatprep.subr.bf16.mxu1 %v9186_v20  ;;  %v9236_v41 = vpack.c.bf16 %v464_v33, %v9203_v25  ;;  %v996_v42 = vsel %vm992_vm12, 1.0, %v13160_v15  ;;  %v989_v44 = vadd.s32 2, %v9172_v14  ;;  %v990_v45 = vadd.s32 2, %v9181_v17 }
  0x20   : > { %7961 = vmatprep.mubr.msk.bf16.mxu1 %vm13137_vm2, %v9225_v35  ;;  %v9245_v43 = vpack.c.bf16 %v996_v42, %v9232_v40  ;;  %vm461_vm13 = vcmp.eq.s32.totalorder %v9152_v5, %v9172_v14  ;;  %vm462_vm14 = vcmp.eq.s32.totalorder %v9152_v5, %v9181_v17  ;;  %vm598_vm1 = vcmask 785408   ;;  %v8436_v42 = vld [vmem:[%s13125_s1 + $0x24] ss:$8 sps:$4 sm:$0xff]  }
  0x21   : > { %vm993_vm15 = vcmp.eq.s32.totalorder %v9152_v5, %v989_v44  ;;  %vm994_vm0 = vcmp.eq.s32.totalorder %v9152_v5, %v990_v45  ;;  %v465_v47 = vsel %vm461_vm13, 1.0, %v13160_v15  ;;  %v466_v48 = vsel %vm462_vm14, 1.0, %v13160_v15  ;;  %v8434_v44 = vld [vmem:[%s13125_s1 + $0x20] ss:$8 sps:$4 sm:$0xff]   ;;  %v8439_v45 = vld [vmem:[%s13125_s1 + $0x34] ss:$8 sps:$4 sm:$0xff]  }
  0x22   : > { %7936 = vmatpush3.bf16.msra.mxu0 %v9186_v20  ;;  %7960 = vmatpush3.bf16.msra.mxu1 %v9186_v20  ;;  %v997_v49 = vsel %vm993_vm15, 1.0, %v13160_v15  ;;  %v998_v50 = vsel %vm994_vm0, 1.0, %v13160_v15  ;;  %v468_v52 = vpack.c.bf16 %v466_v48, %v465_v47  ;;  %v8442_v47 = vld [vmem:[%s13125_s1 + $0x44] ss:$8 sps:$4 sm:$0xff]   ;;  %v8440_v48 = vld [vmem:[%s13125_s1 + $0x40] ss:$8 sps:$4 sm:$0xff]  }
  0x23   : > { %7941 = vmatprep.subr.bf16.mxu0 %v9160_v8  ;;  %7965 = vmatprep.subr.bf16.mxu1 %v9160_v8  ;;  %v1000_v53 = vpack.c.bf16 %v998_v50, %v997_v49  ;;  %v8445_v49 = vld [vmem:[%s13125_s1 + $0x54] ss:$8 sps:$4 sm:$0xff]   ;;  %v8443_v50 = vld [vmem:[%s13125_s1 + $0x50] ss:$8 sps:$4 sm:$0xff]   ;;  %vm13134_vm11 = vcmask 261120  }
  0x25   : > { %7938 = vmatmul.mubr.msk.bf16.vlgmr.msra.gmra.mrb[0].mxu0 %vm13137_vm2, %v364_v38  ;;  %7962 = vmatmul.mubr.msk.bf16.vlgmr.msra.gmra.mrb[0].mxu1 %vm13137_vm2, %v790_v39  ;;  %v8431_v39 = vld [vmem:[%s13125_s1 + $0x10] ss:$8 sps:$4 sm:$0xff]  }
  0x26   : > { %7942 = vmatpush3.bf16.msra.mxu0 %v9160_v8  ;;  %7949 = vmatprep.mubr.msk.bf16.mxu0 %vm13137_vm2, %v9236_v41 }
  0x27   : > { %7943 = vmatprep.subr.bf16.mxu0 %v9163_v10  ;;  %7966 = vmatpush3.bf16.msra.mxu1 %v9160_v8 }
  0x28   : > { %7967 = vmatprep.subr.bf16.mxu1 %v9163_v10  ;;  %7973 = vmatprep.mubr.msk.bf16.mxu1 %vm13137_vm2, %v9245_v43 }
  0x2a   : > { %7944 = vmatpush3.bf16.msra.mxu0 %v9163_v10 }
  0x2b   : > { %7945 = vmatprep.subr.bf16.mxu0 %v9168_v13  ;;  %7968 = vmatpush3.bf16.msra.mxu1 %v9163_v10 }
  0x2c   : > { %7969 = vmatprep.subr.bf16.mxu1 %v9168_v13 }
  0x2e   : > { %7946 = vmatpush3.bf16.msra.mxu0 %v9168_v13 }
  0x2f   : > { %7947 = vmatprep.subr.bf16.mxu0 %v9186_v20  ;;  %7970 = vmatpush3.bf16.msra.mxu1 %v9168_v13 }
  0x30   : > { %7971 = vmatprep.subr.bf16.mxu1 %v9186_v20 }
  0x32   : > { %7948 = vmatpush3.bf16.msra.mxu0 %v9186_v20 }
  0x33   : > { %7972 = vmatpush3.bf16.msra.mxu1 %v9186_v20  ;;  %605 = vmatprep.subr.bf16.mxu0 %v8412_v46  ;;  %v8437_v46 = vld [vmem:[%s13125_s1 + $0x30] ss:$8 sps:$4 sm:$0xff]  }
  0x35   : > { %7950 = vmatmul.mubr.msk.bf16.vlgmr.msra.gmra.mrb[4].mxu0 %vm13137_vm2, %v468_v52  ;;  %v8446_v52 = vld [vmem:[%s13125_s1 + $0xc0] ss:$8 sps:$4 sm:$0xff]  }
  0x36   : > { %7974 = vmatmul.mubr.msk.bf16.vlgmr.msra.gmra.mrb[4].mxu1 %vm13137_vm2, %v1000_v53  ;;  %606 = vmatpush1.bf16.msra.mxu0 %v8410_v51  ;;  %v8448_v51 = vld [vmem:[%s13125_s1 + $0xc4] ss:$8 sps:$4 sm:$0xff]   ;;  %v8451_v53 = vld [vmem:[%s13125_s1 + $0xd4] ss:$8 sps:$4 sm:$0xff]  }
  0x37   : > { %607 = vmatprep.subr.bf16.mxu0 %v8415_v54  ;;  %637 = vmatprep.mubr.bf16.mxu0 %v13158_v1  ;;  %v8449_v54 = vld [vmem:[%s13125_s1 + $0xd0] ss:$8 sps:$4 sm:$0xff]  }
  0x38   : > { %1351 = vmatprep.mubr.bf16.mxu1 %v13158_v1 }
  0x3a   : > { %608 = vmatpush1.bf16.msra.mxu0 %v8413_v55  ;;  %v8454_v55 = vld [vmem:[%s13125_s1 + $0xe4] ss:$8 sps:$4 sm:$0xff]  }
  0x3b   : > { %609 = vmatprep.subr.bf16.mxu0 %v8418_v56  ;;  %v8452_v56 = vld [vmem:[%s13125_s1 + $0xe0] ss:$8 sps:$4 sm:$0xff]  }
  0x3e   : > { %610 = vmatpush1.bf16.msra.mxu0 %v8416_v57  ;;  %v8457_v57 = vld [vmem:[%s13125_s1 + $0xf4] ss:$8 sps:$4 sm:$0xff]  }
  0x3f   : > { %611 = vmatprep.subr.bf16.mxu0 %v8421_v58  ;;  %v8455_v58 = vld [vmem:[%s13125_s1 + $0xf0] ss:$8 sps:$4 sm:$0xff]  }
  0x42   : > { %612 = vmatpush1.bf16.msra.mxu0 %v8419_v59  ;;  %v8460_v59 = vld [vmem:[%s13125_s1 + $0x104] ss:$8 sps:$4 sm:$0xff]  }
  0x43   : > { %613 = vmatprep.subr.bf16.mxu0 %v8424_v60  ;;  %v8458_v60 = vld [vmem:[%s13125_s1 + $0x100] ss:$8 sps:$4 sm:$0xff]  }
  0x46   : > { %614 = vmatpush1.bf16.msra.mxu0 %v8422_v61  ;;  %v8463_v61 = vld [vmem:[%s13125_s1 + $0x114] ss:$8 sps:$4 sm:$0xff]  }
  0x47   : > { %615 = vmatprep.subr.bf16.mxu0 %v8427_v62  ;;  %v8461_v62 = vld [vmem:[%s13125_s1 + $0x110] ss:$8 sps:$4 sm:$0xff]  }
  0x4a   : > { %616 = vmatpush1.bf16.msra.mxu0 %v8425_v63  ;;  %v8466_v63 = vld [vmem:[%s13125_s1 + $0x124] ss:$8 sps:$4 sm:$0xff]  }
  0x4b   : > { %724 = vmatprep.subr.bf16.mxu0 %v8430_v0  ;;  %v8464_v0 = vld [vmem:[%s13125_s1 + $0x120] ss:$8 sps:$4 sm:$0xff]  }
  0xf8   : > { %v9322_v4 = vpop.f32.mrb[0].mxu0  ;;  %v9324_v8 = vpop.f32.mrb[0].mxu1 }
  0xf9   : > { %v430_v9 = vpop.f32.mrb[1].mxu0  ;;  %v9326_v10 = vpop.f32.mrb[1].mxu1 }
  0xfa   : > { %v7940_v11 = vpop.f32.mrb[2].mxu0  ;;  %v9328_v12 = vpop.f32.mrb[2].mxu1 }
  0xfb   : > { %v446_v13 = vpack.c.bf16 %v7940_v11, %v9322_v4  ;;  %v433_v14 = vpop.f32.mrb[3].mxu0  ;;  %v847_v17 = vpack.c.bf16 %v9328_v12, %v9324_v8  ;;  %v9333_v18 = vpop.f32.mrb[3].mxu1  ;;  %v8469_v4 = vld [vmem:[%s13125_s1 + $0x134] ss:$8 sps:$4 sm:$0xff]   ;;  %v8472_v11 = vld [vmem:[%s13125_s1 + $0x144] ss:$8 sps:$4 sm:$0xff]  }
  0xfc   : > { %v445_v19 = vpack.c.bf16 %v433_v14, %v430_v9  ;;  %v846_v20 = vpack.c.bf16 %v9333_v18, %v9326_v10  ;;  %v8467_v9 = vld [vmem:[%s13125_s1 + $0x130] ss:$8 sps:$4 sm:$0xff]   ;;  %v8475_v10 = vld [vmem:[%s13125_s1 + $0x154] ss:$8 sps:$4 sm:$0xff]   ;;  %v8478_v18 = vld [vmem:[%s13125_s1 + $0x164] ss:$8 sps:$4 sm:$0xff]  }
  0xfd   : > { %v8473_v14 = vld [vmem:[%s13125_s1 + $0x150] ss:$8 sps:$4 sm:$0xff]   ;;  %v8481_v8 = vld [vmem:[%s13125_s1 + $0x174] ss:$8 sps:$4 sm:$0xff]  }
  0xfe   : > { %v8479_v12 = vld [vmem:[%s13125_s1 + $0x170] ss:$8 sps:$4 sm:$0xff]  }
 0x108   : > { %v7951_v22 = vpop.f32.mrb[4].mxu0 }
 0x109   : > { %v509_v23 = vpop.f32.mrb[5].mxu0  ;;  %v9337_v24 = vpop.f32.mrb[4].mxu1 }
 0x10a   : > { %v7952_v26 = vpop.f32.mrb[6].mxu0  ;;  %v9339_v28 = vpop.f32.mrb[5].mxu1 }
 0x10b   : > { %v525_v29 = vpack.c.bf16 %v7952_v26, %v7951_v22  ;;  %v512_v30 = vpop.f32.mrb[7].mxu0  ;;  %v9344_v32 = vpop.f32.mrb[6].mxu1  ;;  %v1205_v22 = vsub.s32 1, %v9142_v2 }
 0x10c   : > { %v524_v33 = vpack.c.bf16 %v512_v30, %v509_v23  ;;  %v1057_v36 = vpack.c.bf16 %v9344_v32, %v9337_v24  ;;  %v9351_v37 = vpop.f32.mrb[7].mxu1 }
 0x10d   : > { %v1056_v38 = vpack.c.bf16 %v9351_v37, %v9339_v28 }
 0x10e   : > { %7161 = vmatmul.mubr.msk.bf16.vlgmr.msra.gmra.mrb[8].mxu0 %vm598_vm1, %v524_v33 }
 0x10f   : > { %725 = vmatpush1.bf16.msra.mxu0 %v8428_v31  ;;  %647 = vmatprep.mubr.bf16.mxu0 %v13158_v1 }
 0x110   : > { %726 = vmatprep.subr.bf16.mxu0 %v8433_v34 }
 0x113   : > { %727 = vmatpush1.bf16.msra.mxu0 %v8431_v39 }
 0x114   : > { %728 = vmatprep.subr.bf16.mxu0 %v8436_v42 }
 0x116   : > { %7162 = vmatmul.mubr.msk.bf16.gmra.mrb[12].mxu0 %vm598_vm1, %v525_v29 }
 0x117   : > { %729 = vmatpush1.bf16.msra.mxu0 %v8434_v44  ;;  %756 = vmatprep.mubr.bf16.mxu0 %v13158_v1 }
 0x118   : > { %730 = vmatprep.subr.bf16.mxu0 %v8439_v45 }
 0x11b   : > { %731 = vmatpush1.bf16.msra.mxu0 %v8437_v46 }
 0x11c   : > { %732 = vmatprep.subr.bf16.mxu0 %v8442_v47 }
 0x11f   : > { %733 = vmatpush1.bf16.msra.mxu0 %v8440_v48 }
 0x120   : > { %734 = vmatprep.subr.bf16.mxu0 %v8445_v49 }
 0x123   : > { %735 = vmatpush1.bf16.msra.mxu0 %v8443_v50 }
 0x124   : > { %926 = vmatprep.subr.bf16.mxu0 %v8448_v51 }
 0x126   : > { %7175 = vmatmul.mubr.msk.bf16.vlgmr.msra.gmra.mrb[8].mxu0 %vm598_vm1, %v445_v19  ;;  %v8476_v19 = vld [vmem:[%s13125_s1 + $0x160] ss:$8 sps:$4 sm:$0xff]  }
 0x127   : > { %927 = vmatpush1.bf16.msra.mxu0 %v8446_v52  ;;  %766 = vmatprep.mubr.bf16.mxu0 %v13158_v1 }
 0x128   : > { %928 = vmatprep.subr.bf16.mxu0 %v8451_v53 }
 0x12b   : > { %929 = vmatpush1.bf16.msra.mxu0 %v8449_v54 }
 0x12c   : > { %930 = vmatprep.subr.bf16.mxu0 %v8454_v55 }
 0x12e   : > { %7176 = vmatmul.mubr.msk.bf16.gmra.mrb[12].mxu0 %vm598_vm1, %v446_v13  ;;  %v8470_v13 = vld [vmem:[%s13125_s1 + $0x140] ss:$8 sps:$4 sm:$0xff]  }
 0x12f   : > { %931 = vmatpush1.bf16.msra.mxu0 %v8452_v56  ;;  %958 = vmatprep.mubr.bf16.mxu0 %v13158_v1 }
 0x130   : > { %932 = vmatprep.subr.bf16.mxu0 %v8457_v57 }
 0x133   : > { %933 = vmatpush1.bf16.msra.mxu0 %v8455_v58 }
 0x134   : > { %934 = vmatprep.subr.bf16.mxu0 %v8460_v59 }
 0x137   : > { %935 = vmatpush1.bf16.msra.mxu0 %v8458_v60 }
 0x138   : > { %936 = vmatprep.subr.bf16.mxu0 %v8463_v61 }
 0x13b   : > { %937 = vmatpush1.bf16.msra.mxu0 %v8461_v62 }
 0x13c   : > { %1136 = vmatprep.subr.bf16.mxu0 %v8466_v63 }
 0x13e   : > { %7191 = vmatmul.mubr.msk.bf16.vlgmr.msra.gmra.mrb[8].mxu0 %vm598_vm1, %v846_v20  ;;  %v1197_v20 = vld [vmem:[%s13130_s6] sm:$0x3] }
 0x13f   : > { %1137 = vmatpush1.bf16.msra.mxu0 %v8464_v0  ;;  %968 = vmatprep.mubr.bf16.mxu0 %v13158_v1  ;;  %v1206_v26 = vrot.slane %v1197_v20, %v1205_v22  ;;  %v8502_v22 = vld [vmem:[%s13126_s2 + $0x124] ss:$8 sps:$4 sm:$0xff]  }
 0x140   : > { %1138 = vmatprep.subr.bf16.mxu0 %v8469_v4 }
 0x143   : > { %1139 = vmatpush1.bf16.msra.mxu0 %v8467_v9 }
 0x144   : > { %1140 = vmatprep.subr.bf16.mxu0 %v8472_v11  ;;  %v8484_v11 = vld [vmem:[%s13126_s2 + $0xc4] ss:$8 sps:$4 sm:$0xff]  }
 0x146   : > { %7192 = vmatmul.mubr.msk.bf16.gmra.mrb[12].mxu0 %vm598_vm1, %v847_v17  ;;  %v9483_v17 = vsub.s32 0, %v9142_v2 }
 0x147   : > { %1141 = vmatpush1.bf16.msra.mxu0 %v8470_v13  ;;  %1168 = vmatprep.mubr.bf16.mxu0 %v13158_v1  ;;  %v8482_v13 = vld [vmem:[%s13126_s2 + $0xc0] ss:$8 sps:$4 sm:$0xff]  }
 0x148   : > { %1142 = vmatprep.subr.bf16.mxu0 %v8475_v10  ;;  %13333 = vst [vmem:[#allocation4_spill] sm:$0xff] %v9483_v17  ;;  %v1202_v23 = vrot.slane %v1197_v20, %v9483_v17  ;;  %v8487_v10 = vld [vmem:[%s13126_s2 + $0xd4] ss:$8 sps:$4 sm:$0xff]   ;;  %v8497_v20 = vld [vmem:[%s13126_s2 + $0x110] ss:$8 sps:$4 sm:$0xff]  }
 0x14b   : > { %1143 = vmatpush1.bf16.msra.mxu0 %v8473_v14  ;;  %v8485_v14 = vld [vmem:[%s13126_s2 + $0xd0] ss:$8 sps:$4 sm:$0xff]  }
 0x14c   : > { %1144 = vmatprep.subr.bf16.mxu0 %v8478_v18  ;;  %v8490_v18 = vld [vmem:[%s13126_s2 + $0xe4] ss:$8 sps:$4 sm:$0xff]  }
 0x14f   : > { %1145 = vmatpush1.bf16.msra.mxu0 %v8476_v19  ;;  %v8491_v19 = vld [vmem:[%s13126_s2 + $0xf0] ss:$8 sps:$4 sm:$0xff]  }
 0x150   : > { %1146 = vmatprep.subr.bf16.mxu0 %v8481_v8  ;;  %v8496_v8 = vld [vmem:[%s13126_s2 + $0x104] ss:$8 sps:$4 sm:$0xff]  }
 0x153   : > { %1147 = vmatpush1.bf16.msra.mxu0 %v8479_v12  ;;  %v8499_v12 = vld [vmem:[%s13126_s2 + $0x114] ss:$8 sps:$4 sm:$0xff]  }
 0x156   : > { %7207 = vmatmul.mubr.msk.bf16.vlgmr.msra.gmra.mrb[8].mxu0 %vm598_vm1, %v1056_v38 }
 0x157   : > { %1178 = vmatprep.mubr.bf16.mxu0 %v13158_v1 }
 0x15e   : > { %7208 = vmatmul.mubr.msk.bf16.gmra.mrb[12].mxu0 %vm598_vm1, %v1057_v36 }
 0x15f   : > { %1280 = vmatprep.mubr.bf16.mxu0 %v13158_v1 }
 0x229   : > { %v1170_v28 = vpop.f32.mrb[8].mxu0 }
 0x22a   : > { %v1209_v29 = vadd.f32 %v1202_v23, %v1170_v28  ;;  %v1172_v30 = vpop.f32.mrb[9].mxu0  ;;  %v8508_v28 = vld [vmem:[%s13126_s2 + $0x144] ss:$8 sps:$4 sm:$0xff]  }
 0x22b   : > { %v1210_v24 = vadd.f32 %v1206_v26, %v1172_v30  ;;  %v1174_v31 = vpop.f32.mrb[10].mxu0  ;;  %v8511_v30 = vld [vmem:[%s13126_s2 + $0x154] ss:$8 sps:$4 sm:$0xff]  }
 0x22c   : > { %v1225_v32 = vmul.f32 0.2, %v1209_v29  ;;  %v1211_v33 = vadd.f32 %v1202_v23, %v1174_v31  ;;  %v1176_v34 = vpop.f32.mrb[11].mxu0  ;;  %vm1217_vm3 = vcmp.gt.f32.partialorder %v1209_v29, 0.0  ;;  %v8514_v31 = vld [vmem:[%s13126_s2 + $0x164] ss:$8 sps:$4 sm:$0xff]  }
 0x22d   : > { %v1226_v36 = vmul.f32 0.2, %v1210_v24  ;;  %v1212_v37 = vadd.f32 %v1206_v26, %v1176_v34  ;;  %vm1218_vm4 = vcmp.gt.f32.partialorder %v1210_v24, 0.0  ;;  %v8515_v34 = vld [vmem:[%s13126_s2 + $0x170] ss:$8 sps:$4 sm:$0xff]  }
 0x22e   : > { %vm1219_vm5 = vcmp.gt.f32.partialorder %v1211_v33, 0.0  ;;  %v1227_v38 = vmul.f32 0.2, %v1211_v33  ;;  %v1233_v42 = vsel %vm1217_vm3, %v1209_v29, %v1225_v32  ;;  %v8506_v29 = vld [vmem:[%s13126_s2 + $0x140] ss:$8 sps:$4 sm:$0xff]  }
 0x22f   : > { %vm1220_vm6 = vcmp.gt.f32.partialorder %v1212_v37, 0.0  ;;  %v1228_v39 = vmul.f32 0.2, %v1212_v37  ;;  %v1234_v45 = vsel %vm1218_vm4, %v1210_v24, %v1226_v36  ;;  %v8509_v24 = vld [vmem:[%s13126_s2 + $0x150] ss:$8 sps:$4 sm:$0xff]  }
 0x230   : > { %v1235_v44 = vsel %vm1219_vm5, %v1211_v33, %v1227_v38  ;;  %v8512_v32 = vld [vmem:[%s13126_s2 + $0x160] ss:$8 sps:$4 sm:$0xff]   ;;  %v8517_v33 = vld [vmem:[%s13126_s2 + $0x174] ss:$8 sps:$4 sm:$0xff]   ;;  %v8520_v36 = vld [vmem:[%s13126_s2 + $0x4] ss:$8 sps:$4 sm:$0xff]  }
 0x231   : > { %v1241_v46 = vpack.c.bf16 %v1235_v44, %v1233_v42  ;;  %v1236_v47 = vsel %vm1220_vm6, %v1212_v37, %v1228_v39  ;;  %v1180_v48 = vpop.f32.mrb[12].mxu0 }
 0x232   : > { %v1242_v49 = vpack.c.bf16 %v1236_v47, %v1234_v45  ;;  %v1213_v50 = vadd.f32 %v1202_v23, %v1180_v48  ;;  %v1182_v51 = vpop.f32.mrb[13].mxu0 }
 0x233   : > { %v1214_v52 = vadd.f32 %v1206_v26, %v1182_v51  ;;  %v1184_v53 = vpop.f32.mrb[14].mxu0  ;;  %v8518_v51 = vld [vmem:[%s13126_s2] ss:$8 sps:$4 sm:$0xff]  }
 0x234   : > { %v1229_v54 = vmul.f32 0.2, %v1213_v50  ;;  %v1215_v55 = vadd.f32 %v1202_v23, %v1184_v53  ;;  %v1186_v56 = vpop.f32.mrb[15].mxu0  ;;  %1248 = vmatprep.subr.bf16.mxu0 %v1242_v49  ;;  %1319 = vmatprep.subr.bf16.mxu1 %v1242_v49  ;;  %vm1221_vm7 = vcmp.gt.f32.partialorder %v1213_v50, 0.0  ;;  %v8500_v23 = vld [vmem:[%s13126_s2 + $0x120] ss:$8 sps:$4 sm:$0xff]  }
 0x235   : > { %v1230_v57 = vmul.f32 0.2, %v1214_v52  ;;  %v1216_v58 = vadd.f32 %v1206_v26, %v1186_v56  ;;  %1249 = vmatpush1.bf16.msra.mxu0 %v1241_v46  ;;  %1320 = vmatpush1.bf16.msra.mxu1 %v1241_v46  ;;  %vm1222_vm8 = vcmp.gt.f32.partialorder %v1214_v52, 0.0  ;;  %v8503_v26 = vld [vmem:[%s13126_s2 + $0x130] ss:$8 sps:$4 sm:$0xff]  }
 0x236   : > { %vm1223_vm9 = vcmp.gt.f32.partialorder %v1215_v55, 0.0  ;;  %v1231_v59 = vmul.f32 0.2, %v1215_v55  ;;  %v1237_v61 = vsel %vm1221_vm7, %v1213_v50, %v1229_v54  ;;  %v8523_v53 = vld [vmem:[%s13126_s2 + $0x14] ss:$8 sps:$4 sm:$0xff]  }
 0x237   : > { %vm1224_vm10 = vcmp.gt.f32.partialorder %v1216_v58, 0.0  ;;  %v1232_v60 = vmul.f32 0.2, %v1216_v58  ;;  %v1238_v63 = vsel %vm1222_vm8, %v1214_v52, %v1230_v57  ;;  %v8521_v54 = vld [vmem:[%s13126_s2 + $0x10] ss:$8 sps:$4 sm:$0xff]  }
 0x238   : > { %v1239_v62 = vsel %vm1223_vm9, %v1215_v55, %v1231_v59  ;;  %v8526_v56 = vld [vmem:[%s13126_s2 + $0x24] ss:$8 sps:$4 sm:$0xff]  }
 0x239   : > { %v1243_v0 = vpack.c.bf16 %v1239_v62, %v1237_v61  ;;  %v1240_v4 = vsel %vm1224_vm10, %v1216_v58, %v1232_v60  ;;  %v8524_v61 = vld [vmem:[%s13126_s2 + $0x20] ss:$8 sps:$4 sm:$0xff]  }
 0x23a   : > { %v1244_v9 = vpack.c.bf16 %v1240_v4, %v1238_v63  ;;  %v8529_v63 = vld [vmem:[%s13126_s2 + $0x34] ss:$8 sps:$4 sm:$0xff]  }
 0x23c   : > { %1250 = vmatprep.subr.bf16.mxu0 %v1244_v9  ;;  %1321 = vmatprep.subr.bf16.mxu1 %v1244_v9 }
 0x23d   : > { %1251 = vmatpush1.bf16.msra.mxu0 %v1243_v0  ;;  %1322 = vmatpush1.bf16.msra.mxu1 %v1243_v0 }
 0x23e   : > { %1722 = vmatprep.subr.bf16.mxu0 %v1242_v49  ;;  %1511 = vmatprep.subr.bf16.mxu1 %v8484_v11 }
 0x240   : > { %7210 = vmatmul.mubr.msk.bf16.vlgmr.msra.gmra.mrb[8].mxu1 %vm13134_vm11, %v9236_v41  ;;  %7209 = vmatmul.mubr.msk.bf16.vlgmr.msra.gmra.mrb[16].mxu0 %vm13134_vm11, %v9189_v21  ;;  %v8488_v21 = vld [vmem:[%s13126_s2 + $0xe0] ss:$8 sps:$4 sm:$0xff]   ;;  %v8493_v41 = vld [vmem:[%s13126_s2 + $0xf4] ss:$8 sps:$4 sm:$0xff]  }
 0x241   : > { %1723 = vmatpush1.bf16.msra.mxu0 %v1241_v46  ;;  %1754 = vmatprep.mubr.bf16.mxu0 %v13158_v1 }
 0x242   : > { %1724 = vmatprep.subr.bf16.mxu0 %v1244_v9  ;;  %1512 = vmatpush1.bf16.msra.mxu1 %v8482_v13 }
 0x243   : > { %1513 = vmatprep.subr.bf16.mxu1 %v8487_v10 }
 0x245   : > { %1725 = vmatpush1.bf16.msra.mxu0 %v1243_v0 }
 0x246   : > { %1963 = vmatprep.subr.bf16.mxu0 %v1242_v49  ;;  %1514 = vmatpush1.bf16.msra.mxu1 %v8485_v14 }
 0x247   : > { %1515 = vmatprep.subr.bf16.mxu1 %v8490_v18  ;;  %v8530_v18 = vld [vmem:[%s13126_s2 + $0x40] ss:$8 sps:$4 sm:$0xff]  }
 0x248   : > { %7261 = vmatmul.mubr.msk.bf16.vlgmr.msra.gmra.mrb[20].mxu0 %vm13134_vm11, %v9225_v35  ;;  %v8494_v35 = vld [vmem:[%s13126_s2 + $0x100] ss:$8 sps:$4 sm:$0xff]  }
 0x249   : > { %1964 = vmatpush1.bf16.msra.mxu0 %v1241_v46  ;;  %1995 = vmatprep.mubr.bf16.mxu0 %v13158_v1 }
 0x24a   : > { %1965 = vmatprep.subr.bf16.mxu0 %v1244_v9  ;;  %1516 = vmatpush1.bf16.msra.mxu1 %v8488_v21  ;;  %v8532_v9 = vld [vmem:[%s13126_s2 + $0x44] ss:$8 sps:$4 sm:$0xff]  }
 0x24b   : > { %1517 = vmatprep.subr.bf16.mxu1 %v8493_v41  ;;  %v8535_v41 = vld [vmem:[%s13126_s2 + $0x54] ss:$8 sps:$4 sm:$0xff]  }
 0x24d   : > { %1966 = vmatpush1.bf16.msra.mxu0 %v1243_v0  ;;  %v8527_v0 = vld [vmem:[%s13126_s2 + $0x30] ss:$8 sps:$4 sm:$0xff]  }
 0x24e   : > { %1518 = vmatpush1.bf16.msra.mxu1 %v8491_v19  ;;  %v9638_v19 = vmul.u32 24, %v9152_v5 }
 0x24f   : > { %1519 = vmatprep.subr.bf16.mxu1 %v8496_v8  ;;  %v9641_v8 = vadd.s32 1, %v9152_v5 }
 0x250   : > { %7287 = vmatmul.mubr.msk.bf16.vlgmr.msra.gmra.mrb[24].mxu0 %vm13134_vm11, %v9245_v43  ;;  %v8505_v43 = vld [vmem:[%s13126_s2 + $0x134] ss:$8 sps:$4 sm:$0xff]   ;;  %vm2223_vm12 = vcmp.ge.s32.totalorder %v9142_v2, %v9638_v19  ;;  %vm2224_vm13 = vcmp.ge.s32.totalorder %v9146_v3, %v9638_v19  ;;  %vm2225_vm1 = vcmp.ge.s32.totalorder %v9155_v6, %v9638_v19  ;;  %vm2226_vm5 = vcmp.ge.s32.totalorder %v9158_v7, %v9638_v19 }
 0x251   : > { %13334 = vst [vmem:[#allocation5_spill] sm:$0xff] %v9641_v8 }
 0x252   : > { %1520 = vmatpush1.bf16.msra.mxu1 %v8494_v35  ;;  %v8533_v35 = vld [vmem:[%s13126_s2 + $0x50] ss:$8 sps:$4 sm:$0xff]  }
 0x253   : > { %1521 = vmatprep.subr.bf16.mxu1 %v8499_v12  ;;  %v13164_v12 = vmov 0.0|0.0  }
 0x254   : > { %7977 = vmatprep.subr.bf16.mxu0 %v13164_v12 }
 0x256   : > { %1522 = vmatpush1.bf16.msra.mxu1 %v8497_v20  ;;  %v8538_v20 = vld [vmem:[%s13126_s2 + $0x64] ss:$8 sps:$4 sm:$0xff]  }
 0x257   : > { %1523 = vmatprep.subr.bf16.mxu1 %v8502_v22  ;;  %v9653_v22 = vmul.u32 24, %v9641_v8 }
 0x259   : > { %vm2249_vm14 = vcmp.lt.s32.totalorder %v9142_v2, %v9653_v22  ;;  %vm2250_vm15 = vcmp.lt.s32.totalorder %v9146_v3, %v9653_v22  ;;  %vm2251_vm3 = vcmp.lt.s32.totalorder %v9155_v6, %v9653_v22  ;;  %vm2252_vm6 = vcmp.lt.s32.totalorder %v9158_v7, %v9653_v22 }
 0x25a   : > { %1524 = vmatpush1.bf16.msra.mxu1 %v8500_v23  ;;  %v9662_v23 = vadd.s32 32, %v9142_v2  ;;  %vm9667_vm0 = vmand %vm2223_vm12, %vm2249_vm14 }
 0x25b   : > { %1525 = vmatprep.subr.bf16.mxu1 %v8505_v43  ;;  %v8536_v43 = vld [vmem:[%s13126_s2 + $0x60] ss:$8 sps:$4 sm:$0xff]   ;;  %vm9681_vm4 = vmand %vm2224_vm13, %vm2250_vm15 }
 0x25c   : > { %13335 = vst [vmem:[#allocation6_spill] sm:$0xff] %v9662_v23  ;;  %vm13136_vm7 = vmpackc.low %vm9681_vm4, %vm9667_vm0  ;;  %vm2227_vm9 = vcmp.ge.s32.totalorder %v9662_v23, %v9638_v19  ;;  %vm2253_vm10 = vcmp.lt.s32.totalorder %v9662_v23, %v9653_v22 }
 0x25d   : > { %vm9702_vm8 = vmand %vm2225_vm1, %vm2251_vm3 }
 0x25e   : > { %1526 = vmatpush1.bf16.msra.mxu1 %v8503_v26  ;;  %vm9717_vm12 = vmand %vm2226_vm5, %vm2252_vm6 }
 0x25f   : > { %1527 = vmatprep.subr.bf16.mxu1 %v8508_v28  ;;  %v9676_v28 = vadd.s32 40, %v9142_v2  ;;  %vm13135_vm15 = vmpackc.low %vm9717_vm12, %vm9702_vm8 }
 0x260   : > { %vm9735_vm1 = vmand %vm2227_vm9, %vm2253_vm10 }
 0x261   : > { %13338 = vst [vmem:[#allocation7_spill] sm:$0xff] %v9676_v28  ;;  %vm2228_vm13 = vcmp.ge.s32.totalorder %v9676_v28, %v9638_v19  ;;  %vm2254_vm14 = vcmp.lt.s32.totalorder %v9676_v28, %v9653_v22 }
 0x262   : > { %1528 = vmatpush1.bf16.msra.mxu1 %v8506_v29  ;;  %v8541_v29 = vld [vmem:[%s13126_s2 + $0x74] ss:$8 sps:$4 sm:$0xff]   ;;  %vm9752_vm6 = vmand %vm2228_vm13, %vm2254_vm14 }
 0x263   : > { %1529 = vmatprep.subr.bf16.mxu1 %v8511_v30  ;;  %vm13138_vm13 = vmpackc.low %vm9752_vm6, %vm9735_vm1 }
 0x266   : > { %1530 = vmatpush1.bf16.msra.mxu1 %v8509_v24  ;;  %v9694_v24 = vadd.s32 48, %v9142_v2 }
 0x267   : > { %1531 = vmatprep.subr.bf16.mxu1 %v8514_v31  ;;  %v13162_v31 = vmov 1.0|1.0  }
 0x268   : > { %13341 = vst [vmem:[#allocation8_spill] sm:$0xff] %v9694_v24  ;;  %7979 = vmatpush1.bf16.msk.msra.mxu0 %vm13136_vm7, %v13162_v31  ;;  %vm2229_vm3 = vcmp.ge.s32.totalorder %v9694_v24, %v9638_v19  ;;  %vm2255_vm5 = vcmp.lt.s32.totalorder %v9694_v24, %v9653_v22 }
 0x269   : > { %7980 = vmatprep.subr.bf16.mxu0 %v13164_v12  ;;  %vm9774_vm14 = vmand %vm2229_vm3, %vm2255_vm5 }
 0x26a   : > { %1532 = vmatpush1.bf16.msra.mxu1 %v8512_v32  ;;  %v13439_v32 = vmov 0.0  }
 0x26b   : > { %1533 = vmatprep.subr.bf16.mxu1 %v8517_v33  ;;  %v9711_v33 = vadd.s32 56, %v9142_v2 }
 0x26c   : > { %7982 = vmatpush1.bf16.msk.msra.mxu0 %vm13135_vm15, %v13162_v31 }
 0x26d   : > { %13344 = vst [vmem:[#allocation9_spill] sm:$0xff] %v9711_v33  ;;  %vm2230_vm9 = vcmp.ge.s32.totalorder %v9711_v33, %v9638_v19  ;;  %vm2256_vm10 = vcmp.lt.s32.totalorder %v9711_v33, %v9653_v22  ;;  %7983 = vmatprep.subr.bf16.mxu0 %v13164_v12 }
 0x26e   : > { %1534 = vmatpush1.bf16.msra.mxu1 %v8515_v34  ;;  %v8539_v34 = vld [vmem:[%s13126_s2 + $0x70] ss:$8 sps:$4 sm:$0xff]   ;;  %vm9785_vm7 = vmand %vm2230_vm9, %vm2256_vm10 }
 0x26f   : > { %1677 = vmatprep.subr.bf16.mxu1 %v8520_v36  ;;  %v10346_v36 = vadd.s32 128, %v9152_v5 }
 0x270   : > { %7985 = vmatpush1.bf16.msk.msra.mxu0 %vm13138_vm13, %v13162_v31 }
 0x271   : > { %7986 = vmatprep.subr.bf16.mxu0 %v13164_v12 }
 0x313   : > { %v1353_v37 = vpop.f32.mrb[8].mxu1  ;;  %v9575_v38 = vpop.f32.mrb[16].mxu0 }
 0x314   : > { %v1355_v39 = vpop.f32.mrb[9].mxu1  ;;  %v1284_v42 = vpop.f32.mrb[17].mxu0 }
 0x315   : > { %v1357_v44 = vpop.f32.mrb[10].mxu1  ;;  %v9577_v45 = vpop.f32.mrb[18].mxu0 }
 0x316   : > { %v1362_v46 = vpack.c.bf16 %v1357_v44, %v1353_v37  ;;  %v1359_v47 = vpop.f32.mrb[11].mxu1  ;;  %v1291_v48 = vpack.c.bf16 %v9577_v45, %v9575_v38  ;;  %v1288_v49 = vpop.f32.mrb[19].mxu0  ;;  %v8544_v37 = vld [vmem:[%s13126_s2 + $0x84] ss:$8 sps:$4 sm:$0xff]   ;;  %v9744_v44 = vadd.s32 72, %v9142_v2 }
 0x317   : > { %v1363_v50 = vpack.c.bf16 %v1359_v47, %v1355_v39  ;;  %v1292_v52 = vpack.c.bf16 %v1288_v49, %v1284_v42  ;;  %v9733_v39 = vadd.s32 64, %v9142_v2  ;;  %v13348_v42 = vmov 0  ;;  %v8542_v47 = vld [vmem:[%s13126_s2 + $0x80] ss:$8 sps:$4 sm:$0xff]   ;;  %v8562_v38 = vld [vmem:[%s13126_s2 + $0x1a4] ss:$8 sps:$4 sm:$0xff]  }
 0x318   : > { %v13349_v42 = vsel %vm9735_vm1, 4294967295, %v13348_v42  ;;  %13350 = vst [vmem:[#allocation11_spill] sm:$0xff] %v9744_v44  ;;  %v9769_v49 = vadd.s32 80, %v9142_v2  ;;  %vm2258_vm3 = vcmp.lt.s32.totalorder %v9744_v44, %v9653_v22  ;;  %v8560_v45 = vld [vmem:[%s13126_s2 + $0x1a0] ss:$8 sps:$4 sm:$0xff]  }
 0x319   : > { %7235 = vmatprep.mubr.msk.bf16.mxu1 %vm13137_vm2, %v1363_v50  ;;  %13347 = vst [vmem:[#allocation10_spill] sm:$0xff] %v9733_v39  ;;  %v8547_v50 = vld [vmem:[%s13126_s2 + $0x94] ss:$8 sps:$4 sm:$0xff]   ;;  %vm2231_vm11 = vcmp.ge.s32.totalorder %v9733_v39, %v9638_v19  ;;  %vm2257_vm15 = vcmp.lt.s32.totalorder %v9733_v39, %v9653_v22 }
 0x31a   : > { %1544 = vmatmul.mubr.bf16.vlgmr.msra.gmra.mrb[12].mxu1 %v1362_v46  ;;  %13353 = vst [vmem:[#allocation12_spill] sm:$0xff] %v9769_v49  ;;  %vm9807_vm9 = vmand %vm2231_vm11, %vm2257_vm15  ;;  %vm2233_vm10 = vcmp.ge.s32.totalorder %v9769_v49, %v9638_v19  ;;  %vm2259_vm13 = vcmp.lt.s32.totalorder %v9769_v49, %v9653_v22  ;;  %v9078_v46 = vmov 1.0  }
 0x31b   : > { %1678 = vmatpush1.bf16.msra.mxu1 %v8518_v51  ;;  %7260 = vmatprep.mubr.msk.bf16.mxu1 %vm13137_vm2, %v1292_v52  ;;  %v9592_v55 = vpop.f32.mrb[20].mxu0  ;;  %v13354_v51 = vmov 0  ;;  %v9783_v52 = vadd.s32 88, %v9142_v2  ;;  %vm2232_vm2 = vcmp.ge.s32.totalorder %v9744_v44, %v9638_v19 }
 0x31c   : > { %1679 = vmatprep.subr.bf16.mxu1 %v8523_v53  ;;  %v9597_v57 = vpop.f32.mrb[21].mxu0  ;;  %v13355_v51 = vsel %vm9774_vm14, 4294967295, %v13354_v51  ;;  %v13357_v53 = vmov 0  ;;  %vm9818_vm5 = vmand %vm2232_vm2, %vm2258_vm3 }
 0x31d   : > { %v9599_v58 = vpop.f32.mrb[22].mxu0  ;;  %13356 = vst [vmem:[#allocation13_spill] sm:$0xff] %v9783_v52  ;;  %v13358_v53 = vsel %vm9785_vm7, 4294967295, %v13357_v53  ;;  %vm2234_vm11 = vcmp.ge.s32.totalorder %v9783_v52, %v9638_v19  ;;  %vm2260_vm15 = vcmp.lt.s32.totalorder %v9783_v52, %v9653_v22  ;;  %vm13365_vm2 = vmpackc.low %vm9785_vm7, %vm9774_vm14 }
 0x31e   : > { %v1765_v59 = vpack.c.bf16 %v9599_v58, %v9592_v55  ;;  %v9603_v60 = vpop.f32.mrb[23].mxu0  ;;  %7988 = vmatpush1.bf16.msk.msra.mxu0 %vm13365_vm2, %v13162_v31  ;;  %vm9842_vm3 = vmand %vm2233_vm10, %vm2259_vm13  ;;  %v8596_v55 = vld [vmem:[%s13126_s2 + $0x260] ss:$8 sps:$4 sm:$0xff]   ;;  %v8601_v58 = vld [vmem:[%s13126_s2 + $0x274] ss:$8 sps:$4 sm:$0xff]  }
 0x31f   : > { %1680 = vmatpush1.bf16.msra.mxu1 %v8521_v54  ;;  %v1766_v62 = vpack.c.bf16 %v9603_v60, %v9597_v57  ;;  %v8545_v54 = vld [vmem:[%s13126_s2 + $0x90] ss:$8 sps:$4 sm:$0xff]   ;;  %7989 = vmatprep.subr.bf16.mxu0 %v13164_v12  ;;  %vm9850_vm1 = vmand %vm2234_vm11, %vm2260_vm15  ;;  %v8568_v60 = vld [vmem:[%s13126_s2 + $0x1c4] ss:$8 sps:$4 sm:$0xff]  }
 0x320   : > { %1681 = vmatprep.subr.bf16.mxu1 %v8526_v56  ;;  %vm13370_vm15 = vmpackc.low %vm9818_vm5, %vm9807_vm9  ;;  %v8563_v57 = vld [vmem:[%s13126_s2 + $0x1b0] ss:$8 sps:$4 sm:$0xff]  }
 0x321   : > { %vm13143_vm14 = vmpackc.low %vm9850_vm1, %vm9842_vm3 }
 0x322   : > { %7991 = vmatpush1.bf16.msk.msra.mxu0 %vm13370_vm15, %v13162_v31 }
 0x323   : > { %1682 = vmatpush1.bf16.msra.mxu1 %v8524_v61  ;;  %v9616_v4 = vpop.f32.mrb[24].mxu0  ;;  %v8550_v61 = vld [vmem:[%s13126_s2 + $0xa4] ss:$8 sps:$4 sm:$0xff]   ;;  %7992 = vmatprep.subr.bf16.mxu0 %v13164_v12 }
 0x324   : > { %1683 = vmatprep.subr.bf16.mxu1 %v8529_v63  ;;  %v9621_v11 = vpop.f32.mrb[25].mxu0 }
 0x325   : > { %v9623_v13 = vpop.f32.mrb[26].mxu0 }
 0x326   : > { %v2006_v10 = vpack.c.bf16 %v9623_v13, %v9616_v4  ;;  %v9627_v14 = vpop.f32.mrb[27].mxu0  ;;  %7994 = vmatpush1.bf16.msk.msra.mxu0 %vm13143_vm14, %v13162_v31  ;;  %v13379_v4 = vmov 0  ;;  %v13381_v13 = vmov 0 }
 0x327   : > { %1684 = vmatpush1.bf16.msra.mxu1 %v8527_v0  ;;  %v2007_v21 = vpack.c.bf16 %v9627_v14, %v9621_v11  ;;  %v9827_v0 = vadd.s32 96, %v9142_v2  ;;  %7995 = vmatprep.subr.bf16.mxu0 %v13164_v12  ;;  %v8604_v11 = vld [vmem:[%s13126_s2 + $0x284] ss:$8 sps:$4 sm:$0xff]   ;;  %v8602_v14 = vld [vmem:[%s13126_s2 + $0x280] ss:$8 sps:$4 sm:$0xff]  }
 0x328   : > { %1685 = vmatprep.subr.bf16.mxu1 %v8532_v9  ;;  %v9834_v9 = vadd.s32 104, %v9142_v2 }
 0x329   : > { %13363 = vst [vmem:[#allocation14_spill] sm:$0xff] %v9827_v0  ;;  %vm2235_vm13 = vcmp.ge.s32.totalorder %v9827_v0, %v9638_v19  ;;  %vm2261_vm10 = vcmp.lt.s32.totalorder %v9827_v0, %v9653_v22 }
 0x32a   : > { %13364 = vst [vmem:[#allocation15_spill] sm:$0xff] %v9834_v9  ;;  %vm2236_vm2 = vcmp.ge.s32.totalorder %v9834_v9, %v9638_v19  ;;  %vm2262_vm11 = vcmp.lt.s32.totalorder %v9834_v9, %v9653_v22  ;;  %vm9879_vm7 = vmand %vm2235_vm13, %vm2261_vm10  ;;  %vm13375_vm10 = vcmask 523264  }
 0x32b   : > { %1686 = vmatpush1.bf16.msra.mxu1 %v8530_v18  ;;  %v13366_v18 = vmov 0  ;;  %vm9886_vm15 = vmand %vm2236_vm2, %vm2262_vm11 }
 0x32c   : > { %1687 = vmatprep.subr.bf16.mxu1 %v8535_v41  ;;  %v13367_v18 = vsel %vm9842_vm3, 4294967295, %v13366_v18  ;;  %v8548_v41 = vld [vmem:[%s13126_s2 + $0xa0] ss:$8 sps:$4 sm:$0xff]   ;;  %vm13142_vm13 = vmpackc.low %vm9886_vm15, %vm9879_vm7 }
 0x32d   : > { %7997 = vmatpush1.bf16.msk.msra.mxu0 %vm13142_vm13, %v13162_v31  ;;  %vm13376_vm2 = vmmov %vm13375_vm10 }
 0x32e   : > { %7998 = vmatprep.subr.bf16.mxu0 %v13164_v12 }
 0x32f   : > { %1688 = vmatpush1.bf16.msra.mxu1 %v8533_v35 }
 0x330   : > { %1689 = vmatprep.subr.bf16.mxu1 %v8538_v20  ;;  %v8553_v20 = vld [vmem:[%s13126_s2 + $0xb4] ss:$8 sps:$4 sm:$0xff]  }
 0x333   : > { %1690 = vmatpush1.bf16.msra.mxu1 %v8536_v43  ;;  %v8551_v43 = vld [vmem:[%s13126_s2 + $0xb0] ss:$8 sps:$4 sm:$0xff]  }
 0x334   : > { %1691 = vmatprep.subr.bf16.mxu1 %v8541_v29  ;;  %v13371_v29 = vmov 0 }
 0x335   : > { %v13372_v29 = vsel %vm9879_vm7, 4294967295, %v13371_v29 }
 0x337   : > { %1692 = vmatpush1.bf16.msra.mxu1 %v8539_v34  ;;  %v8556_v34 = vld [vmem:[%s13126_s2 + $0x184] ss:$8 sps:$4 sm:$0xff]  }
 0x338   : > { %1693 = vmatprep.subr.bf16.mxu1 %v8544_v37  ;;  %v13373_v37 = vmov 0 }
 0x339   : > { %v13374_v37 = vsel %vm9886_vm15, 4294967295, %v13373_v37 }
 0x33b   : > { %1694 = vmatpush1.bf16.msra.mxu1 %v8542_v47  ;;  %v8554_v47 = vld [vmem:[%s13126_s2 + $0x180] ss:$8 sps:$4 sm:$0xff]  }
 0x33c   : > { %1695 = vmatprep.subr.bf16.mxu1 %v8547_v50  ;;  %v8559_v50 = vld [vmem:[%s13126_s2 + $0x194] ss:$8 sps:$4 sm:$0xff]  }
 0x33f   : > { %1696 = vmatpush1.bf16.msra.mxu1 %v8545_v54  ;;  %v8557_v54 = vld [vmem:[%s13126_s2 + $0x190] ss:$8 sps:$4 sm:$0xff]  }
 0x340   : > { %1697 = vmatprep.subr.bf16.mxu1 %v8550_v61  ;;  %v8571_v61 = vld [vmem:[%s13126_s2 + $0x1d4] ss:$8 sps:$4 sm:$0xff]  }
 0x343   : > { %1698 = vmatpush1.bf16.msra.mxu1 %v8548_v41  ;;  %v8569_v41 = vld [vmem:[%s13126_s2 + $0x1d0] ss:$8 sps:$4 sm:$0xff]  }
 0x344   : > { %1699 = vmatprep.subr.bf16.mxu1 %v8553_v20  ;;  %v8574_v20 = vld [vmem:[%s13126_s2 + $0x1e4] ss:$8 sps:$4 sm:$0xff]  }
 0x347   : > { %1700 = vmatpush1.bf16.msra.mxu1 %v8551_v43  ;;  %v8572_v43 = vld [vmem:[%s13126_s2 + $0x1e0] ss:$8 sps:$4 sm:$0xff]  }
 0x348   : > { %1914 = vmatprep.subr.bf16.mxu1 %v8556_v34  ;;  %v8577_v34 = vld [vmem:[%s13126_s2 + $0x1f4] ss:$8 sps:$4 sm:$0xff]  }
 0x34a   : > { %1710 = vmatmul.mubr.bf16.vlgmr.msra.gmra.mrb[12].mxu1 %v1291_v48  ;;  %v8565_v48 = vld [vmem:[%s13126_s2 + $0x1b4] ss:$8 sps:$4 sm:$0xff]  }
 0x34b   : > { %1915 = vmatpush1.bf16.msra.mxu1 %v8554_v47  ;;  %7286 = vmatprep.mubr.msk.bf16.mxu1 %vm13375_vm10, %v1766_v62  ;;  %v8566_v62 = vld [vmem:[%s13126_s2 + $0x1c0] ss:$8 sps:$4 sm:$0xff]   ;;  %v8575_v47 = vld [vmem:[%s13126_s2 + $0x1f0] ss:$8 sps:$4 sm:$0xff]  }
 0x34c   : > { %1916 = vmatprep.subr.bf16.mxu1 %v8559_v50  ;;  %v8580_v50 = vld [vmem:[%s13126_s2 + $0x204] ss:$8 sps:$4 sm:$0xff]  }
 0x34f   : > { %1917 = vmatpush1.bf16.msra.mxu1 %v8557_v54  ;;  %v8578_v54 = vld [vmem:[%s13126_s2 + $0x200] ss:$8 sps:$4 sm:$0xff]  }
 0x350   : > { %1918 = vmatprep.subr.bf16.mxu1 %v8562_v38  ;;  %v8583_v38 = vld [vmem:[%s13126_s2 + $0x214] ss:$8 sps:$4 sm:$0xff]  }
 0x353   : > { %1919 = vmatpush1.bf16.msra.mxu1 %v8560_v45  ;;  %v8581_v45 = vld [vmem:[%s13126_s2 + $0x210] ss:$8 sps:$4 sm:$0xff]  }
 0x354   : > { %1920 = vmatprep.subr.bf16.mxu1 %v8565_v48  ;;  %v8586_v48 = vld [vmem:[%s13126_s2 + $0x224] ss:$8 sps:$4 sm:$0xff]  }
 0x357   : > { %1921 = vmatpush1.bf16.msra.mxu1 %v8563_v57  ;;  %v8584_v57 = vld [vmem:[%s13126_s2 + $0x220] ss:$8 sps:$4 sm:$0xff]  }
 0x358   : > { %1922 = vmatprep.subr.bf16.mxu1 %v8568_v60  ;;  %v8589_v60 = vld [vmem:[%s13126_s2 + $0x234] ss:$8 sps:$4 sm:$0xff]  }
 0x35b   : > { %1923 = vmatpush1.bf16.msra.mxu1 %v8566_v62  ;;  %v8587_v62 = vld [vmem:[%s13126_s2 + $0x230] ss:$8 sps:$4 sm:$0xff]  }
 0x35c   : > { %1924 = vmatprep.subr.bf16.mxu1 %v8571_v61  ;;  %v8592_v61 = vld [vmem:[%s13126_s2 + $0x244] ss:$8 sps:$4 sm:$0xff]  }
 0x35f   : > { %1925 = vmatpush1.bf16.msra.mxu1 %v8569_v41  ;;  %v8590_v41 = vld [vmem:[%s13126_s2 + $0x240] ss:$8 sps:$4 sm:$0xff]  }
 0x360   : > { %1926 = vmatprep.subr.bf16.mxu1 %v8574_v20  ;;  %v8595_v20 = vld [vmem:[%s13126_s2 + $0x254] ss:$8 sps:$4 sm:$0xff]  }
 0x363   : > { %1927 = vmatpush1.bf16.msra.mxu1 %v8572_v43  ;;  %v8593_v43 = vld [vmem:[%s13126_s2 + $0x250] ss:$8 sps:$4 sm:$0xff]  }
 0x364   : > { %1928 = vmatprep.subr.bf16.mxu1 %v8577_v34  ;;  %v8598_v34 = vld [vmem:[%s13126_s2 + $0x264] ss:$8 sps:$4 sm:$0xff]  }
 0x367   : > { %1929 = vmatpush1.bf16.msra.mxu1 %v8575_v47  ;;  %v8605_v47 = vld [vmem:[%s13126_s2 + $0x290] ss:$8 sps:$4 sm:$0xff]  }
 0x368   : > { %1930 = vmatprep.subr.bf16.mxu1 %v8580_v50  ;;  %v8610_v50 = vld [vmem:[%s13126_s2 + $0x2a4] ss:$8 sps:$4 sm:$0xff]  }
 0x36b   : > { %1931 = vmatpush1.bf16.msra.mxu1 %v8578_v54  ;;  %v8608_v54 = vld [vmem:[%s13126_s2 + $0x2a0] ss:$8 sps:$4 sm:$0xff]  }
 0x36c   : > { %1932 = vmatprep.subr.bf16.mxu1 %v8583_v38  ;;  %v8613_v38 = vld [vmem:[%s13126_s2 + $0x2b4] ss:$8 sps:$4 sm:$0xff]  }
 0x36f   : > { %1933 = vmatpush1.bf16.msra.mxu1 %v8581_v45  ;;  %v8611_v45 = vld [vmem:[%s13126_s2 + $0x2b0] ss:$8 sps:$4 sm:$0xff]  }
 0x370   : > { %1934 = vmatprep.subr.bf16.mxu1 %v8586_v48  ;;  %v8616_v48 = vld [vmem:[%s13126_s2 + $0x2c4] ss:$8 sps:$4 sm:$0xff]  }
 0x373   : > { %1935 = vmatpush1.bf16.msra.mxu1 %v8584_v57  ;;  %v8614_v57 = vld [vmem:[%s13126_s2 + $0x2c0] ss:$8 sps:$4 sm:$0xff]  }
 0x374   : > { %1936 = vmatprep.subr.bf16.mxu1 %v8589_v60  ;;  %v8619_v60 = vld [vmem:[%s13126_s2 + $0x2d4] ss:$8 sps:$4 sm:$0xff]  }
 0x377   : > { %1937 = vmatpush1.bf16.msra.mxu1 %v8587_v62  ;;  %v8617_v62 = vld [vmem:[%s13126_s2 + $0x2d0] ss:$8 sps:$4 sm:$0xff]  }
 0x378   : > { %2155 = vmatprep.subr.bf16.mxu1 %v8592_v61  ;;  %v8622_v61 = vld [vmem:[%s13126_s2 + $0x2e4] ss:$8 sps:$4 sm:$0xff]  }
 0x37a   : > { %1947 = vmatmul.mubr.bf16.vlgmr.msra.gmra.mrb[12].mxu1 %v1765_v59  ;;  %v8599_v59 = vld [vmem:[%s13126_s2 + $0x270] ss:$8 sps:$4 sm:$0xff]  }
 0x37b   : > { %2156 = vmatpush1.bf16.msra.mxu1 %v8590_v41  ;;  %7312 = vmatprep.mubr.msk.bf16.mxu1 %vm13376_vm2, %v2007_v21  ;;  %v8607_v21 = vld [vmem:[%s13126_s2 + $0x294] ss:$8 sps:$4 sm:$0xff]   ;;  %v8620_v41 = vld [vmem:[%s13126_s2 + $0x2e0] ss:$8 sps:$4 sm:$0xff]  }
 0x37c   : > { %2157 = vmatprep.subr.bf16.mxu1 %v8595_v20  ;;  %v8625_v20 = vld [vmem:[%s13126_s2 + $0x2f4] ss:$8 sps:$4 sm:$0xff]  }
 0x37f   : > { %2158 = vmatpush1.bf16.msra.mxu1 %v8593_v43  ;;  %v8623_v43 = vld [vmem:[%s13126_s2 + $0x2f0] ss:$8 sps:$4 sm:$0xff]  }
 0x380   : > { %2159 = vmatprep.subr.bf16.mxu1 %v8598_v34  ;;  %v10068_v34 = vadd.s32 112, %v9142_v2 }
 0x382   : > { %13377 = vst [vmem:[#allocation16_spill] sm:$0xff] %v10068_v34  ;;  %vm2237_vm11 = vcmp.ge.s32.totalorder %v10068_v34, %v9638_v19  ;;  %vm2263_vm2 = vcmp.lt.s32.totalorder %v10068_v34, %v9653_v22 }
 0x383   : > { %2160 = vmatpush1.bf16.msra.mxu1 %v8596_v55  ;;  %v10071_v55 = vadd.s32 120, %v9142_v2  ;;  %vm10081_vm14 = vmand %vm2237_vm11, %vm2263_vm2 }
 0x384   : > { %2161 = vmatprep.subr.bf16.mxu1 %v8601_v58  ;;  %v13380_v4 = vsel %vm10081_vm14, 4294967295, %v13379_v4  ;;  %v10093_v58 = vadd.s32 136, %v9142_v2 }
 0x385   : > { %13378 = vst [vmem:[#allocation17_spill] sm:$0xff] %v10071_v55  ;;  %vm2238_vm10 = vcmp.ge.s32.totalorder %v10071_v55, %v9638_v19  ;;  %vm2264_vm13 = vcmp.lt.s32.totalorder %v10071_v55, %v9653_v22 }
 0x386   : > { %vm10085_vm7 = vmand %vm2238_vm10, %vm2264_vm13  ;;  %13384 = vst [vmem:[#allocation19_spill] sm:$0xff] %v10093_v58  ;;  %vm2240_vm11 = vcmp.ge.s32.totalorder %v10093_v58, %v9638_v19  ;;  %vm2266_vm2 = vcmp.lt.s32.totalorder %v10093_v58, %v9653_v22 }
 0x387   : > { %2162 = vmatpush1.bf16.msra.mxu1 %v8599_v59  ;;  %v13382_v13 = vsel %vm10085_vm7, 4294967295, %v13381_v13  ;;  %vm13148_vm15 = vmpackc.low %vm10085_vm7, %vm10081_vm14  ;;  %v13385_v59 = vmov 0 }
 0x388   : > { %2163 = vmatprep.subr.bf16.mxu1 %v8604_v11  ;;  %8000 = vmatpush1.bf16.msk.msra.mxu0 %vm13148_vm15, %v13162_v31  ;;  %vm10118_vm14 = vmand %vm2240_vm11, %vm2266_vm2  ;;  %v13387_v11 = vmov 0 }
 0x389   : > { %8001 = vmatprep.subr.bf16.mxu0 %v13164_v12  ;;  %v13388_v11 = vsel %vm10118_vm14, 4294967295, %v13387_v11 }
 0x38b   : > { %2164 = vmatpush1.bf16.msra.mxu1 %v8602_v14  ;;  %v10123_v14 = vadd.s32 144, %v9142_v2 }
 0x38c   : > { %2165 = vmatprep.subr.bf16.mxu1 %v8607_v21  ;;  %v10126_v21 = vadd.s32 152, %v9142_v2 }
 0x38d   : > { %13389 = vst [vmem:[#allocation20_spill] sm:$0xff] %v10123_v14 }
 0x38e   : > { %13390 = vst [vmem:[#allocation21_spill] sm:$0xff] %v10126_v21  ;;  %vm2242_vm11 = vcmp.ge.s32.totalorder %v10126_v21, %v9638_v19  ;;  %vm2268_vm2 = vcmp.lt.s32.totalorder %v10126_v21, %v9653_v22 }
 0x38f   : > { %2166 = vmatpush1.bf16.msra.mxu1 %v8605_v47  ;;  %v13391_v47 = vmov 0 }
 0x390   : > { %2167 = vmatprep.subr.bf16.mxu1 %v8610_v50  ;;  %v13393_v50 = vmov 0 }
 0x393   : > { %2168 = vmatpush1.bf16.msra.mxu1 %v8608_v54  ;;  %v10156_v54 = vadd.s32 160, %v9142_v2 }
 0x394   : > { %2169 = vmatprep.subr.bf16.mxu1 %v8613_v38  ;;  %v10159_v38 = vadd.s32 168, %v9142_v2 }
 0x395   : > { %13395 = vst [vmem:[#allocation22_spill] sm:$0xff] %v10156_v54 }
 0x396   : > { %13396 = vst [vmem:[#allocation23_spill] sm:$0xff] %v10159_v38 }
 0x397   : > { %2170 = vmatpush1.bf16.msra.mxu1 %v8611_v45  ;;  %v13397_v45 = vmov 0 }
 0x398   : > { %2171 = vmatprep.subr.bf16.mxu1 %v8616_v48 }
 0x39b   : > { %2172 = vmatpush1.bf16.msra.mxu1 %v8614_v57  ;;  %v10189_v57 = vadd.s32 176, %v9142_v2 }
 0x39c   : > { %2173 = vmatprep.subr.bf16.mxu1 %v8619_v60  ;;  %v10192_v60 = vadd.s32 184, %v9142_v2 }
 0x39d   : > { %13401 = vst [vmem:[#allocation24_spill] sm:$0xff] %v10189_v57 }
 0x39e   : > { %13402 = vst [vmem:[#allocation25_spill] sm:$0xff] %v10192_v60 }
 0x39f   : > { %2174 = vmatpush1.bf16.msra.mxu1 %v8617_v62 }
 0x3a0   : > { %2175 = vmatprep.subr.bf16.mxu1 %v8622_v61 }
 0x3a3   : > { %2176 = vmatpush1.bf16.msra.mxu1 %v8620_v41 }
 0x3a4   : > { %2177 = vmatprep.subr.bf16.mxu1 %v8625_v20 }
 0x3a7   : > { %2178 = vmatpush1.bf16.msra.mxu1 %v8623_v43 }
 0x3aa   : > { %2188 = vmatmul.mubr.bf16.vlgmr.msra.gmra.mrb[12].mxu1 %v2006_v10  ;;  %v10090_v10 = vadd.s32 128, %v9142_v2 }
 0x3ab   : > { %3216 = vmatprep.mubr.bf16.mxu1 %v13158_v1 }
 0x3ac   : > { %13383 = vst [vmem:[#allocation18_spill] sm:$0xff] %v10090_v10  ;;  %vm2239_vm13 = vcmp.ge.s32.totalorder %v10090_v10, %v9638_v19  ;;  %vm2265_vm10 = vcmp.lt.s32.totalorder %v10090_v10, %v9653_v22 }
 0x3ad   : > { %vm10114_vm3 = vmand %vm2239_vm13, %vm2265_vm10  ;;  %vm2241_vm13 = vcmp.ge.s32.totalorder %v10123_v14, %v9638_v19  ;;  %vm2267_vm10 = vcmp.lt.s32.totalorder %v10123_v14, %v9653_v22 }
 0x3ae   : > { %v13386_v59 = vsel %vm10114_vm3, 4294967295, %v13385_v59  ;;  %vm13151_vm15 = vmpackc.low %vm10118_vm14, %vm10114_vm3 }
 0x3af   : > { %8003 = vmatpush1.bf16.msk.msra.mxu0 %vm13151_vm15, %v13162_v31  ;;  %vm10147_vm7 = vmand %vm2241_vm13, %vm2267_vm10  ;;  %vm2243_vm13 = vcmp.ge.s32.totalorder %v10156_v54, %v9638_v19  ;;  %vm2269_vm10 = vcmp.lt.s32.totalorder %v10156_v54, %v9653_v22 }
 0x3b0   : > { %8004 = vmatprep.subr.bf16.mxu0 %v13164_v12  ;;  %v13392_v47 = vsel %vm10147_vm7, 4294967295, %v13391_v47  ;;  %vm10151_vm3 = vmand %vm2242_vm11, %vm2268_vm2  ;;  %vm2244_vm11 = vcmp.ge.s32.totalorder %v10159_v38, %v9638_v19  ;;  %vm2270_vm2 = vcmp.lt.s32.totalorder %v10159_v38, %v9653_v22 }
 0x3b1   : > { %v13394_v50 = vsel %vm10151_vm3, 4294967295, %v13393_v50  ;;  %vm13154_vm15 = vmpackc.low %vm10151_vm3, %vm10147_vm7 }
 0x3b2   : > { %vm10180_vm14 = vmand %vm2243_vm13, %vm2269_vm10  ;;  %vm2245_vm13 = vcmp.ge.s32.totalorder %v10189_v57, %v9638_v19  ;;  %vm2271_vm10 = vcmp.lt.s32.totalorder %v10189_v57, %v9653_v22 }
 0x3b3   : > { %8006 = vmatpush1.bf16.msk.msra.mxu0 %vm13154_vm15, %v13162_v31  ;;  %v13398_v45 = vsel %vm10180_vm14, 4294967295, %v13397_v45  ;;  %vm10184_vm7 = vmand %vm2244_vm11, %vm2270_vm2  ;;  %vm2246_vm11 = vcmp.ge.s32.totalorder %v10192_v60, %v9638_v19  ;;  %vm2272_vm2 = vcmp.lt.s32.totalorder %v10192_v60, %v9653_v22 }
 0x3b4   : > { %8007 = vmatprep.subr.bf16.mxu0 %v13164_v12  ;;  %vm13157_vm15 = vmpackc.low %vm10184_vm7, %vm10180_vm14 }
 0x3b5   : > { %vm10213_vm3 = vmand %vm2245_vm13, %vm2271_vm10  ;;  %vm13407_vm13 = vcmask 523264  }
 0x3b6   : > { %vm10217_vm14 = vmand %vm2246_vm11, %vm2272_vm2 }
 0x3b7   : > { %8009 = vmatpush1.bf16.msk.msra.mxu0 %vm13157_vm15, %v13162_v31  ;;  %vm8011_vm15 = vmpackc.low %vm10217_vm14, %vm10213_vm3 }
 0x3b8   : > { %8010 = vmatprep.subr.bf16.mxu0 %v13164_v12  ;;  %vm13408_vm11 = vmmov %vm13407_vm13 }
 0x3b9   : > { %vm13409_vm10 = vmmov %vm13408_vm11 }
 0x3ba   : > { %vm13410_vm2 = vmmov %vm13409_vm10 }
 0x3bb   : > { %8012 = vmatpush1.bf16.msk.msra.mxu0 %vm8011_vm15, %v13162_v31 }
 0x3bc   : > { %8013 = vmatprep.subr.bf16.mxu0 %v13164_v12 }
 0x47d   : > { %v10232_v19 = vpop.f32.mrb[12].mxu1 }
 0x47e   : > { %v10234_v22 = vpop.f32.mrb[13].mxu1  ;;  %v2422_v43 = vmul.f32 %v10232_v19, %v10232_v19 }
 0x47f   : > { %v2423_v41 = vmul.f32 %v10234_v22, %v10234_v22  ;;  %v10238_v20 = vpop.f32.mrb[14].mxu1  ;;  %v2340_v12 = vsel %vm13407_vm13, %v10234_v22, 0.0  ;;  %vm13411_vm13 = vmmov %vm13410_vm2 }
 0x480   : > { %v2333_v1 = vadd.f32 %v10238_v20, %v10232_v19  ;;  %v2424_v15 = vmul.f32 %v10238_v20, %v10238_v20  ;;  %v10246_v31 = vpop.f32.mrb[15].mxu1 }
 0x481   : > { %v2341_v60 = vsel %vm13408_vm11, %v10246_v31, 0.0  ;;  %v2425_v57 = vmul.f32 %v10246_v31, %v10246_v31  ;;  %v2433_v14 = vsel %vm13409_vm10, %v2423_v41, 0.0  ;;  %vm13413_vm11 = vmpackc.low %vm9681_vm4, %vm9667_vm0  ;;  %vm13419_vm4 = vnez %v13358_v53 }
 0x482   : > { %v2334_v38 = vrot.slane %v2333_v1, 4  ;;  %v2426_v54 = vadd.f32 %v2424_v15, %v2422_v43  ;;  %v2342_v21 = vadd.f32 %v2341_v60, %v2340_v12  ;;  %vm13414_vm10 = vmmov %vm13410_vm2 }
 0x483   : > { %v2434_v58 = vsel %vm13410_vm2, %v2425_v57, 0.0  ;;  %vm13416_vm2 = vmpackc.low %vm9717_vm12, %vm9702_vm8  ;;  %vm13423_vm12 = vnez %v13367_v18 }
 0x484   : > { %v2335_v10 = vadd.f32 %v2334_v38, %v2333_v1  ;;  %v2343_v55 = vrot.slane %v2342_v21, 4  ;;  %v2435_v34 = vadd.f32 %v2434_v58, %v2433_v14  ;;  %v13412_v1 = vmov 1.0|1.0   ;;  %vm13422_vm8 = vmpackc.low %vm9818_vm5, %vm9807_vm9 }
 0x485   : > { %vm13428_vm5 = vnez %v13382_v13  ;;  %vm13429_vm9 = vnez %v13380_v4 }
 0x486   : > { %v2336_v9 = vrot.slane %v2335_v10, 2  ;;  %v2344_v0 = vadd.f32 %v2343_v55, %v2342_v21  ;;  %v2436_v52 = vrot.slane %v2435_v34, 4 }
 0x488   : > { %v2337_v49 = vadd.f32 %v2336_v9, %v2335_v10  ;;  %v2345_v44 = vrot.slane %v2344_v0, 2  ;;  %v2437_v39 = vadd.f32 %v2436_v52, %v2435_v34 }
 0x48a   : > { %v2346_v33 = vadd.f32 %v2345_v44, %v2344_v0  ;;  %v2438_v24 = vrot.slane %v2437_v39, 2  ;;  %v2338_v28 = vrot.slane %v2337_v49, 1  ;;  %v13415_v44 = vmov 0.0|0.0  }
 0x48c   : > { %v2347_v23 = vrot.slane %v2346_v33, 1  ;;  %v2439_v7 = vadd.f32 %v2438_v24, %v2437_v39  ;;  %v2339_v60 = vadd.f32 %v2338_v28, %v2337_v49  ;;  %v2322_v39 = vmul.u32 24, %v9142_v2 }
 0x48e   : > { %v2348_v15 = vadd.f32 %v2347_v23, %v2346_v33  ;;  %v2440_v12 = vrot.slane %v2439_v7, 1  ;;  %v10343_v33 = vadd.s32 1, %v9142_v2  ;;  %vm2323_vm3 = vcmp.ge.s32.totalorder %v9152_v5, %v2322_v39 }
 0x490   : > { %7337 = vmatprep.mubr.msk.f32.mxu0 %vm13411_vm13, %v2348_v15  ;;  %v2441_v57 = vadd.f32 %v2440_v12, %v2439_v7  ;;  %vm13417_vm13 = vnez %v13349_v42  ;;  %v2427_v7 = vrot.slane %v2426_v54, 4  ;;  %v2326_v42 = vmul.u32 24, %v10343_v33 }
 0x491   : > { %2417 = vmatmul.mubr.f32.vlgmr.msra.gmra.mrb[28].mxu0 %v2339_v60  ;;  %vm13418_vm0 = vmpackc.low %vm9752_vm6, %vm13417_vm13  ;;  %vm13426_vm13 = vnez %v13372_v29  ;;  %v10368_v60 = vpack.c.bf16 %v9178_v16, %v9178_v16  ;;  %v10386_v16 = vpack.c.bf16 %v9203_v25, %v9203_v25  ;;  %v8629_v25 = vld [vmem:[%s13127_s3 + $0xd0] ss:$8 sps:$4 sm:$0xff]  }
 0x492   : > { %8015 = vmatpush1.bf16.msk.msra.mxu0 %vm13413_vm11, %v13412_v1  ;;  %7362 = vmatprep.mubr.msk.f32.mxu0 %vm13414_vm10, %v2441_v57  ;;  %vm13420_vm11 = vnez %v13355_v51  ;;  %vm13424_vm6 = vmpackc.low %vm9850_vm1, %vm13423_vm12  ;;  %v2428_v23 = vadd.f32 %v2427_v7, %v2426_v54  ;;  %vm13431_vm1 = vnez %v13388_v11  ;;  %vm13435_vm12 = vnez %v13392_v47  ;;  %v8628_v7 = vld [vmem:[%s13127_s3 + $0xc4] ss:$8 sps:$4 sm:$0xff]  }
 0x493   : > { %8016 = vmatprep.subr.bf16.mxu0 %v13415_v44  ;;  %vm13421_vm10 = vmpackc.low %vm13419_vm4, %vm13420_vm11  ;;  %vm13432_vm11 = vnez %v13386_v59  ;;  %v10372_v57 = vpack.c.bf16 %v9208_v27, %v9208_v27  ;;  %v10390_v27 = vpack.c.bf16 %v9232_v40, %v9232_v40  ;;  %v8634_v40 = vld [vmem:[%s13127_s3 + $0xe4] ss:$8 sps:$4 sm:$0xff]  }
 0x494   : > { %vm13430_vm4 = vmpackc.low %vm13428_vm5, %vm13429_vm9  ;;  %v2429_v26 = vrot.slane %v2428_v23, 2  ;;  %vm13208_vm9 = vcmask 64512  }
 0x495   : > { %13441 = vst [vmem:[#allocation26_spill] sm:$0xff] %v10372_v57  ;;  %13442 = vst [vmem:[#allocation27_spill] sm:$0xff] %v10390_v27 }
 0x496   : > { %8018 = vmatpush1.bf16.msk.msra.mxu0 %vm13416_vm2, %v13412_v1  ;;  %vm13425_vm2 = vnez %v13374_v37  ;;  %v2430_v28 = vadd.f32 %v2429_v26, %v2428_v23  ;;  %v13440_v37 = vmov 0   ;;  %v8626_v23 = vld [vmem:[%s13127_s3 + $0xc0] ss:$8 sps:$4 sm:$0xff]   ;;  %v8631_v26 = vld [vmem:[%s13127_s3 + $0xd4] ss:$8 sps:$4 sm:$0xff]  }
 0x497   : > { %8019 = vmatprep.subr.bf16.mxu0 %v13415_v44 }
 0x498   : > { %v2431_v30 = vrot.slane %v2430_v28, 1 }
 0x49a   : > { %8021 = vmatpush1.bf16.msk.msra.mxu0 %vm13418_vm0, %v13412_v1  ;;  %vm13427_vm0 = vmpackc.low %vm13425_vm2, %vm13426_vm13  ;;  %vm13437_vm2 = vnez %v13398_v45  ;;  %v2432_v24 = vadd.f32 %v2431_v30, %v2430_v28  ;;  %v8632_v28 = vld [vmem:[%s13127_s3 + $0xe0] ss:$8 sps:$4 sm:$0xff]   ;;  %v8637_v30 = vld [vmem:[%s13127_s3 + $0xf4] ss:$8 sps:$4 sm:$0xff]  }
 0x49b   : > { %8022 = vmatprep.subr.bf16.mxu0 %v13415_v44  ;;  %vm13438_vm13 = vmpackc.low %vm10184_vm7, %vm13437_vm2  ;;  %vm2324_vm7 = vcmp.ge.s32.totalorder %v10346_v36, %v2322_v39  ;;  %v8640_v39 = vld [vmem:[%s13127_s3 + $0x104] ss:$8 sps:$4 sm:$0xff]  }
 0x49e   : > { %8024 = vmatpush1.bf16.msk.msra.mxu0 %vm13421_vm10, %v13412_v1  ;;  %vm13433_vm10 = vmpackc.low %vm13431_vm1, %vm13432_vm11 }
 0x49f   : > { %8025 = vmatprep.subr.bf16.mxu0 %v13415_v44 }
 0x4a2   : > { %8027 = vmatpush1.bf16.msk.msra.mxu0 %vm13422_vm8, %v13412_v1  ;;  %vm13434_vm8 = vnez %v13394_v50 }
 0x4a3   : > { %8028 = vmatprep.subr.bf16.mxu0 %v13415_v44 }
 0x4a6   : > { %8030 = vmatpush1.bf16.msk.msra.mxu0 %vm13424_vm6, %v13412_v1  ;;  %vm13436_vm6 = vmpackc.low %vm13434_vm8, %vm13435_vm12  ;;  %vm13209_vm8 = vcmask 130048   ;;  %vm13443_vm12 = vcmask 523264  }
 0x4a7   : > { %8031 = vmatprep.subr.bf16.mxu0 %v13415_v44 }
 0x4aa   : > { %8033 = vmatpush1.bf16.msk.msra.mxu0 %vm13427_vm0, %v13412_v1  ;;  %vm2328_vm0 = vcmp.lt.s32.totalorder %v10346_v36, %v2326_v42 }
 0x4ab   : > { %8034 = vmatprep.subr.bf16.mxu0 %v13415_v44  ;;  %vm2330_vm14 = vmand %vm2324_vm7, %vm2328_vm0 }
 0x4ae   : > { %8036 = vmatpush1.bf16.msk.msra.mxu0 %vm13430_vm4, %v13412_v1 }
 0x4af   : > { %8037 = vmatprep.subr.bf16.mxu0 %v13415_v44 }
 0x4b2   : > { %8039 = vmatpush1.bf16.msk.msra.mxu0 %vm13433_vm10, %v13412_v1 }
 0x4b3   : > { %8040 = vmatprep.subr.bf16.mxu0 %v13415_v44 }
 0x4b6   : > { %8042 = vmatpush1.bf16.msk.msra.mxu0 %vm13436_vm6, %v13412_v1  ;;  %vm13444_vm6 = vmmov %vm13443_vm12 }
 0x4b7   : > { %8043 = vmatprep.subr.bf16.mxu0 %v13415_v44 }
 0x4ba   : > { %8045 = vmatpush1.bf16.msk.msra.mxu0 %vm13438_vm13, %v13412_v1 }
 0x4bb   : > { %8046 = vmatprep.subr.bf16.mxu0 %v13415_v44 }
 0x4be   : > { %8048 = vmatpush1.bf16.msk.msra.mxu0 %vm8011_vm15, %v13412_v1  ;;  %vm2327_vm15 = vcmp.lt.s32.totalorder %v9152_v5, %v2326_v42  ;;  %v8638_v42 = vld [vmem:[%s13127_s3 + $0x100] ss:$8 sps:$4 sm:$0xff]  }
 0x4bf   : > { %7363 = vmatprep.subr.msk.mxu0 %vm2330_vm14, %v9078_v46  ;;  %vm2329_vm5 = vmand %vm2323_vm3, %vm2327_vm15 }
 0x4c1   : > { %2510 = vmatmul.mubr.f32.vlgmr.msra.gmra.mrb[30].mxu0 %v2432_v24  ;;  %v8635_v24 = vld [vmem:[%s13127_s3 + $0xf0] ss:$8 sps:$4 sm:$0xff]  }
 0x4c2   : > { %2590 = vmatprep.mubr.f32.mxu0 %v13439_v32  ;;  %7364 = vmatpush1.msk.msra.mxu0 %vm2329_vm5, %v9078_v46 }
 0x4c3   : > { %7366 = vmatprep.subr.msk.mxu0 %vm2330_vm14, %v9078_v46 }
 0x564   : > { %v2418_v49 = vpop.f32.mrb[28].mxu0 }
 0x565   : > { %v2515_v51 = vmul.f32 0.0026041667, %v2418_v49  ;;  %v2420_v52 = vpop.f32.mrb[29].mxu0  ;;  %v8641_v49 = vld [vmem:[%s13127_s3 + $0x110] ss:$8 sps:$4 sm:$0xff]  }
 0x566   : > { %v8644_v52 = vld [vmem:[%s13127_s3 + $0x120] ss:$8 sps:$4 sm:$0xff]  }
 0x567   : > { %7365 = vmatmul.mubr.msk.f32.vlgmr.msra.gmra.mrb[32].mxu0 %vm13208_vm9, %v2515_v51  ;;  %v2517_v56 = vmul.f32 %v2515_v51, %v2515_v51  ;;  %v8646_v51 = vld [vmem:[%s13127_s3 + $0x124] ss:$8 sps:$4 sm:$0xff]  }
 0x568   : > { %7367 = vmatpush1.msk.msra.mxu0 %vm2329_vm5, %v9078_v46  ;;  %2664 = vmatprep.mubr.f32.mxu0 %v13439_v32  ;;  %v8643_v46 = vld [vmem:[%s13127_s3 + $0x114] ss:$8 sps:$4 sm:$0xff]  }
 0x594   : > { %v2511_v53 = vpop.f32.mrb[30].mxu0 }
 0x595   : > { %v2516_v63 = vmul.f32 0.0026041667, %v2511_v53  ;;  %v2513_v0 = vpop.f32.mrb[31].mxu0  ;;  %v8649_v53 = vld [vmem:[%s13127_s3 + $0x134] ss:$8 sps:$4 sm:$0xff]  }
 0x596   : > { %v8650_v0 = vld [vmem:[%s13127_s3 + $0x140] ss:$8 sps:$4 sm:$0xff]  }
 0x597   : > { %v2518_v9 = vsub.f32 %v2516_v63, %v2517_v56  ;;  %v8647_v56 = vld [vmem:[%s13127_s3 + $0x130] ss:$8 sps:$4 sm:$0xff]   ;;  %v8652_v63 = vld [vmem:[%s13127_s3 + $0x144] ss:$8 sps:$4 sm:$0xff]  }
 0x599   : > { %v2519_v18 = vmax.f32 %v2518_v9, 0.0  ;;  %v8655_v9 = vld [vmem:[%s13127_s3 + $0x154] ss:$8 sps:$4 sm:$0xff]  }
 0x59b   : > { %v2520_v35 = vadd.f32 1e-05, %v2519_v18  ;;  %v8653_v18 = vld [vmem:[%s13127_s3 + $0x150] ss:$8 sps:$4 sm:$0xff]  }
 0x59d   : > { %9058 = vrsqrt.f32 %v2520_v35  ;;  %v8658_v35 = vld [vmem:[%s13127_s3 + $0x164] ss:$8 sps:$4 sm:$0xff]  }
 0x5a7   : > { %v9059_v29 = vpop.eup %9058 }
 0x5a8   : > { %7368 = vmatmul.mubr.msk.f32.vlgmr.msra.gmra.mrb[34].mxu0 %vm13208_vm9, %v9059_v29  ;;  %v8656_v29 = vld [vmem:[%s13127_s3 + $0x160] ss:$8 sps:$4 sm:$0xff]  }
 0x5a9   : > { %2746 = vmatprep.mubr.bf16.mxu0 %v13440_v37 }
 0x63a   : > { %v2592_v34 = vpop.f32.mrb[32].mxu0 }
 0x63b   : > { %v2674_v55 = vrot.slane %v2592_v34, %v9483_v17  ;;  %v2594_v4 = vpop.f32.mrb[33].mxu0  ;;  %v8661_v34 = vld [vmem:[%s13127_s3 + $0x174] ss:$8 sps:$4 sm:$0xff]  }
 0x63c   : > { %v2678_v13 = vrot.slane %v2594_v4, %v9483_v17  ;;  %v8664_v4 = vld [vmem:[%s13127_s3 + $0x4] ss:$8 sps:$4 sm:$0xff]  }
 0x63d   : > { %v2679_v10 = vsub.f32 %v10232_v19, %v2674_v55  ;;  %v2681_v58 = vsub.f32 %v10238_v20, %v2674_v55  ;;  %v8659_v55 = vld [vmem:[%s13127_s3 + $0x170] ss:$8 sps:$4 sm:$0xff]  }
 0x63e   : > { %v2680_v59 = vsub.f32 %v10234_v22, %v2678_v13  ;;  %v2682_v11 = vsub.f32 %v10246_v31, %v2678_v13 }
 0x67b   : > { %v2666_v14 = vpop.f32.mrb[34].mxu0 }
 0x67c   : > { %v2686_v21 = vrot.slane %v2666_v14, %v9483_v17  ;;  %v2668_v47 = vpop.f32.mrb[35].mxu0 }
 0x67d   : > { %v2690_v50 = vrot.slane %v2668_v47, %v9483_v17 }
 0x67e   : > { %v2691_v54 = vmul.f32 %v2686_v21, %v2679_v10  ;;  %v2693_v38 = vmul.f32 %v2686_v21, %v2681_v58 }
 0x67f   : > { %v2692_v45 = vmul.f32 %v2690_v50, %v2680_v59  ;;  %v2694_v48 = vmul.f32 %v2690_v50, %v2682_v11 }
 0x680   : > { %vm2695_vm4 = vcmp.gt.f32.partialorder %v2691_v54, 0.0  ;;  %vm2697_vm1 = vcmp.gt.f32.partialorder %v2693_v38, 0.0  ;;  %v2699_v62 = vmul.f32 0.2, %v2691_v54  ;;  %v2701_v61 = vmul.f32 0.2, %v2693_v38 }
 0x681   : > { %vm2696_vm11 = vcmp.gt.f32.partialorder %v2692_v45, 0.0  ;;  %vm2698_vm10 = vcmp.gt.f32.partialorder %v2694_v48, 0.0  ;;  %v2700_v19 = vmul.f32 0.2, %v2692_v45  ;;  %v2702_v22 = vmul.f32 0.2, %v2694_v48 }
 0x682   : > { %v2703_v41 = vsel %vm2695_vm4, %v2691_v54, %v2699_v62  ;;  %v2705_v31 = vsel %vm2697_vm1, %v2693_v38, %v2701_v61 }
 0x683   : > { %v2704_v20 = vsel %vm2696_vm11, %v2692_v45, %v2700_v19  ;;  %v2706_v43 = vsel %vm2698_vm10, %v2694_v48, %v2702_v22  ;;  %v2707_v15 = vpack.c.bf16 %v2705_v31, %v2703_v41  ;;  %v8662_v48 = vld [vmem:[%s13127_s3] ss:$8 sps:$4 sm:$0xff]   ;;  %v8667_v19 = vld [vmem:[%s13127_s3 + $0x14] ss:$8 sps:$4 sm:$0xff]   ;;  %v8665_v41 = vld [vmem:[%s13127_s3 + $0x10] ss:$8 sps:$4 sm:$0xff]  }
 0x684   : > { %v2708_v12 = vpack.c.bf16 %v2706_v43, %v2704_v20  ;;  %v8670_v31 = vld [vmem:[%s13127_s3 + $0x24] ss:$8 sps:$4 sm:$0xff]   ;;  %v8668_v20 = vld [vmem:[%s13127_s3 + $0x20] ss:$8 sps:$4 sm:$0xff]  }
 0x686   : > { %2714 = vmatprep.subr.bf16.mxu0 %v2708_v12  ;;  %3184 = vmatprep.subr.bf16.mxu1 %v2708_v12 }
 0x687   : > { %2715 = vmatpush1.bf16.msra.mxu0 %v2707_v15  ;;  %3185 = vmatpush1.bf16.msra.mxu1 %v2707_v15 }
 0x688   : > { %2785 = vmatprep.subr.bf16.mxu0 %v2708_v12  ;;  %3421 = vmatprep.subr.bf16.mxu1 %v2708_v12 }
 0x68a   : > { %7369 = vmatmul.mubr.msk.bf16.vlgmr.msra.gmra.mrb[36].mxu0 %vm13209_vm8, %v10368_v60  ;;  %7421 = vmatmul.mubr.msk.bf16.vlgmr.msra.gmra.mrb[16].mxu1 %vm13209_vm8, %v10372_v57 }
 0x68b   : > { %2786 = vmatpush1.bf16.msra.mxu0 %v2707_v15  ;;  %3422 = vmatpush1.bf16.msra.mxu1 %v2707_v15  ;;  %v8673_v15 = vld [vmem:[%s13127_s3 + $0x34] ss:$8 sps:$4 sm:$0xff]  }
 0x68c   : > { %2817 = vmatprep.mubr.bf16.mxu0 %v13440_v37  ;;  %3453 = vmatprep.mubr.bf16.mxu1 %v13440_v37 }
 0x68d   : > { %2975 = vmatprep.subr.bf16.mxu0 %v8628_v7  ;;  %8049 = vmatprep.subr.bf16.mxu1 %v13415_v44 }
 0x692   : > { %7370 = vmatmul.mubr.msk.bf16.vlgmr.msra.gmra.mrb[40].mxu0 %vm13209_vm8, %v10386_v16  ;;  %7447 = vmatmul.mubr.msk.bf16.vlgmr.msra.gmra.mrb[20].mxu1 %vm13209_vm8, %v10390_v27 }
 0x693   : > { %2976 = vmatpush1.bf16.msra.mxu0 %v8626_v23 }
 0x694   : > { %2977 = vmatprep.subr.bf16.mxu0 %v8631_v26  ;;  %v8671_v26 = vld [vmem:[%s13127_s3 + $0x30] ss:$8 sps:$4 sm:$0xff]  }
 0x697   : > { %2978 = vmatpush1.bf16.msra.mxu0 %v8629_v25  ;;  %v8676_v25 = vld [vmem:[%s13127_s3 + $0x44] ss:$8 sps:$4 sm:$0xff]  }
 0x698   : > { %2979 = vmatprep.subr.bf16.mxu0 %v8634_v40  ;;  %v8674_v40 = vld [vmem:[%s13127_s3 + $0x40] ss:$8 sps:$4 sm:$0xff]  }
 0x69b   : > { %2980 = vmatpush1.bf16.msra.mxu0 %v8632_v28  ;;  %v8679_v28 = vld [vmem:[%s13127_s3 + $0x54] ss:$8 sps:$4 sm:$0xff]  }
 0x69c   : > { %2981 = vmatprep.subr.bf16.mxu0 %v8637_v30  ;;  %v10511_v30 = vmul.u32 12, %v9152_v5 }
 0x69e   : > { %vm3655_vm2 = vcmp.ge.s32.totalorder %v9142_v2, %v10511_v30  ;;  %vm3656_vm13 = vcmp.ge.s32.totalorder %v9146_v3, %v10511_v30  ;;  %vm3657_vm3 = vcmp.ge.s32.totalorder %v9155_v6, %v10511_v30 }
 0x69f   : > { %2982 = vmatpush1.bf16.msra.mxu0 %v8635_v24  ;;  %v10514_v24 = vmul.u32 12, %v9641_v8 }
 0x6a0   : > { %2983 = vmatprep.subr.bf16.mxu0 %v8640_v39  ;;  %v8677_v39 = vld [vmem:[%s13127_s3 + $0x50] ss:$8 sps:$4 sm:$0xff]  }
 0x6a1   : > { %vm3680_vm7 = vcmp.lt.s32.totalorder %v9142_v2, %v10514_v24  ;;  %vm3681_vm0 = vcmp.lt.s32.totalorder %v9146_v3, %v10514_v24  ;;  %vm3682_vm15 = vcmp.lt.s32.totalorder %v9155_v6, %v10514_v24 }
 0x6a2   : > { %vm10530_vm14 = vmand %vm3655_vm2, %vm3680_vm7 }
 0x6a3   : > { %2984 = vmatpush1.bf16.msra.mxu0 %v8638_v42  ;;  %v8682_v42 = vld [vmem:[%s13127_s3 + $0x64] ss:$8 sps:$4 sm:$0xff]   ;;  %vm10538_vm5 = vmand %vm3656_vm13, %vm3681_vm0 }
 0x6a4   : > { %2985 = vmatprep.subr.bf16.mxu0 %v8643_v46  ;;  %vm13211_vm11 = vmpackc.low %vm10538_vm5, %vm10530_vm14 }
 0x6a5   : > { %8051 = vmatpush1.bf16.msk.msra.mxu1 %vm13211_vm11, %v13412_v1  ;;  %vm10562_vm10 = vmand %vm3657_vm3, %vm3682_vm15 }
 0x6a6   : > { %8052 = vmatprep.subr.bf16.mxu1 %v13415_v44 }
 0x6a7   : > { %2986 = vmatpush1.bf16.msra.mxu0 %v8641_v49 }
 0x6a8   : > { %2987 = vmatprep.subr.bf16.mxu0 %v8646_v51  ;;  %v13449_v51 = vld [vmem:[#allocation3_spill] sm:$0xff] }
 0x6a9   : > { %vm3658_vm4 = vcmp.ge.s32.totalorder %v13449_v51, %v10511_v30  ;;  %vm3683_vm1 = vcmp.lt.s32.totalorder %v13449_v51, %v10514_v24 }
 0x6aa   : > { %vm10571_vm2 = vmand %vm3658_vm4, %vm3683_vm1 }
 0x6ab   : > { %2988 = vmatpush1.bf16.msra.mxu0 %v8644_v52  ;;  %v8680_v52 = vld [vmem:[%s13127_s3 + $0x60] ss:$8 sps:$4 sm:$0xff]   ;;  %vm13210_vm0 = vmpackc.low %vm10571_vm2, %vm10562_vm10 }
 0x6ac   : > { %2989 = vmatprep.subr.bf16.mxu0 %v8649_v53  ;;  %v8685_v53 = vld [vmem:[%s13127_s3 + $0x74] ss:$8 sps:$4 sm:$0xff]   ;;  %8054 = vmatpush1.bf16.msk.msra.mxu1 %vm13210_vm0, %v13412_v1 }
 0x6ad   : > { %8055 = vmatprep.subr.bf16.mxu1 %v13415_v44 }
 0x6af   : > { %2990 = vmatpush1.bf16.msra.mxu0 %v8647_v56  ;;  %v13450_v56 = vmov 0 }
 0x6b0   : > { %2991 = vmatprep.subr.bf16.mxu0 %v8652_v63  ;;  %v13451_v56 = vsel %vm10562_vm10, 4294967295, %v13450_v56  ;;  %v13452_v63 = vld [vmem:[#allocation6_spill] sm:$0xff] }
 0x6b3   : > { %2992 = vmatpush1.bf16.msra.mxu0 %v8650_v0  ;;  %v13453_v0 = vmov 0 }
 0x6b4   : > { %2993 = vmatprep.subr.bf16.mxu0 %v8655_v9  ;;  %v13454_v0 = vsel %vm10571_vm2, 4294967295, %v13453_v0  ;;  %v13455_v9 = vld [vmem:[#allocation7_spill] sm:$0xff] }
 0x6b5   : > { %vm3660_vm13 = vcmp.ge.s32.totalorder %v13455_v9, %v10511_v30  ;;  %vm3685_vm7 = vcmp.lt.s32.totalorder %v13455_v9, %v10514_v24 }
 0x6b6   : > { %vm10603_vm1 = vmand %vm3660_vm13, %vm3685_vm7 }
 0x6b7   : > { %2994 = vmatpush1.bf16.msra.mxu0 %v8653_v18  ;;  %v8683_v18 = vld [vmem:[%s13127_s3 + $0x70] ss:$8 sps:$4 sm:$0xff]  }
 0x6b8   : > { %2995 = vmatprep.subr.bf16.mxu0 %v8658_v35  ;;  %v13456_v35 = vmov 0 }
 0x6bb   : > { %2996 = vmatpush1.bf16.msra.mxu0 %v8656_v29  ;;  %v13458_v29 = vld [vmem:[#allocation8_spill] sm:$0xff] }
 0x6bc   : > { %2997 = vmatprep.subr.bf16.mxu0 %v8661_v34  ;;  %vm3661_vm15 = vcmp.ge.s32.totalorder %v13458_v29, %v10511_v30  ;;  %vm3686_vm4 = vcmp.lt.s32.totalorder %v13458_v29, %v10514_v24  ;;  %v8688_v34 = vld [vmem:[%s13127_s3 + $0x84] ss:$8 sps:$4 sm:$0xff]  }
 0x6bd   : > { %vm10616_vm8 = vmand %vm3661_vm15, %vm3686_vm4 }
 0x6bf   : > { %2998 = vmatpush1.bf16.msra.mxu0 %v8659_v55 }
 0x6c0   : > { %3139 = vmatprep.subr.bf16.mxu0 %v8664_v4  ;;  %v13461_v4 = vld [vmem:[#allocation9_spill] sm:$0xff] }
 0x75d   : > { %v10468_v13 = vpop.f32.mrb[36].mxu0  ;;  %v10470_v10 = vpop.f32.mrb[16].mxu1 }
 0x75e   : > { %v2750_v58 = vpop.f32.mrb[37].mxu0  ;;  %v10472_v59 = vpop.f32.mrb[17].mxu1 }
 0x75f   : > { %v2752_v11 = vpop.f32.mrb[38].mxu0  ;;  %v3222_v14 = vpop.f32.mrb[18].mxu1  ;;  %v2756_v22 = vpack.c.bf16 %v2750_v58, %v2750_v58  ;;  %v13462_v58 = vmov 0 }
 0x760   : > { %v2753_v21 = vpop.f32.mrb[39].mxu0  ;;  %v3223_v47 = vpop.f32.mrb[19].mxu1  ;;  %v13463_v58 = vsel %vm10616_vm8, 4294967295, %v13462_v58  ;;  %v13464_v11 = vld [vmem:[#allocation10_spill] sm:$0xff] }
 0x761   : > { %vm3663_vm13 = vcmp.ge.s32.totalorder %v13464_v11, %v10511_v30  ;;  %vm3688_vm7 = vcmp.lt.s32.totalorder %v13464_v11, %v10514_v24  ;;  %v8686_v14 = vld [vmem:[%s13127_s3 + $0x80] ss:$8 sps:$4 sm:$0xff]   ;;  %v13465_v21 = vmov 0 }
 0x762   : > { %v13467_v47 = vld [vmem:[#allocation11_spill] sm:$0xff] }
 0x763   : > { %vm3664_vm15 = vcmp.ge.s32.totalorder %v13467_v47, %v10511_v30  ;;  %vm3689_vm4 = vcmp.lt.s32.totalorder %v13467_v47, %v10514_v24 }
 0x764   : > { %vm10657_vm2 = vmand %vm3664_vm15, %vm3689_vm4 }
 0x765   : > { %v2819_v50 = vpop.f32.mrb[40].mxu0  ;;  %v10491_v43 = vpop.f32.mrb[20].mxu1 }
 0x766   : > { %v2821_v54 = vpop.f32.mrb[41].mxu0  ;;  %v2826_v62 = vpack.c.bf16 %v2819_v50, %v2819_v50  ;;  %v10496_v12 = vpop.f32.mrb[21].mxu1  ;;  %v8691_v50 = vld [vmem:[%s13127_s3 + $0x94] ss:$8 sps:$4 sm:$0xff]  }
 0x767   : > { %v2827_v38 = vpack.c.bf16 %v2821_v54, %v2821_v54  ;;  %v2823_v45 = vpop.f32.mrb[42].mxu0  ;;  %v3459_v7 = vpop.f32.mrb[22].mxu1  ;;  %v13468_v54 = vmov 0 }
 0x768   : > { %v2824_v61 = vpop.f32.mrb[43].mxu0  ;;  %v3460_v23 = vpop.f32.mrb[23].mxu1 }
 0x769   : > { %7395 = vmatprep.mubr.msk.bf16.mxu0 %vm13443_vm12, %v2827_v38  ;;  %vm3659_vm12 = vcmp.ge.s32.totalorder %v13452_v63, %v10511_v30  ;;  %v13470_v38 = vld [vmem:[#allocation12_spill] sm:$0xff] }
 0x76a   : > { %3008 = vmatmul.mubr.bf16.vlgmr.msra.gmra.mrb[44].mxu0 %v2826_v62  ;;  %vm3665_vm11 = vcmp.ge.s32.totalorder %v13470_v38, %v10511_v30  ;;  %vm3690_vm10 = vcmp.lt.s32.totalorder %v13470_v38, %v10514_v24  ;;  %v8689_v62 = vld [vmem:[%s13127_s3 + $0x90] ss:$8 sps:$4 sm:$0xff]   ;;  %v8694_v61 = vld [vmem:[%s13127_s3 + $0xa4] ss:$8 sps:$4 sm:$0xff]  }
 0x76b   : > { %3140 = vmatpush1.bf16.msra.mxu0 %v8662_v48  ;;  %7420 = vmatprep.mubr.msk.bf16.mxu0 %vm13444_vm6, %v2756_v22  ;;  %vm3684_vm6 = vcmp.lt.s32.totalorder %v13452_v63, %v10514_v24  ;;  %v13473_v48 = vld [vmem:[#allocation13_spill] sm:$0xff]  ;;  %vm10681_vm15 = vmand %vm3665_vm11, %vm3690_vm10 }
 0x76c   : > { %3141 = vmatprep.subr.bf16.mxu0 %v8667_v19  ;;  %vm10586_vm3 = vmand %vm3659_vm12, %vm3684_vm6  ;;  %vm3662_vm12 = vcmp.ge.s32.totalorder %v13461_v4, %v10511_v30  ;;  %vm3687_vm6 = vcmp.lt.s32.totalorder %v13461_v4, %v10514_v24 }
 0x76d   : > { %v13457_v35 = vsel %vm10586_vm3, 4294967295, %v13456_v35  ;;  %vm13214_vm9 = vmpackc.low %vm10603_vm1, %vm10586_vm3 }
 0x76e   : > { %vm10627_vm0 = vmand %vm3662_vm12, %vm3687_vm6  ;;  %8057 = vmatpush1.bf16.msk.msra.mxu1 %vm13214_vm9, %v13412_v1  ;;  %vm3666_vm9 = vcmp.ge.s32.totalorder %v13473_v48, %v10511_v30  ;;  %vm3691_vm12 = vcmp.lt.s32.totalorder %v13473_v48, %v10514_v24 }
 0x76f   : > { %3142 = vmatpush1.bf16.msra.mxu0 %v8665_v41  ;;  %v13466_v21 = vsel %vm10627_vm0, 4294967295, %v13465_v21  ;;  %8058 = vmatprep.subr.bf16.mxu1 %v13415_v44  ;;  %vm10649_vm6 = vmand %vm3663_vm13, %vm3688_vm7  ;;  %v13479_v41 = vld [vmem:[#allocation14_spill] sm:$0xff] }
 0x770   : > { %3143 = vmatprep.subr.bf16.mxu0 %v8670_v31  ;;  %v13469_v54 = vsel %vm10649_vm6, 4294967295, %v13468_v54  ;;  %vm13474_vm7 = vmpackc.low %vm10627_vm0, %vm10616_vm8  ;;  %vm3667_vm13 = vcmp.ge.s32.totalorder %v13479_v41, %v10511_v30  ;;  %vm3692_vm3 = vcmp.lt.s32.totalorder %v13479_v41, %v10514_v24  ;;  %v13480_v31 = vld [vmem:[#allocation15_spill] sm:$0xff] }
 0x771   : > { %vm10686_vm4 = vmand %vm3666_vm9, %vm3691_vm12  ;;  %vm3668_vm8 = vcmp.ge.s32.totalorder %v13480_v31, %v10511_v30  ;;  %vm3693_vm11 = vcmp.lt.s32.totalorder %v13480_v31, %v10514_v24 }
 0x772   : > { %8060 = vmatpush1.bf16.msk.msra.mxu1 %vm13474_vm7, %v13412_v1  ;;  %vm13481_vm10 = vmpackc.low %vm10657_vm2, %vm10649_vm6 }
 0x773   : > { %3144 = vmatpush1.bf16.msra.mxu0 %v8668_v20  ;;  %8061 = vmatprep.subr.bf16.mxu1 %v13415_v44  ;;  %v8692_v20 = vld [vmem:[%s13127_s3 + $0xa0] ss:$8 sps:$4 sm:$0xff]   ;;  %vm10714_vm12 = vmand %vm3667_vm13, %vm3692_vm3 }
 0x774   : > { %3145 = vmatprep.subr.bf16.mxu0 %v8673_v15  ;;  %v8697_v15 = vld [vmem:[%s13127_s3 + $0xb4] ss:$8 sps:$4 sm:$0xff]   ;;  %vm10719_vm7 = vmand %vm3668_vm8, %vm3693_vm11 }
 0x775   : > { %vm13488_vm13 = vmpackc.low %vm10686_vm4, %vm10681_vm15 }
 0x776   : > { %8063 = vmatpush1.bf16.msk.msra.mxu1 %vm13481_vm10, %v13412_v1  ;;  %vm13220_vm11 = vmpackc.low %vm10719_vm7, %vm10714_vm12 }
 0x777   : > { %3146 = vmatpush1.bf16.msra.mxu0 %v8671_v26  ;;  %8064 = vmatprep.subr.bf16.mxu1 %v13415_v44  ;;  %v13486_v26 = vld [vmem:[#allocation16_spill] sm:$0xff] }
 0x778   : > { %3147 = vmatprep.subr.bf16.mxu0 %v8676_v25  ;;  %vm3669_vm9 = vcmp.ge.s32.totalorder %v13486_v26, %v10511_v30  ;;  %vm3694_vm0 = vcmp.lt.s32.totalorder %v13486_v26, %v10514_v24  ;;  %v8695_v25 = vld [vmem:[%s13127_s3 + $0xb0] ss:$8 sps:$4 sm:$0xff]  }
 0x779   : > { %vm10748_vm10 = vmand %vm3669_vm9, %vm3694_vm0  ;;  %vm13493_vm9 = vcmask 523264  }
 0x77a   : > { %8066 = vmatpush1.bf16.msk.msra.mxu1 %vm13488_vm13, %v13412_v1 }
 0x77b   : > { %3148 = vmatpush1.bf16.msra.mxu0 %v8674_v40  ;;  %v13487_v40 = vld [vmem:[#allocation17_spill] sm:$0xff]  ;;  %8067 = vmatprep.subr.bf16.mxu1 %v13415_v44 }
 0x77c   : > { %3149 = vmatprep.subr.bf16.mxu0 %v8679_v28  ;;  %vm3670_vm3 = vcmp.ge.s32.totalorder %v13487_v40, %v10511_v30  ;;  %vm3695_vm8 = vcmp.lt.s32.totalorder %v13487_v40, %v10514_v24  ;;  %v8700_v28 = vld [vmem:[%s13127_s3 + $0x184] ss:$8 sps:$4 sm:$0xff]  }
 0x77d   : > { %vm10752_vm6 = vmand %vm3670_vm3, %vm3695_vm8 }
 0x77e   : > { %8069 = vmatpush1.bf16.msk.msra.mxu1 %vm13220_vm11, %v13412_v1  ;;  %vm13219_vm0 = vmpackc.low %vm10752_vm6, %vm10748_vm10 }
 0x77f   : > { %3150 = vmatpush1.bf16.msra.mxu0 %v8677_v39  ;;  %v13489_v39 = vmov 0  ;;  %8070 = vmatprep.subr.bf16.mxu1 %v13415_v44  ;;  %vm13494_vm3 = vmmov %vm13493_vm9 }
 0x780   : > { %3151 = vmatprep.subr.bf16.mxu0 %v8682_v42  ;;  %v13490_v39 = vsel %vm10748_vm10, 4294967295, %v13489_v39  ;;  %v13491_v42 = vmov 0 }
 0x781   : > { %v13492_v42 = vsel %vm10752_vm6, 4294967295, %v13491_v42 }
 0x782   : > { %8072 = vmatpush1.bf16.msk.msra.mxu1 %vm13219_vm0, %v13412_v1 }
 0x783   : > { %3152 = vmatpush1.bf16.msra.mxu0 %v8680_v52  ;;  %v8698_v52 = vld [vmem:[%s13127_s3 + $0x180] ss:$8 sps:$4 sm:$0xff]   ;;  %8073 = vmatprep.subr.bf16.mxu1 %v13415_v44 }
 0x784   : > { %3153 = vmatprep.subr.bf16.mxu0 %v8685_v53  ;;  %v3226_v53 = vpack.c.bf16 %v10472_v59, %v10472_v59  ;;  %v8706_v59 = vld [vmem:[%s13127_s3 + $0x1a4] ss:$8 sps:$4 sm:$0xff]  }
 0x787   : > { %3154 = vmatpush1.bf16.msra.mxu0 %v8683_v18  ;;  %v2755_v18 = vpack.c.bf16 %v10468_v13, %v10468_v13  ;;  %v8701_v13 = vld [vmem:[%s13127_s3 + $0x190] ss:$8 sps:$4 sm:$0xff]  }
 0x788   : > { %3155 = vmatprep.subr.bf16.mxu0 %v8688_v34  ;;  %v8703_v34 = vld [vmem:[%s13127_s3 + $0x194] ss:$8 sps:$4 sm:$0xff]  }
 0x78b   : > { %3156 = vmatpush1.bf16.msra.mxu0 %v8686_v14  ;;  %v8704_v14 = vld [vmem:[%s13127_s3 + $0x1a0] ss:$8 sps:$4 sm:$0xff]  }
 0x78c   : > { %3157 = vmatprep.subr.bf16.mxu0 %v8691_v50  ;;  %v8709_v50 = vld [vmem:[%s13127_s3 + $0x1b4] ss:$8 sps:$4 sm:$0xff]  }
 0x78f   : > { %3158 = vmatpush1.bf16.msra.mxu0 %v8689_v62  ;;  %v8707_v62 = vld [vmem:[%s13127_s3 + $0x1b0] ss:$8 sps:$4 sm:$0xff]  }
 0x790   : > { %3159 = vmatprep.subr.bf16.mxu0 %v8694_v61  ;;  %v8712_v61 = vld [vmem:[%s13127_s3 + $0x1c4] ss:$8 sps:$4 sm:$0xff]  }
 0x793   : > { %3160 = vmatpush1.bf16.msra.mxu0 %v8692_v20  ;;  %v8710_v20 = vld [vmem:[%s13127_s3 + $0x1c0] ss:$8 sps:$4 sm:$0xff]  }
 0x794   : > { %3161 = vmatprep.subr.bf16.mxu0 %v8697_v15  ;;  %v8715_v15 = vld [vmem:[%s13127_s3 + $0x1d4] ss:$8 sps:$4 sm:$0xff]  }
 0x797   : > { %3162 = vmatpush1.bf16.msra.mxu0 %v8695_v25  ;;  %v8713_v25 = vld [vmem:[%s13127_s3 + $0x1d0] ss:$8 sps:$4 sm:$0xff]  }
 0x798   : > { %3374 = vmatprep.subr.bf16.mxu0 %v8700_v28  ;;  %v8718_v28 = vld [vmem:[%s13127_s3 + $0x1e4] ss:$8 sps:$4 sm:$0xff]  }
 0x79a   : > { %3172 = vmatmul.mubr.bf16.vlgmr.msra.gmra.mrb[44].mxu0 %v2755_v18  ;;  %v8719_v18 = vld [vmem:[%s13127_s3 + $0x1f0] ss:$8 sps:$4 sm:$0xff]  }
 0x79b   : > { %3375 = vmatpush1.bf16.msra.mxu0 %v8698_v52  ;;  %7446 = vmatprep.mubr.msk.bf16.mxu0 %vm13493_vm9, %v3226_v53  ;;  %v8716_v52 = vld [vmem:[%s13127_s3 + $0x1e0] ss:$8 sps:$4 sm:$0xff]   ;;  %v8721_v53 = vld [vmem:[%s13127_s3 + $0x1f4] ss:$8 sps:$4 sm:$0xff]  }
 0x79c   : > { %3376 = vmatprep.subr.bf16.mxu0 %v8703_v34  ;;  %v8724_v34 = vld [vmem:[%s13127_s3 + $0x204] ss:$8 sps:$4 sm:$0xff]  }
 0x79f   : > { %3377 = vmatpush1.bf16.msra.mxu0 %v8701_v13  ;;  %v8722_v13 = vld [vmem:[%s13127_s3 + $0x200] ss:$8 sps:$4 sm:$0xff]  }
 0x7a0   : > { %3378 = vmatprep.subr.bf16.mxu0 %v8706_v59  ;;  %v8727_v59 = vld [vmem:[%s13127_s3 + $0x214] ss:$8 sps:$4 sm:$0xff]  }
 0x7a3   : > { %3379 = vmatpush1.bf16.msra.mxu0 %v8704_v14  ;;  %v8725_v14 = vld [vmem:[%s13127_s3 + $0x210] ss:$8 sps:$4 sm:$0xff]  }
 0x7a4   : > { %3380 = vmatprep.subr.bf16.mxu0 %v8709_v50  ;;  %v8730_v50 = vld [vmem:[%s13127_s3 + $0x224] ss:$8 sps:$4 sm:$0xff]  }
 0x7a7   : > { %3381 = vmatpush1.bf16.msra.mxu0 %v8707_v62  ;;  %v8728_v62 = vld [vmem:[%s13127_s3 + $0x220] ss:$8 sps:$4 sm:$0xff]  }
 0x7a8   : > { %3382 = vmatprep.subr.bf16.mxu0 %v8712_v61  ;;  %v8733_v61 = vld [vmem:[%s13127_s3 + $0x234] ss:$8 sps:$4 sm:$0xff]  }
 0x7ab   : > { %3383 = vmatpush1.bf16.msra.mxu0 %v8710_v20  ;;  %v8731_v20 = vld [vmem:[%s13127_s3 + $0x230] ss:$8 sps:$4 sm:$0xff]  }
 0x7ac   : > { %3384 = vmatprep.subr.bf16.mxu0 %v8715_v15  ;;  %v8736_v15 = vld [vmem:[%s13127_s3 + $0x244] ss:$8 sps:$4 sm:$0xff]  }
 0x7af   : > { %3385 = vmatpush1.bf16.msra.mxu0 %v8713_v25  ;;  %v3225_v25 = vpack.c.bf16 %v10470_v10, %v10470_v10  ;;  %v8742_v10 = vld [vmem:[%s13127_s3 + $0x264] ss:$8 sps:$4 sm:$0xff]  }
 0x7b0   : > { %3386 = vmatprep.subr.bf16.mxu0 %v8718_v28  ;;  %v8734_v28 = vld [vmem:[%s13127_s3 + $0x240] ss:$8 sps:$4 sm:$0xff]  }
 0x7b3   : > { %3387 = vmatpush1.bf16.msra.mxu0 %v8716_v52  ;;  %v3463_v52 = vpack.c.bf16 %v10496_v12, %v10496_v12  ;;  %v8740_v12 = vld [vmem:[%s13127_s3 + $0x260] ss:$8 sps:$4 sm:$0xff]  }
 0x7b4   : > { %3388 = vmatprep.subr.bf16.mxu0 %v8721_v53  ;;  %v8739_v53 = vld [vmem:[%s13127_s3 + $0x254] ss:$8 sps:$4 sm:$0xff]  }
 0x7b7   : > { %3389 = vmatpush1.bf16.msra.mxu0 %v8719_v18  ;;  %v8737_v18 = vld [vmem:[%s13127_s3 + $0x250] ss:$8 sps:$4 sm:$0xff]  }
 0x7b8   : > { %3390 = vmatprep.subr.bf16.mxu0 %v8724_v34  ;;  %v8745_v34 = vld [vmem:[%s13127_s3 + $0x274] ss:$8 sps:$4 sm:$0xff]  }
 0x7bb   : > { %3391 = vmatpush1.bf16.msra.mxu0 %v8722_v13  ;;  %v8743_v13 = vld [vmem:[%s13127_s3 + $0x270] ss:$8 sps:$4 sm:$0xff]  }
 0x7bc   : > { %3392 = vmatprep.subr.bf16.mxu0 %v8727_v59  ;;  %v8748_v59 = vld [vmem:[%s13127_s3 + $0x284] ss:$8 sps:$4 sm:$0xff]  }
 0x7bf   : > { %3393 = vmatpush1.bf16.msra.mxu0 %v8725_v14  ;;  %v8746_v14 = vld [vmem:[%s13127_s3 + $0x280] ss:$8 sps:$4 sm:$0xff]  }
 0x7c0   : > { %3394 = vmatprep.subr.bf16.mxu0 %v8730_v50  ;;  %v8751_v50 = vld [vmem:[%s13127_s3 + $0x294] ss:$8 sps:$4 sm:$0xff]  }
 0x7c3   : > { %3395 = vmatpush1.bf16.msra.mxu0 %v8728_v62  ;;  %v8749_v62 = vld [vmem:[%s13127_s3 + $0x290] ss:$8 sps:$4 sm:$0xff]  }
 0x7c4   : > { %3396 = vmatprep.subr.bf16.mxu0 %v8733_v61  ;;  %v8754_v61 = vld [vmem:[%s13127_s3 + $0x2a4] ss:$8 sps:$4 sm:$0xff]  }
 0x7c7   : > { %3397 = vmatpush1.bf16.msra.mxu0 %v8731_v20  ;;  %v8752_v20 = vld [vmem:[%s13127_s3 + $0x2a0] ss:$8 sps:$4 sm:$0xff]  }
 0x7c8   : > { %3611 = vmatprep.subr.bf16.mxu0 %v8736_v15  ;;  %v8757_v15 = vld [vmem:[%s13127_s3 + $0x2b4] ss:$8 sps:$4 sm:$0xff]  }
 0x7ca   : > { %3407 = vmatmul.mubr.bf16.vlgmr.msra.gmra.mrb[44].mxu0 %v3225_v25  ;;  %v8755_v25 = vld [vmem:[%s13127_s3 + $0x2b0] ss:$8 sps:$4 sm:$0xff]  }
 0x7cb   : > { %3612 = vmatpush1.bf16.msra.mxu0 %v8734_v28  ;;  %7472 = vmatprep.mubr.msk.bf16.mxu0 %vm13494_vm3, %v3463_v52  ;;  %v8760_v28 = vld [vmem:[%s13127_s3 + $0x2c4] ss:$8 sps:$4 sm:$0xff]   ;;  %v8758_v52 = vld [vmem:[%s13127_s3 + $0x2c0] ss:$8 sps:$4 sm:$0xff]  }
 0x7cc   : > { %3613 = vmatprep.subr.bf16.mxu0 %v8739_v53  ;;  %v8763_v53 = vld [vmem:[%s13127_s3 + $0x2d4] ss:$8 sps:$4 sm:$0xff]  }
 0x7cf   : > { %3614 = vmatpush1.bf16.msra.mxu0 %v8737_v18  ;;  %v8761_v18 = vld [vmem:[%s13127_s3 + $0x2d0] ss:$8 sps:$4 sm:$0xff]  }
 0x7d0   : > { %3615 = vmatprep.subr.bf16.mxu0 %v8742_v10  ;;  %v8766_v10 = vld [vmem:[%s13127_s3 + $0x2e4] ss:$8 sps:$4 sm:$0xff]  }
 0x7d3   : > { %3616 = vmatpush1.bf16.msra.mxu0 %v8740_v12  ;;  %v8764_v12 = vld [vmem:[%s13127_s3 + $0x2e0] ss:$8 sps:$4 sm:$0xff]  }
 0x7d4   : > { %3617 = vmatprep.subr.bf16.mxu0 %v8745_v34  ;;  %v8769_v34 = vld [vmem:[%s13127_s3 + $0x2f4] ss:$8 sps:$4 sm:$0xff]  }
 0x7d7   : > { %3618 = vmatpush1.bf16.msra.mxu0 %v8743_v13  ;;  %v8767_v13 = vld [vmem:[%s13127_s3 + $0x2f0] ss:$8 sps:$4 sm:$0xff]  }
 0x7d8   : > { %3619 = vmatprep.subr.bf16.mxu0 %v8748_v59  ;;  %v3462_v59 = vpack.c.bf16 %v10491_v43, %v10491_v43  ;;  %v13499_v43 = vmov 0 }
 0x7db   : > { %3620 = vmatpush1.bf16.msra.mxu0 %v8746_v14  ;;  %v13495_v14 = vld [vmem:[#allocation18_spill] sm:$0xff] }
 0x7dc   : > { %3621 = vmatprep.subr.bf16.mxu0 %v8751_v50  ;;  %vm3671_vm8 = vcmp.ge.s32.totalorder %v13495_v14, %v10511_v30  ;;  %v13496_v50 = vld [vmem:[#allocation19_spill] sm:$0xff]  ;;  %vm3696_vm9 = vcmp.lt.s32.totalorder %v13495_v14, %v10514_v24 }
 0x7dd   : > { %vm3672_vm13 = vcmp.ge.s32.totalorder %v13496_v50, %v10511_v30  ;;  %vm3697_vm3 = vcmp.lt.s32.totalorder %v13496_v50, %v10514_v24  ;;  %vm10936_vm0 = vmand %vm3671_vm8, %vm3696_vm9 }
 0x7de   : > { %vm10940_vm11 = vmand %vm3672_vm13, %vm3697_vm3 }
 0x7df   : > { %3622 = vmatpush1.bf16.msra.mxu0 %v8749_v62  ;;  %v13497_v62 = vmov 0  ;;  %v13500_v43 = vsel %vm10940_vm11, 4294967295, %v13499_v43  ;;  %vm13224_vm10 = vmpackc.low %vm10940_vm11, %vm10936_vm0 }
 0x7e0   : > { %3623 = vmatprep.subr.bf16.mxu0 %v8754_v61  ;;  %v13498_v62 = vsel %vm10936_vm0, 4294967295, %v13497_v62  ;;  %8075 = vmatpush1.bf16.msk.msra.mxu1 %vm13224_vm10, %v13412_v1  ;;  %v13501_v61 = vld [vmem:[#allocation20_spill] sm:$0xff] }
 0x7e1   : > { %vm3673_vm8 = vcmp.ge.s32.totalorder %v13501_v61, %v10511_v30  ;;  %vm3698_vm9 = vcmp.lt.s32.totalorder %v13501_v61, %v10514_v24  ;;  %8076 = vmatprep.subr.bf16.mxu1 %v13415_v44 }
 0x7e2   : > { %vm10963_vm6 = vmand %vm3673_vm8, %vm3698_vm9 }
 0x7e3   : > { %3624 = vmatpush1.bf16.msra.mxu0 %v8752_v20  ;;  %v13502_v20 = vld [vmem:[#allocation21_spill] sm:$0xff] }
 0x7e4   : > { %3625 = vmatprep.subr.bf16.mxu0 %v8757_v15  ;;  %vm3674_vm13 = vcmp.ge.s32.totalorder %v13502_v20, %v10511_v30  ;;  %vm3699_vm3 = vcmp.lt.s32.totalorder %v13502_v20, %v10514_v24  ;;  %v13503_v15 = vmov 0 }
 0x7e5   : > { %v13504_v15 = vsel %vm10963_vm6, 4294967295, %v13503_v15  ;;  %vm10967_vm0 = vmand %vm3674_vm13, %vm3699_vm3 }
 0x7e6   : > { %vm13227_vm10 = vmpackc.low %vm10967_vm0, %vm10963_vm6 }
 0x7e7   : > { %3626 = vmatpush1.bf16.msra.mxu0 %v8755_v25  ;;  %v13505_v25 = vmov 0  ;;  %8078 = vmatpush1.bf16.msk.msra.mxu1 %vm13227_vm10, %v13412_v1 }
 0x7e8   : > { %3627 = vmatprep.subr.bf16.mxu0 %v8760_v28  ;;  %v13506_v25 = vsel %vm10967_vm0, 4294967295, %v13505_v25  ;;  %v13507_v28 = vld [vmem:[#allocation22_spill] sm:$0xff]  ;;  %8079 = vmatprep.subr.bf16.mxu1 %v13415_v44 }
 0x7e9   : > { %vm3675_vm8 = vcmp.ge.s32.totalorder %v13507_v28, %v10511_v30  ;;  %vm3700_vm9 = vcmp.lt.s32.totalorder %v13507_v28, %v10514_v24 }
 0x7ea   : > { %vm10990_vm11 = vmand %vm3675_vm8, %vm3700_vm9 }
 0x7eb   : > { %3628 = vmatpush1.bf16.msra.mxu0 %v8758_v52  ;;  %v13508_v52 = vld [vmem:[#allocation23_spill] sm:$0xff] }
 0x7ec   : > { %3629 = vmatprep.subr.bf16.mxu0 %v8763_v53  ;;  %vm3676_vm13 = vcmp.ge.s32.totalorder %v13508_v52, %v10511_v30  ;;  %vm3701_vm3 = vcmp.lt.s32.totalorder %v13508_v52, %v10514_v24  ;;  %v13509_v53 = vmov 0 }
 0x7ed   : > { %v13510_v53 = vsel %vm10990_vm11, 4294967295, %v13509_v53  ;;  %vm10994_vm6 = vmand %vm3676_vm13, %vm3701_vm3 }
 0x7ee   : > { %vm13230_vm10 = vmpackc.low %vm10994_vm6, %vm10990_vm11 }
 0x7ef   : > { %3630 = vmatpush1.bf16.msra.mxu0 %v8761_v18  ;;  %8081 = vmatpush1.bf16.msk.msra.mxu1 %vm13230_vm10, %v13412_v1 }
 0x7f0   : > { %3631 = vmatprep.subr.bf16.mxu0 %v8766_v10  ;;  %v13513_v10 = vld [vmem:[#allocation24_spill] sm:$0xff]  ;;  %8082 = vmatprep.subr.bf16.mxu1 %v13415_v44 }
 0x7f1   : > { %vm3677_vm8 = vcmp.ge.s32.totalorder %v13513_v10, %v10511_v30  ;;  %vm3702_vm9 = vcmp.lt.s32.totalorder %v13513_v10, %v10514_v24 }
 0x7f2   : > { %vm11017_vm0 = vmand %vm3677_vm8, %vm3702_vm9  ;;  %vm13519_vm8 = vcmask 523264  }
 0x7f3   : > { %3632 = vmatpush1.bf16.msra.mxu0 %v8764_v12  ;;  %v13514_v12 = vld [vmem:[#allocation25_spill] sm:$0xff]  ;;  %vm13521_vm9 = vmmov %vm13519_vm8 }
 0x7f4   : > { %3633 = vmatprep.subr.bf16.mxu0 %v8769_v34  ;;  %vm3678_vm13 = vcmp.ge.s32.totalorder %v13514_v12, %v10511_v30  ;;  %vm3703_vm3 = vcmp.lt.s32.totalorder %v13514_v12, %v10514_v24  ;;  %v13515_v34 = vmov 0 }
 0x7f5   : > { %v13516_v34 = vsel %vm11017_vm0, 4294967295, %v13515_v34  ;;  %vm11021_vm11 = vmand %vm3678_vm13, %vm3703_vm3 }
 0x7f6   : > { %vm13251_vm10 = vmpackc.low %vm11021_vm11, %vm11017_vm0 }
 0x7f7   : > { %3634 = vmatpush1.bf16.msra.mxu0 %v8767_v13  ;;  %8084 = vmatpush1.bf16.msk.msra.mxu1 %vm13251_vm10, %v13412_v1  ;;  %vm13520_vm13 = vmmov %vm13519_vm8  ;;  %vm13524_vm10 = vnez %v13451_v56  ;;  %v11107_v56 = vadd.s32 1, %v9146_v3  ;;  %v8772_v13 = vld [vmem:[%s13128_s4 + $0xc4] ss:$8 sps:$4 sm:$0xff]  }
 0x7f8   : > { %8085 = vmatprep.subr.bf16.mxu1 %v13415_v44  ;;  %vm13522_vm3 = vmpackc.low %vm10538_vm5, %vm10530_vm14  ;;  %vm13528_vm5 = vnez %v13466_v21 }
 0x7fa   : > { %3644 = vmatmul.mubr.bf16.vlgmr.msra.gmra.mrb[44].mxu0 %v3462_v59 }
 0x7fb   : > { %4637 = vmatprep.mubr.bf16.mxu0 %v13440_v37 }
 0x8cd   : > { %v11036_v30 = vpop.f32.mrb[44].mxu0 }
 0x8ce   : > { %v3773_v24 = vrot.slane %v11036_v30, 4  ;;  %v11039_v59 = vpop.f32.mrb[45].mxu0  ;;  %v3859_v46 = vmul.f32 %v11036_v30, %v11036_v30 }
 0x8cf   : > { %v3779_v12 = vsel %vm13519_vm8, %v11039_v59, 0.0  ;;  %v3860_v10 = vmul.f32 %v11039_v59, %v11039_v59  ;;  %v3649_v52 = vpop.f32.mrb[46].mxu0 }
 0x8d0   : > { %v3774_v28 = vadd.f32 %v3773_v24, %v11036_v30  ;;  %v3780_v20 = vrot.slane %v3779_v12, 4  ;;  %v3650_v61 = vpop.f32.mrb[47].mxu0  ;;  %v3861_v49 = vrot.slane %v3859_v46, 4 }
 0x8d1   : > { %v3867_v50 = vsel %vm13520_vm13, %v3860_v10, 0.0  ;;  %vm13523_vm13 = vnez %v13454_v0  ;;  %v3752_v0 = vmul.u32 12, %v9142_v2 }
 0x8d2   : > { %v3775_v14 = vrot.slane %v3774_v28, 2  ;;  %v3781_v40 = vadd.f32 %v3780_v20, %v3779_v12  ;;  %v3868_v26 = vrot.slane %v3867_v50, 4  ;;  %vm13525_vm0 = vmpackc.low %vm13523_vm13, %vm13524_vm10  ;;  %vm13531_vm10 = vnez %v13469_v54 }
 0x8d3   : > { %vm13535_vm13 = vnez %v13492_v42 }
 0x8d4   : > { %v3776_v31 = vadd.f32 %v3775_v14, %v3774_v28  ;;  %v3782_v41 = vrot.slane %v3781_v40, 2  ;;  %v3869_v48 = vadd.f32 %v3868_v26, %v3867_v50 }
 0x8d6   : > { %v3783_v38 = vadd.f32 %v3782_v41, %v3781_v40  ;;  %v3870_v47 = vrot.slane %v3869_v48, 2  ;;  %v3777_v11 = vrot.slane %v3776_v31, 1 }
 0x8d8   : > { %v3784_v4 = vrot.slane %v3783_v38, 1  ;;  %v3871_v29 = vadd.f32 %v3870_v47, %v3869_v48  ;;  %v3778_v52 = vadd.f32 %v3777_v11, %v3776_v31 }
 0x8da   : > { %v3785_v9 = vadd.f32 %v3784_v4, %v3783_v38  ;;  %v3872_v63 = vrot.slane %v3871_v29, 1 }
 0x8dc   : > { %7497 = vmatprep.mubr.msk.f32.mxu1 %vm13521_vm9, %v3785_v9  ;;  %v3873_v24 = vadd.f32 %v3872_v63, %v3871_v29  ;;  %vm13526_vm9 = vnez %v13457_v35  ;;  %v3862_v63 = vadd.f32 %v3861_v49, %v3859_v46  ;;  %v3759_v9 = vmul.u32 12, %v10343_v33  ;;  %v8776_v46 = vld [vmem:[%s13128_s4 + $0xe0] ss:$8 sps:$4 sm:$0xff]   ;;  %v8781_v49 = vld [vmem:[%s13128_s4 + $0xf4] ss:$8 sps:$4 sm:$0xff]  }
 0x8dd   : > { %3854 = vmatmul.mubr.f32.vlgmr.msra.gmra.mrb[24].mxu1 %v3778_v52  ;;  %vm13527_vm14 = vmpackc.low %vm10603_vm1, %vm13526_vm9  ;;  %v3753_v35 = vmul.u32 12, %v9146_v3  ;;  %v3760_v29 = vmul.u32 12, %v11107_v56  ;;  %v8773_v52 = vld [vmem:[%s13128_s4 + $0xd0] ss:$8 sps:$4 sm:$0xff]  }
 0x8de   : > { %8087 = vmatpush1.bf16.msk.msra.mxu1 %vm13522_vm3, %v13412_v1  ;;  %7522 = vmatprep.mubr.msk.f32.mxu1 %vm13519_vm8, %v3873_v24  ;;  %vm13529_vm3 = vnez %v13463_v58  ;;  %vm13533_vm1 = vmpackc.low %vm10686_vm4, %vm10681_vm15  ;;  %vm13536_vm15 = vnez %v13490_v39  ;;  %v3863_v55 = vrot.slane %v3862_v63, 2  ;;  %v8778_v24 = vld [vmem:[%s13128_s4 + $0xe4] ss:$8 sps:$4 sm:$0xff]  }
 0x8df   : > { %8088 = vmatprep.subr.bf16.mxu1 %v13415_v44  ;;  %vm13530_vm8 = vmpackc.low %vm13528_vm5, %vm13529_vm3  ;;  %vm3762_vm5 = vcmp.lt.s32.totalorder %v10346_v36, %v3759_v9  ;;  %vm13541_vm3 = vnez %v13506_v25 }
 0x8e0   : > { %vm13537_vm4 = vmpackc.low %vm13535_vm13, %vm13536_vm15  ;;  %v3864_v4 = vadd.f32 %v3863_v55, %v3862_v63  ;;  %vm13544_vm15 = vnez %v13510_v53  ;;  %v8779_v63 = vld [vmem:[%s13128_s4 + $0xf0] ss:$8 sps:$4 sm:$0xff]   ;;  %v8790_v55 = vld [vmem:[%s13128_s4 + $0x124] ss:$8 sps:$4 sm:$0xff]  }
 0x8e2   : > { %8090 = vmatpush1.bf16.msk.msra.mxu1 %vm13525_vm0, %v13412_v1  ;;  %vm13532_vm0 = vmpackc.low %vm10657_vm2, %vm13531_vm10  ;;  %v3865_v58 = vrot.slane %v3864_v4, 1 }
 0x8e3   : > { %8091 = vmatprep.subr.bf16.mxu1 %v13415_v44  ;;  %vm13534_vm2 = vmpackc.low %vm10719_vm7, %vm10714_vm12  ;;  %vm13538_vm12 = vnez %v13500_v43  ;;  %vm13539_vm7 = vnez %v13498_v62 }
 0x8e4   : > { %vm13540_vm9 = vmpackc.low %vm13538_vm12, %vm13539_vm7  ;;  %vm13546_vm7 = vnez %v13516_v34  ;;  %v3866_v11 = vadd.f32 %v3865_v58, %v3864_v4  ;;  %v8788_v4 = vld [vmem:[%s13128_s4 + $0x120] ss:$8 sps:$4 sm:$0xff]   ;;  %v8793_v58 = vld [vmem:[%s13128_s4 + $0x134] ss:$8 sps:$4 sm:$0xff]  }
 0x8e6   : > { %8093 = vmatpush1.bf16.msk.msra.mxu1 %vm13527_vm14, %v13412_v1  ;;  %vm3755_vm14 = vcmp.ge.s32.totalorder %v10346_v36, %v3752_v0 }
 0x8e7   : > { %8094 = vmatprep.subr.bf16.mxu1 %v13415_v44 }
 0x8ea   : > { %8096 = vmatpush1.bf16.msk.msra.mxu1 %vm13530_vm8, %v13412_v1  ;;  %vm13542_vm8 = vnez %v13504_v15 }
 0x8eb   : > { %8097 = vmatprep.subr.bf16.mxu1 %v13415_v44  ;;  %vm13543_vm10 = vmpackc.low %vm13541_vm3, %vm13542_vm8  ;;  %vm3763_vm3 = vcmp.lt.s32.totalorder %v9152_v5, %v3760_v29 }
 0x8ee   : > { %8099 = vmatpush1.bf16.msk.msra.mxu1 %vm13532_vm0, %v13412_v1  ;;  %vm3757_vm0 = vcmp.ge.s32.totalorder %v10346_v36, %v3753_v35 }
 0x8ef   : > { %8100 = vmatprep.subr.bf16.mxu1 %v13415_v44 }
 0x8f2   : > { %8102 = vmatpush1.bf16.msk.msra.mxu1 %vm13533_vm1, %v13412_v1  ;;  %vm3764_vm1 = vcmp.lt.s32.totalorder %v10346_v36, %v3760_v29  ;;  %v8785_v29 = vld [vmem:[%s13128_s4 + $0x110] ss:$8 sps:$4 sm:$0xff]  }
 0x8f3   : > { %8103 = vmatprep.subr.bf16.mxu1 %v13415_v44  ;;  %vm3768_vm13 = vmand %vm3757_vm0, %vm3764_vm1 }
 0x8f6   : > { %8105 = vmatpush1.bf16.msk.msra.mxu1 %vm13534_vm2, %v13412_v1  ;;  %vm3766_vm2 = vmand %vm3755_vm14, %vm3762_vm5  ;;  %vm3756_vm14 = vcmp.ge.s32.totalorder %v9152_v5, %v3753_v35  ;;  %vm3761_vm5 = vcmp.lt.s32.totalorder %v9152_v5, %v3759_v9  ;;  %v8782_v9 = vld [vmem:[%s13128_s4 + $0x100] ss:$8 sps:$4 sm:$0xff]   ;;  %v8787_v35 = vld [vmem:[%s13128_s4 + $0x114] ss:$8 sps:$4 sm:$0xff]  }
 0x8f7   : > { %8106 = vmatprep.subr.bf16.mxu1 %v13415_v44  ;;  %vm8121_vm12 = vmpackc.low %vm3768_vm13, %vm3766_vm2 }
 0x8fa   : > { %8108 = vmatpush1.bf16.msk.msra.mxu1 %vm13537_vm4, %v13412_v1  ;;  %vm13545_vm4 = vmpackc.low %vm10994_vm6, %vm13544_vm15  ;;  %vm3754_vm6 = vcmp.ge.s32.totalorder %v9152_v5, %v3752_v0  ;;  %vm13255_vm15 = vcmask 1043456   ;;  %v8784_v0 = vld [vmem:[%s13128_s4 + $0x104] ss:$8 sps:$4 sm:$0xff]  }
 0x8fb   : > { %8109 = vmatprep.subr.bf16.mxu1 %v13415_v44  ;;  %vm3765_vm8 = vmand %vm3754_vm6, %vm3761_vm5  ;;  %vm13554_vm6 = vcmask 523264  }
 0x8fe   : > { %8111 = vmatpush1.bf16.msk.msra.mxu1 %vm13540_vm9, %v13412_v1  ;;  %vm13547_vm9 = vmpackc.low %vm11021_vm11, %vm13546_vm7  ;;  %vm13548_vm11 = vcmask 130048  }
 0x8ff   : > { %8112 = vmatprep.subr.bf16.mxu1 %v13415_v44  ;;  %vm13549_vm1 = vmmov %vm13548_vm11 }
 0x902   : > { %8114 = vmatpush1.bf16.msk.msra.mxu1 %vm13543_vm10, %v13412_v1  ;;  %vm3767_vm10 = vmand %vm3756_vm14, %vm3763_vm3 }
 0x903   : > { %8115 = vmatprep.subr.bf16.mxu1 %v13415_v44  ;;  %vm8123_vm0 = vmpackc.low %vm3767_vm10, %vm3765_vm8 }
 0x904   : > { %vm13555_vm14 = vmmov %vm13554_vm6 }
 0x906   : > { %8117 = vmatpush1.bf16.msk.msra.mxu1 %vm13545_vm4, %v13412_v1  ;;  %vm13550_vm4 = vcmask 64512  }
 0x907   : > { %8118 = vmatprep.subr.bf16.mxu1 %v13415_v44  ;;  %vm13552_vm7 = vmmov %vm13550_vm4 }
 0x90a   : > { %8120 = vmatpush1.bf16.msk.msra.mxu1 %vm13547_vm9, %v13412_v1  ;;  %vm13553_vm9 = vmmov %vm13550_vm4 }
 0x90b   : > { %8122 = vmatprep.subr.msk.bf16.mxu1 %vm8121_vm12, %v13412_v1 }
 0x90d   : > { %3942 = vmatmul.mubr.f32.vlgmr.msra.gmra.mrb[26].mxu1 %v3866_v11  ;;  %v8791_v11 = vld [vmem:[%s13128_s4 + $0x130] ss:$8 sps:$4 sm:$0xff]  }
 0x90e   : > { %4021 = vmatprep.mubr.f32.mxu1 %v13439_v32  ;;  %8124 = vmatpush1.bf16.msk.msra.mxu1 %vm8123_vm0, %v13412_v1 }
 0x90f   : > { %8126 = vmatprep.subr.msk.bf16.mxu1 %vm8121_vm12, %v13412_v1  ;;  %vm13551_vm12 = vmmov %vm13550_vm4 }
 0x9b0   : > { %v3855_v21 = vpop.f32.mrb[24].mxu1 }
 0x9b1   : > { %v3947_v47 = vmul.f32 0.010416667, %v3855_v21  ;;  %v3857_v54 = vpop.f32.mrb[25].mxu1  ;;  %v8796_v21 = vld [vmem:[%s13128_s4 + $0x144] ss:$8 sps:$4 sm:$0xff]  }
 0x9b2   : > { %v8799_v54 = vld [vmem:[%s13128_s4 + $0x154] ss:$8 sps:$4 sm:$0xff]  }
 0x9b3   : > { %7527 = vmatmul.mubr.msk.f32.vlgmr.msra.gmra.mrb[28].mxu1 %vm13548_vm11, %v3947_v47  ;;  %v3949_v45 = vmul.f32 %v3947_v47, %v3947_v47  ;;  %v8794_v47 = vld [vmem:[%s13128_s4 + $0x140] ss:$8 sps:$4 sm:$0xff]  }
 0x9b4   : > { %8128 = vmatpush1.bf16.msk.msra.mxu1 %vm8123_vm0, %v13412_v1  ;;  %4095 = vmatprep.mubr.f32.mxu1 %v13439_v32 }
 0x9e0   : > { %v3943_v38 = vpop.f32.mrb[26].mxu1 }
 0x9e1   : > { %v3948_v48 = vmul.f32 0.010416667, %v3943_v38  ;;  %v3945_v19 = vpop.f32.mrb[27].mxu1  ;;  %v8797_v38 = vld [vmem:[%s13128_s4 + $0x150] ss:$8 sps:$4 sm:$0xff]  }
 0x9e2   : > { %v8805_v19 = vld [vmem:[%s13128_s4 + $0x174] ss:$8 sps:$4 sm:$0xff]  }
 0x9e3   : > { %v3950_v22 = vsub.f32 %v3948_v48, %v3949_v45  ;;  %v8802_v45 = vld [vmem:[%s13128_s4 + $0x164] ss:$8 sps:$4 sm:$0xff]   ;;  %v8800_v48 = vld [vmem:[%s13128_s4 + $0x160] ss:$8 sps:$4 sm:$0xff]  }
 0x9e5   : > { %v3951_v41 = vmax.f32 %v3950_v22, 0.0  ;;  %v8803_v22 = vld [vmem:[%s13128_s4 + $0x170] ss:$8 sps:$4 sm:$0xff]  }
 0x9e7   : > { %v3952_v31 = vadd.f32 1e-05, %v3951_v41  ;;  %v8808_v41 = vld [vmem:[%s13128_s4 + $0x4] ss:$8 sps:$4 sm:$0xff]  }
 0x9e9   : > { %9060 = vrsqrt.f32 %v3952_v31 }
 0x9f3   : > { %v9061_v7 = vpop.eup %9060 }
 0x9f4   : > { %7532 = vmatmul.mubr.msk.f32.vlgmr.msra.gmra.mrb[30].mxu1 %vm13549_vm1, %v9061_v7 }
 0x9f5   : > { %4171 = vmatprep.mubr.bf16.mxu1 %v13440_v37 }
 0xa86   : > { %v4023_v23 = vpop.f32.mrb[28].mxu1 }
 0xa87   : > { %v4105_v26 = vrot.slane %v4023_v23, %v9483_v17  ;;  %v4025_v40 = vpop.f32.mrb[29].mxu1 }
 0xa88   : > { %v4109_v39 = vrot.slane %v4025_v40, %v9483_v17 }
 0xa89   : > { %v4110_v42 = vsub.f32 %v11036_v30, %v4105_v26  ;;  %v8770_v30 = vld [vmem:[%s13128_s4 + $0xc0] ss:$8 sps:$4 sm:$0xff]  }
 0xa8a   : > { %v4111_v14 = vsub.f32 %v11039_v59, %v4109_v39  ;;  %v8775_v59 = vld [vmem:[%s13128_s4 + $0xd4] ss:$8 sps:$4 sm:$0xff]  }
 0xac7   : > { %v4097_v50 = vpop.f32.mrb[30].mxu1 }
 0xac8   : > { %v4115_v62 = vrot.slane %v4097_v50, %v9483_v17  ;;  %v4099_v43 = vpop.f32.mrb[31].mxu1 }
 0xac9   : > { %v4119_v61 = vrot.slane %v4099_v43, %v9483_v17 }
 0xaca   : > { %v4120_v20 = vmul.f32 %v4115_v62, %v4110_v42 }
 0xacb   : > { %v4121_v15 = vmul.f32 %v4119_v61, %v4111_v14 }
 0xacc   : > { %vm4122_vm2 = vcmp.gt.f32.partialorder %v4120_v20, 0.0  ;;  %v4124_v25 = vmul.f32 0.2, %v4120_v20 }
 0xacd   : > { %vm4123_vm13 = vcmp.gt.f32.partialorder %v4121_v15, 0.0  ;;  %v4125_v28 = vmul.f32 0.2, %v4121_v15 }
 0xace   : > { %v4126_v53 = vsel %vm4122_vm2, %v4120_v20, %v4124_v25  ;;  %v8806_v20 = vld [vmem:[%s13128_s4] ss:$8 sps:$4 sm:$0xff]  }
 0xacf   : > { %v4127_v18 = vsel %vm4123_vm13, %v4121_v15, %v4125_v28  ;;  %v4128_v10 = vpack.c.bf16 %v4126_v53, %v4126_v53  ;;  %v8811_v28 = vld [vmem:[%s13128_s4 + $0x14] ss:$8 sps:$4 sm:$0xff]  }
 0xad0   : > { %v4129_v12 = vpack.c.bf16 %v4127_v18, %v4127_v18  ;;  %v8809_v18 = vld [vmem:[%s13128_s4 + $0x10] ss:$8 sps:$4 sm:$0xff]  }
 0xad1   : > { %v4134_v34 = vsel %vm13255_vm15, %v4128_v10, 0  ;;  %v8814_v10 = vld [vmem:[%s13128_s4 + $0x24] ss:$8 sps:$4 sm:$0xff]  }
 0xad2   : > { %7533 = vmatprep.subr.msk.bf16.mxu1 %vm13255_vm15, %v4129_v12  ;;  %7587 = vmatprep.subr.msk.bf16.mxu0 %vm13255_vm15, %v4129_v12 }
 0xad3   : > { %4140 = vmatpush1.bf16.msra.mxu1 %v4134_v34  ;;  %4606 = vmatpush1.bf16.msra.mxu0 %v4134_v34 }
 0xad4   : > { %7535 = vmatprep.subr.msk.bf16.mxu1 %vm13255_vm15, %v4129_v12  ;;  %7614 = vmatprep.subr.msk.bf16.mxu0 %vm13255_vm15, %v4129_v12  ;;  %v8812_v12 = vld [vmem:[%s13128_s4 + $0x20] ss:$8 sps:$4 sm:$0xff]  }
 0xad6   : > { %7534 = vmatmul.mubr.msk.bf16.vlgmr.msra.gmra.mrb[32].mxu1 %vm13550_vm4, %v10368_v60  ;;  %7588 = vmatmul.mubr.msk.bf16.vlgmr.msra.gmra.mrb[48].mxu0 %vm13551_vm12, %v10372_v57 }
 0xad7   : > { %4209 = vmatpush1.bf16.msra.mxu1 %v4134_v34  ;;  %4841 = vmatpush1.bf16.msra.mxu0 %v4134_v34 }
 0xad8   : > { %4240 = vmatprep.mubr.bf16.mxu1 %v13440_v37  ;;  %4872 = vmatprep.mubr.bf16.mxu0 %v13440_v37 }
 0xad9   : > { %4398 = vmatprep.subr.bf16.mxu1 %v8772_v13  ;;  %8129 = vmatprep.subr.bf16.mxu0 %v13415_v44  ;;  %v8817_v13 = vld [vmem:[%s13128_s4 + $0x34] ss:$8 sps:$4 sm:$0xff]  }
 0xade   : > { %7536 = vmatmul.mubr.msk.bf16.vlgmr.msra.gmra.mrb[36].mxu1 %vm13552_vm7, %v10386_v16  ;;  %7615 = vmatmul.mubr.msk.bf16.vlgmr.msra.gmra.mrb[52].mxu0 %vm13553_vm9, %v10390_v27 }
 0xadf   : > { %4399 = vmatpush1.bf16.msra.mxu1 %v8770_v30 }
 0xae0   : > { %4400 = vmatprep.subr.bf16.mxu1 %v8775_v59 }
 0xae3   : > { %4401 = vmatpush1.bf16.msra.mxu1 %v8773_v52 }
 0xae4   : > { %4402 = vmatprep.subr.bf16.mxu1 %v8778_v24  ;;  %v8815_v24 = vld [vmem:[%s13128_s4 + $0x30] ss:$8 sps:$4 sm:$0xff]  }
 0xae7   : > { %4403 = vmatpush1.bf16.msra.mxu1 %v8776_v46  ;;  %v8820_v46 = vld [vmem:[%s13128_s4 + $0x44] ss:$8 sps:$4 sm:$0xff]  }
 0xae8   : > { %4404 = vmatprep.subr.bf16.mxu1 %v8781_v49  ;;  %v8818_v49 = vld [vmem:[%s13128_s4 + $0x40] ss:$8 sps:$4 sm:$0xff]  }
 0xaeb   : > { %4405 = vmatpush1.bf16.msra.mxu1 %v8779_v63  ;;  %v8823_v63 = vld [vmem:[%s13128_s4 + $0x54] ss:$8 sps:$4 sm:$0xff]  }
 0xaec   : > { %4406 = vmatprep.subr.bf16.mxu1 %v8784_v0  ;;  %v11298_v0 = vmul.u32 6, %v9152_v5 }
 0xaee   : > { %vm5074_vm5 = vcmp.ge.s32.totalorder %v9142_v2, %v11298_v0  ;;  %vm5075_vm3 = vcmp.ge.s32.totalorder %v9146_v3, %v11298_v0  ;;  %vm5076_vm11 = vcmp.ge.s32.totalorder %v9155_v6, %v11298_v0  ;;  %vm5077_vm13 = vcmp.ge.s32.totalorder %v13449_v51, %v11298_v0 }
 0xaef   : > { %4407 = vmatpush1.bf16.msra.mxu1 %v8782_v9  ;;  %v11301_v9 = vmul.u32 6, %v9641_v8 }
 0xaf0   : > { %4408 = vmatprep.subr.bf16.mxu1 %v8787_v35  ;;  %v8821_v35 = vld [vmem:[%s13128_s4 + $0x50] ss:$8 sps:$4 sm:$0xff]  }
 0xaf1   : > { %vm5099_vm8 = vcmp.lt.s32.totalorder %v9142_v2, %v11301_v9  ;;  %vm5100_vm10 = vcmp.lt.s32.totalorder %v9146_v3, %v11301_v9  ;;  %vm5101_vm1 = vcmp.lt.s32.totalorder %v9155_v6, %v11301_v9  ;;  %vm5102_vm4 = vcmp.lt.s32.totalorder %v13449_v51, %v11301_v9 }
 0xaf2   : > { %vm11317_vm0 = vmand %vm5074_vm5, %vm5099_vm8 }
 0xaf3   : > { %4409 = vmatpush1.bf16.msra.mxu1 %v8785_v29  ;;  %v8826_v29 = vld [vmem:[%s13128_s4 + $0x64] ss:$8 sps:$4 sm:$0xff]   ;;  %vm11325_vm2 = vmand %vm5075_vm3, %vm5100_vm10 }
 0xaf4   : > { %4410 = vmatprep.subr.bf16.mxu1 %v8790_v55  ;;  %vm13253_vm12 = vmpackc.low %vm11325_vm2, %vm11317_vm0  ;;  %v5171_v55 = vmul.u32 6, %v9142_v2 }
 0xaf5   : > { %8131 = vmatpush1.bf16.msk.msra.mxu0 %vm13253_vm12, %v13412_v1  ;;  %vm11349_vm7 = vmand %vm5076_vm11, %vm5101_vm1 }
 0xaf6   : > { %8132 = vmatprep.subr.bf16.mxu0 %v13415_v44 }
 0xaf7   : > { %4411 = vmatpush1.bf16.msra.mxu1 %v8788_v4  ;;  %v5185_v4 = vmul.u32 6, %v10343_v33 }
 0xaf8   : > { %4412 = vmatprep.subr.bf16.mxu1 %v8793_v58  ;;  %v8824_v58 = vld [vmem:[%s13128_s4 + $0x60] ss:$8 sps:$4 sm:$0xff]  }
 0xafb   : > { %4413 = vmatpush1.bf16.msra.mxu1 %v8791_v11  ;;  %v8829_v11 = vld [vmem:[%s13128_s4 + $0x74] ss:$8 sps:$4 sm:$0xff]  }
 0xafc   : > { %4414 = vmatprep.subr.bf16.mxu1 %v8796_v21  ;;  %v13560_v21 = vmov 0 }
 0xafd   : > { %v13561_v21 = vsel %vm11349_vm7, 4294967295, %v13560_v21 }
 0xaff   : > { %4415 = vmatpush1.bf16.msra.mxu1 %v8794_v47  ;;  %v13562_v47 = vld [vmem:[#allocation6_spill] sm:$0xff] }
 0xb00   : > { %4416 = vmatprep.subr.bf16.mxu1 %v8799_v54  ;;  %vm5078_vm9 = vcmp.ge.s32.totalorder %v13562_v47, %v11298_v0  ;;  %v13563_v54 = vmov 0 }
 0xb03   : > { %4417 = vmatpush1.bf16.msra.mxu1 %v8797_v38  ;;  %v13565_v38 = vld [vmem:[#allocation7_spill] sm:$0xff] }
 0xb04   : > { %4418 = vmatprep.subr.bf16.mxu1 %v8802_v45  ;;  %vm5079_vm5 = vcmp.ge.s32.totalorder %v13565_v38, %v11298_v0  ;;  %vm5104_vm3 = vcmp.lt.s32.totalorder %v13565_v38, %v11301_v9  ;;  %v8827_v45 = vld [vmem:[%s13128_s4 + $0x70] ss:$8 sps:$4 sm:$0xff]  }
 0xb07   : > { %4419 = vmatpush1.bf16.msra.mxu1 %v8800_v48  ;;  %v13566_v48 = vmov 0 }
 0xb08   : > { %4420 = vmatprep.subr.bf16.mxu1 %v8805_v19  ;;  %v13568_v19 = vld [vmem:[#allocation8_spill] sm:$0xff] }
 0xb09   : > { %vm5080_vm11 = vcmp.ge.s32.totalorder %v13568_v19, %v11298_v0  ;;  %vm5105_vm1 = vcmp.lt.s32.totalorder %v13568_v19, %v11301_v9 }
 0xb0a   : > { %vm11403_vm12 = vmand %vm5080_vm11, %vm5105_vm1 }
 0xb0b   : > { %4421 = vmatpush1.bf16.msra.mxu1 %v8803_v22  ;;  %v8832_v22 = vld [vmem:[%s13128_s4 + $0x84] ss:$8 sps:$4 sm:$0xff]  }
 0xb0c   : > { %4562 = vmatprep.subr.bf16.mxu1 %v8808_v41  ;;  %v11916_v41 = vadd.s32 1, %v13449_v51 }
 0xba9   : > { %v11255_v31 = vpop.f32.mrb[32].mxu1  ;;  %v11257_v7 = vpop.f32.mrb[48].mxu0 }
 0xbaa   : > { %v4175_v23 = vpop.f32.mrb[33].mxu1  ;;  %v11259_v26 = vpop.f32.mrb[49].mxu0 }
 0xbab   : > { %v4177_v40 = vpop.f32.mrb[34].mxu1  ;;  %v4643_v39 = vpop.f32.mrb[50].mxu0  ;;  %v4181_v53 = vpack.c.bf16 %v4175_v23, %v4175_v23  ;;  %v13571_v23 = vld [vmem:[#allocation9_spill] sm:$0xff] }
 0xbac   : > { %v4178_v42 = vpop.f32.mrb[35].mxu1  ;;  %v4644_v14 = vpop.f32.mrb[51].mxu0  ;;  %v13572_v40 = vmov 0  ;;  %v13574_v39 = vld [vmem:[#allocation10_spill] sm:$0xff] }
 0xbad   : > { %v13573_v40 = vsel %vm11403_vm12, 4294967295, %v13572_v40  ;;  %v8830_v42 = vld [vmem:[%s13128_s4 + $0x80] ss:$8 sps:$4 sm:$0xff]   ;;  %v13575_v14 = vmov 0 }
 0xbb1   : > { %v4242_v50 = vpop.f32.mrb[36].mxu1  ;;  %v11278_v34 = vpop.f32.mrb[52].mxu0 }
 0xbb2   : > { %v4244_v62 = vpop.f32.mrb[37].mxu1  ;;  %v4249_v15 = vpack.c.bf16 %v4242_v50, %v4242_v50  ;;  %v11283_v30 = vpop.f32.mrb[53].mxu0  ;;  %v13577_v50 = vld [vmem:[#allocation11_spill] sm:$0xff] }
 0xbb3   : > { %v4250_v43 = vpack.c.bf16 %v4244_v62, %v4244_v62  ;;  %v4246_v61 = vpop.f32.mrb[38].mxu1  ;;  %v4878_v59 = vpop.f32.mrb[54].mxu0  ;;  %vm5083_vm11 = vcmp.ge.s32.totalorder %v13577_v50, %v11298_v0  ;;  %vm5108_vm1 = vcmp.lt.s32.totalorder %v13577_v50, %v11301_v9  ;;  %v8835_v62 = vld [vmem:[%s13128_s4 + $0x94] ss:$8 sps:$4 sm:$0xff]  }
 0xbb4   : > { %v4247_v25 = vpop.f32.mrb[39].mxu1  ;;  %v4879_v52 = vpop.f32.mrb[55].mxu0  ;;  %v13580_v61 = vld [vmem:[#allocation12_spill] sm:$0xff]  ;;  %v8841_v59 = vld [vmem:[%s13128_s4 + $0xb4] ss:$8 sps:$4 sm:$0xff]  }
 0xbb5   : > { %7561 = vmatprep.mubr.msk.bf16.mxu1 %vm13554_vm6, %v4250_v43  ;;  %vm5103_vm6 = vcmp.lt.s32.totalorder %v13562_v47, %v11301_v9  ;;  %v13578_v43 = vmov 0  ;;  %vm5084_vm15 = vcmp.ge.s32.totalorder %v13580_v61, %v11298_v0  ;;  %v8833_v25 = vld [vmem:[%s13128_s4 + $0x90] ss:$8 sps:$4 sm:$0xff]  }
 0xbb6   : > { %4431 = vmatmul.mubr.bf16.vlgmr.msra.gmra.mrb[40].mxu1 %v4249_v15  ;;  %vm11373_vm10 = vmand %vm5078_vm9, %vm5103_vm6  ;;  %vm5106_vm9 = vcmp.lt.s32.totalorder %v13571_v23, %v11301_v9  ;;  %v13583_v15 = vld [vmem:[#allocation13_spill] sm:$0xff] }
 0xbb7   : > { %4563 = vmatpush1.bf16.msra.mxu1 %v8806_v20  ;;  %7586 = vmatprep.mubr.msk.bf16.mxu1 %vm13555_vm14, %v4181_v53  ;;  %vm11358_vm14 = vmand %vm5077_vm13, %vm5102_vm4  ;;  %v13567_v48 = vsel %vm11373_vm10, 4294967295, %v13566_v48  ;;  %vm5081_vm4 = vcmp.ge.s32.totalorder %v13571_v23, %v11298_v0 }
 0xbb8   : > { %4564 = vmatprep.subr.bf16.mxu1 %v8811_v28  ;;  %v13564_v54 = vsel %vm11358_vm14, 4294967295, %v13563_v54  ;;  %vm13254_vm8 = vmpackc.low %vm11358_vm14, %vm11349_vm7  ;;  %vm5109_vm7 = vcmp.lt.s32.totalorder %v13580_v61, %v11301_v9  ;;  %v8838_v28 = vld [vmem:[%s13128_s4 + $0xa4] ss:$8 sps:$4 sm:$0xff]  }
 0xbb9   : > { %8134 = vmatpush1.bf16.msk.msra.mxu0 %vm13254_vm8, %v13412_v1  ;;  %vm11390_vm13 = vmand %vm5079_vm5, %vm5104_vm3  ;;  %vm5082_vm5 = vcmp.ge.s32.totalorder %v13574_v39, %v11298_v0  ;;  %vm5107_vm3 = vcmp.lt.s32.totalorder %v13574_v39, %v11301_v9 }
 0xbba   : > { %8135 = vmatprep.subr.bf16.mxu0 %v13415_v44  ;;  %vm13258_vm6 = vmpackc.low %vm11390_vm13, %vm11373_vm10 }
 0xbbb   : > { %4565 = vmatpush1.bf16.msra.mxu1 %v8809_v18  ;;  %vm11414_vm8 = vmand %vm5081_vm4, %vm5106_vm9  ;;  %vm5110_vm4 = vcmp.lt.s32.totalorder %v13583_v15, %v11301_v9 }
 0xbbc   : > { %4566 = vmatprep.subr.bf16.mxu1 %v8814_v10  ;;  %v13576_v14 = vsel %vm11414_vm8, 4294967295, %v13575_v14  ;;  %vm11436_vm9 = vmand %vm5082_vm5, %vm5107_vm3  ;;  %v13589_v10 = vld [vmem:[#allocation14_spill] sm:$0xff] }
 0xbbd   : > { %8137 = vmatpush1.bf16.msk.msra.mxu0 %vm13258_vm6, %v13412_v1  ;;  %v13579_v43 = vsel %vm11436_vm9, 4294967295, %v13578_v43  ;;  %vm11444_vm14 = vmand %vm5083_vm11, %vm5108_vm1  ;;  %vm5085_vm6 = vcmp.ge.s32.totalorder %v13583_v15, %v11298_v0  ;;  %vm5086_vm5 = vcmp.ge.s32.totalorder %v13589_v10, %v11298_v0  ;;  %vm5111_vm10 = vcmp.lt.s32.totalorder %v13589_v10, %v11301_v9 }
 0xbbe   : > { %8138 = vmatprep.subr.bf16.mxu0 %v13415_v44  ;;  %vm13584_vm3 = vmpackc.low %vm11414_vm8, %vm11403_vm12 }
 0xbbf   : > { %4567 = vmatpush1.bf16.msra.mxu1 %v8812_v12  ;;  %vm11468_vm11 = vmand %vm5084_vm15, %vm5109_vm7  ;;  %v13590_v12 = vld [vmem:[#allocation15_spill] sm:$0xff] }
 0xbc0   : > { %4568 = vmatprep.subr.bf16.mxu1 %v8817_v13  ;;  %vm11473_vm1 = vmand %vm5085_vm6, %vm5110_vm4  ;;  %vm5087_vm12 = vcmp.ge.s32.totalorder %v13590_v12, %v11298_v0  ;;  %vm5112_vm15 = vcmp.lt.s32.totalorder %v13590_v12, %v11301_v9  ;;  %v8836_v13 = vld [vmem:[%s13128_s4 + $0xa0] ss:$8 sps:$4 sm:$0xff]  }
 0xbc1   : > { %8140 = vmatpush1.bf16.msk.msra.mxu0 %vm13584_vm3, %v13412_v1  ;;  %vm13591_vm6 = vmpackc.low %vm11444_vm14, %vm11436_vm9 }
 0xbc2   : > { %8141 = vmatprep.subr.bf16.mxu0 %v13415_v44  ;;  %vm11501_vm4 = vmand %vm5086_vm5, %vm5111_vm10 }
 0xbc3   : > { %4569 = vmatpush1.bf16.msra.mxu1 %v8815_v24  ;;  %vm11506_vm3 = vmand %vm5087_vm12, %vm5112_vm15 }
 0xbc4   : > { %4570 = vmatprep.subr.bf16.mxu1 %v8820_v46  ;;  %v13596_v46 = vld [vmem:[#allocation16_spill] sm:$0xff]  ;;  %vm13598_vm5 = vmpackc.low %vm11473_vm1, %vm11468_vm11 }
 0xbc5   : > { %8143 = vmatpush1.bf16.msk.msra.mxu0 %vm13591_vm6, %v13412_v1  ;;  %vm5088_vm7 = vcmp.ge.s32.totalorder %v13596_v46, %v11298_v0  ;;  %vm5113_vm8 = vcmp.lt.s32.totalorder %v13596_v46, %v11301_v9  ;;  %vm13264_vm15 = vmpackc.low %vm11506_vm3, %vm11501_vm4 }
 0xbc6   : > { %8144 = vmatprep.subr.bf16.mxu0 %v13415_v44  ;;  %vm11535_vm6 = vmand %vm5088_vm7, %vm5113_vm8  ;;  %vm13603_vm7 = vcmask 523264  }
 0xbc7   : > { %4571 = vmatpush1.bf16.msra.mxu1 %v8818_v49  ;;  %v8839_v49 = vld [vmem:[%s13128_s4 + $0xb0] ss:$8 sps:$4 sm:$0xff]  }
 0xbc8   : > { %4572 = vmatprep.subr.bf16.mxu1 %v8823_v63  ;;  %v13597_v63 = vld [vmem:[#allocation17_spill] sm:$0xff] }
 0xbc9   : > { %vm5089_vm10 = vcmp.ge.s32.totalorder %v13597_v63, %v11298_v0  ;;  %vm5114_vm12 = vcmp.lt.s32.totalorder %v13597_v63, %v11301_v9  ;;  %8146 = vmatpush1.bf16.msk.msra.mxu0 %vm13598_vm5, %v13412_v1 }
 0xbca   : > { %8147 = vmatprep.subr.bf16.mxu0 %v13415_v44  ;;  %vm11539_vm9 = vmand %vm5089_vm10, %vm5114_vm12 }
 0xbcb   : > { %4573 = vmatpush1.bf16.msra.mxu1 %v8821_v35  ;;  %v8844_v35 = vld [vmem:[%s13128_s4 + $0x184] ss:$8 sps:$4 sm:$0xff]   ;;  %vm13263_vm8 = vmpackc.low %vm11539_vm9, %vm11535_vm6 }
 0xbcc   : > { %4574 = vmatprep.subr.bf16.mxu1 %v8826_v29  ;;  %v13599_v29 = vmov 0  ;;  %vm13604_vm10 = vmmov %vm13603_vm7 }
 0xbcd   : > { %v13600_v29 = vsel %vm11535_vm6, 4294967295, %v13599_v29  ;;  %8149 = vmatpush1.bf16.msk.msra.mxu0 %vm13264_vm15, %v13412_v1 }
 0xbce   : > { %8150 = vmatprep.subr.bf16.mxu0 %v13415_v44 }
 0xbcf   : > { %4575 = vmatpush1.bf16.msra.mxu1 %v8824_v58  ;;  %v13601_v58 = vmov 0 }
 0xbd0   : > { %4576 = vmatprep.subr.bf16.mxu1 %v8829_v11  ;;  %v13602_v58 = vsel %vm11539_vm9, 4294967295, %v13601_v58  ;;  %v8842_v11 = vld [vmem:[%s13128_s4 + $0x180] ss:$8 sps:$4 sm:$0xff]  }
 0xbd1   : > { %8152 = vmatpush1.bf16.msk.msra.mxu0 %vm13263_vm8, %v13412_v1 }
 0xbd2   : > { %8153 = vmatprep.subr.bf16.mxu0 %v13415_v44 }
 0xbd3   : > { %4577 = vmatpush1.bf16.msra.mxu1 %v8827_v45  ;;  %v4647_v45 = vpack.c.bf16 %v11259_v26, %v11259_v26  ;;  %v8850_v26 = vld [vmem:[%s13128_s4 + $0x1a4] ss:$8 sps:$4 sm:$0xff]  }
 0xbd4   : > { %4578 = vmatprep.subr.bf16.mxu1 %v8832_v22  ;;  %v4180_v22 = vpack.c.bf16 %v11255_v31, %v11255_v31  ;;  %v8845_v31 = vld [vmem:[%s13128_s4 + $0x190] ss:$8 sps:$4 sm:$0xff]  }
 0xbd7   : > { %4579 = vmatpush1.bf16.msra.mxu1 %v8830_v42  ;;  %v8847_v42 = vld [vmem:[%s13128_s4 + $0x194] ss:$8 sps:$4 sm:$0xff]  }
 0xbd8   : > { %4580 = vmatprep.subr.bf16.mxu1 %v8835_v62  ;;  %v8848_v62 = vld [vmem:[%s13128_s4 + $0x1a0] ss:$8 sps:$4 sm:$0xff]  }
 0xbdb   : > { %4581 = vmatpush1.bf16.msra.mxu1 %v8833_v25  ;;  %v8853_v25 = vld [vmem:[%s13128_s4 + $0x1b4] ss:$8 sps:$4 sm:$0xff]  }
 0xbdc   : > { %4582 = vmatprep.subr.bf16.mxu1 %v8838_v28  ;;  %v8851_v28 = vld [vmem:[%s13128_s4 + $0x1b0] ss:$8 sps:$4 sm:$0xff]  }
 0xbdf   : > { %4583 = vmatpush1.bf16.msra.mxu1 %v8836_v13  ;;  %v8856_v13 = vld [vmem:[%s13128_s4 + $0x1c4] ss:$8 sps:$4 sm:$0xff]  }
 0xbe0   : > { %4584 = vmatprep.subr.bf16.mxu1 %v8841_v59  ;;  %v8854_v59 = vld [vmem:[%s13128_s4 + $0x1c0] ss:$8 sps:$4 sm:$0xff]  }
 0xbe3   : > { %4585 = vmatpush1.bf16.msra.mxu1 %v8839_v49  ;;  %v8859_v49 = vld [vmem:[%s13128_s4 + $0x1d4] ss:$8 sps:$4 sm:$0xff]  }
 0xbe4   : > { %4795 = vmatprep.subr.bf16.mxu1 %v8844_v35  ;;  %v8857_v35 = vld [vmem:[%s13128_s4 + $0x1d0] ss:$8 sps:$4 sm:$0xff]  }
 0xbe6   : > { %4595 = vmatmul.mubr.bf16.vlgmr.msra.gmra.mrb[40].mxu1 %v4180_v22  ;;  %v8865_v22 = vld [vmem:[%s13128_s4 + $0x1f4] ss:$8 sps:$4 sm:$0xff]  }
 0xbe7   : > { %4796 = vmatpush1.bf16.msra.mxu1 %v8842_v11  ;;  %7613 = vmatprep.mubr.msk.bf16.mxu1 %vm13603_vm7, %v4647_v45  ;;  %v8862_v11 = vld [vmem:[%s13128_s4 + $0x1e4] ss:$8 sps:$4 sm:$0xff]   ;;  %v8860_v45 = vld [vmem:[%s13128_s4 + $0x1e0] ss:$8 sps:$4 sm:$0xff]  }
 0xbe8   : > { %4797 = vmatprep.subr.bf16.mxu1 %v8847_v42  ;;  %v8863_v42 = vld [vmem:[%s13128_s4 + $0x1f0] ss:$8 sps:$4 sm:$0xff]  }
 0xbeb   : > { %4798 = vmatpush1.bf16.msra.mxu1 %v8845_v31  ;;  %v8868_v31 = vld [vmem:[%s13128_s4 + $0x204] ss:$8 sps:$4 sm:$0xff]  }
 0xbec   : > { %4799 = vmatprep.subr.bf16.mxu1 %v8850_v26  ;;  %v8866_v26 = vld [vmem:[%s13128_s4 + $0x200] ss:$8 sps:$4 sm:$0xff]  }
 0xbef   : > { %4800 = vmatpush1.bf16.msra.mxu1 %v8848_v62  ;;  %v8871_v62 = vld [vmem:[%s13128_s4 + $0x214] ss:$8 sps:$4 sm:$0xff]  }
 0xbf0   : > { %4801 = vmatprep.subr.bf16.mxu1 %v8853_v25  ;;  %v8869_v25 = vld [vmem:[%s13128_s4 + $0x210] ss:$8 sps:$4 sm:$0xff]  }
 0xbf3   : > { %4802 = vmatpush1.bf16.msra.mxu1 %v8851_v28  ;;  %v8874_v28 = vld [vmem:[%s13128_s4 + $0x224] ss:$8 sps:$4 sm:$0xff]  }
 0xbf4   : > { %4803 = vmatprep.subr.bf16.mxu1 %v8856_v13  ;;  %v8872_v13 = vld [vmem:[%s13128_s4 + $0x220] ss:$8 sps:$4 sm:$0xff]  }
 0xbf7   : > { %4804 = vmatpush1.bf16.msra.mxu1 %v8854_v59  ;;  %v8877_v59 = vld [vmem:[%s13128_s4 + $0x234] ss:$8 sps:$4 sm:$0xff]  }
 0xbf8   : > { %4805 = vmatprep.subr.bf16.mxu1 %v8859_v49  ;;  %v8875_v49 = vld [vmem:[%s13128_s4 + $0x230] ss:$8 sps:$4 sm:$0xff]  }
 0xbfb   : > { %4806 = vmatpush1.bf16.msra.mxu1 %v8857_v35  ;;  %v8880_v35 = vld [vmem:[%s13128_s4 + $0x244] ss:$8 sps:$4 sm:$0xff]  }
 0xbfc   : > { %4807 = vmatprep.subr.bf16.mxu1 %v8862_v11  ;;  %v4646_v11 = vpack.c.bf16 %v11257_v7, %v11257_v7  ;;  %v8886_v7 = vld [vmem:[%s13128_s4 + $0x264] ss:$8 sps:$4 sm:$0xff]  }
 0xbff   : > { %4808 = vmatpush1.bf16.msra.mxu1 %v8860_v45  ;;  %v8878_v45 = vld [vmem:[%s13128_s4 + $0x240] ss:$8 sps:$4 sm:$0xff]  }
 0xc00   : > { %4809 = vmatprep.subr.bf16.mxu1 %v8865_v22  ;;  %v4882_v22 = vpack.c.bf16 %v11283_v30, %v11283_v30  ;;  %v8884_v30 = vld [vmem:[%s13128_s4 + $0x260] ss:$8 sps:$4 sm:$0xff]  }
 0xc03   : > { %4810 = vmatpush1.bf16.msra.mxu1 %v8863_v42  ;;  %v8883_v42 = vld [vmem:[%s13128_s4 + $0x254] ss:$8 sps:$4 sm:$0xff]  }
 0xc04   : > { %4811 = vmatprep.subr.bf16.mxu1 %v8868_v31  ;;  %v8881_v31 = vld [vmem:[%s13128_s4 + $0x250] ss:$8 sps:$4 sm:$0xff]  }
 0xc07   : > { %4812 = vmatpush1.bf16.msra.mxu1 %v8866_v26  ;;  %v8889_v26 = vld [vmem:[%s13128_s4 + $0x274] ss:$8 sps:$4 sm:$0xff]  }
 0xc08   : > { %4813 = vmatprep.subr.bf16.mxu1 %v8871_v62  ;;  %v8887_v62 = vld [vmem:[%s13128_s4 + $0x270] ss:$8 sps:$4 sm:$0xff]  }
 0xc0b   : > { %4814 = vmatpush1.bf16.msra.mxu1 %v8869_v25  ;;  %v8892_v25 = vld [vmem:[%s13128_s4 + $0x284] ss:$8 sps:$4 sm:$0xff]  }
 0xc0c   : > { %4815 = vmatprep.subr.bf16.mxu1 %v8874_v28  ;;  %v8890_v28 = vld [vmem:[%s13128_s4 + $0x280] ss:$8 sps:$4 sm:$0xff]  }
 0xc0f   : > { %4816 = vmatpush1.bf16.msra.mxu1 %v8872_v13  ;;  %v8895_v13 = vld [vmem:[%s13128_s4 + $0x294] ss:$8 sps:$4 sm:$0xff]  }
 0xc10   : > { %4817 = vmatprep.subr.bf16.mxu1 %v8877_v59  ;;  %v8893_v59 = vld [vmem:[%s13128_s4 + $0x290] ss:$8 sps:$4 sm:$0xff]  }
 0xc13   : > { %4818 = vmatpush1.bf16.msra.mxu1 %v8875_v49  ;;  %v8898_v49 = vld [vmem:[%s13128_s4 + $0x2a4] ss:$8 sps:$4 sm:$0xff]  }
 0xc14   : > { %5030 = vmatprep.subr.bf16.mxu1 %v8880_v35  ;;  %v8896_v35 = vld [vmem:[%s13128_s4 + $0x2a0] ss:$8 sps:$4 sm:$0xff]  }
 0xc16   : > { %4828 = vmatmul.mubr.bf16.vlgmr.msra.gmra.mrb[40].mxu1 %v4646_v11  ;;  %v8901_v11 = vld [vmem:[%s13128_s4 + $0x2b4] ss:$8 sps:$4 sm:$0xff]  }
 0xc17   : > { %5031 = vmatpush1.bf16.msra.mxu1 %v8878_v45  ;;  %7640 = vmatprep.mubr.msk.bf16.mxu1 %vm13604_vm10, %v4882_v22  ;;  %v8899_v45 = vld [vmem:[%s13128_s4 + $0x2b0] ss:$8 sps:$4 sm:$0xff]   ;;  %v8904_v22 = vld [vmem:[%s13128_s4 + $0x2c4] ss:$8 sps:$4 sm:$0xff]  }
 0xc18   : > { %5032 = vmatprep.subr.bf16.mxu1 %v8883_v42  ;;  %v8902_v42 = vld [vmem:[%s13128_s4 + $0x2c0] ss:$8 sps:$4 sm:$0xff]  }
 0xc1b   : > { %5033 = vmatpush1.bf16.msra.mxu1 %v8881_v31  ;;  %v8907_v31 = vld [vmem:[%s13128_s4 + $0x2d4] ss:$8 sps:$4 sm:$0xff]  }
 0xc1c   : > { %5034 = vmatprep.subr.bf16.mxu1 %v8886_v7  ;;  %v8905_v7 = vld [vmem:[%s13128_s4 + $0x2d0] ss:$8 sps:$4 sm:$0xff]  }
 0xc1f   : > { %5035 = vmatpush1.bf16.msra.mxu1 %v8884_v30  ;;  %v8910_v30 = vld [vmem:[%s13128_s4 + $0x2e4] ss:$8 sps:$4 sm:$0xff]  }
 0xc20   : > { %5036 = vmatprep.subr.bf16.mxu1 %v8889_v26  ;;  %v8908_v26 = vld [vmem:[%s13128_s4 + $0x2e0] ss:$8 sps:$4 sm:$0xff]  }
 0xc23   : > { %5037 = vmatpush1.bf16.msra.mxu1 %v8887_v62  ;;  %v8913_v62 = vld [vmem:[%s13128_s4 + $0x2f4] ss:$8 sps:$4 sm:$0xff]  }
 0xc24   : > { %5038 = vmatprep.subr.bf16.mxu1 %v8892_v25  ;;  %v8911_v25 = vld [vmem:[%s13128_s4 + $0x2f0] ss:$8 sps:$4 sm:$0xff]  }
 0xc27   : > { %5039 = vmatpush1.bf16.msra.mxu1 %v8890_v28  ;;  %v4881_v28 = vpack.c.bf16 %v11278_v34, %v11278_v34  ;;  %v13611_v34 = vld [vmem:[#allocation20_spill] sm:$0xff] }
 0xc28   : > { %5040 = vmatprep.subr.bf16.mxu1 %v8895_v13  ;;  %v13605_v13 = vld [vmem:[#allocation18_spill] sm:$0xff] }
 0xc29   : > { %vm5090_vm12 = vcmp.ge.s32.totalorder %v13605_v13, %v11298_v0  ;;  %vm5115_vm7 = vcmp.lt.s32.totalorder %v13605_v13, %v11301_v9 }
 0xc2a   : > { %vm11722_vm8 = vmand %vm5090_vm12, %vm5115_vm7  ;;  %vm5092_vm12 = vcmp.ge.s32.totalorder %v13611_v34, %v11298_v0  ;;  %vm5117_vm7 = vcmp.lt.s32.totalorder %v13611_v34, %v11301_v9 }
 0xc2b   : > { %5041 = vmatpush1.bf16.msra.mxu1 %v8893_v59  ;;  %v13606_v59 = vld [vmem:[#allocation19_spill] sm:$0xff]  ;;  %vm11749_vm9 = vmand %vm5092_vm12, %vm5117_vm7 }
 0xc2c   : > { %5042 = vmatprep.subr.bf16.mxu1 %v8898_v49  ;;  %vm5091_vm5 = vcmp.ge.s32.totalorder %v13606_v59, %v11298_v0  ;;  %vm5116_vm10 = vcmp.lt.s32.totalorder %v13606_v59, %v11301_v9  ;;  %v13607_v49 = vmov 0 }
 0xc2d   : > { %v13608_v49 = vsel %vm11722_vm8, 4294967295, %v13607_v49  ;;  %vm11726_vm15 = vmand %vm5091_vm5, %vm5116_vm10 }
 0xc2e   : > { %vm13268_vm6 = vmpackc.low %vm11726_vm15, %vm11722_vm8 }
 0xc2f   : > { %5043 = vmatpush1.bf16.msra.mxu1 %v8896_v35  ;;  %v13609_v35 = vmov 0  ;;  %8155 = vmatpush1.bf16.msk.msra.mxu0 %vm13268_vm6, %v13412_v1 }
 0xc30   : > { %5044 = vmatprep.subr.bf16.mxu1 %v8901_v11  ;;  %v13610_v35 = vsel %vm11726_vm15, 4294967295, %v13609_v35  ;;  %v13612_v11 = vld [vmem:[#allocation21_spill] sm:$0xff]  ;;  %8156 = vmatprep.subr.bf16.mxu0 %v13415_v44 }
 0xc31   : > { %vm5093_vm5 = vcmp.ge.s32.totalorder %v13612_v11, %v11298_v0  ;;  %vm5118_vm10 = vcmp.lt.s32.totalorder %v13612_v11, %v11301_v9 }
 0xc32   : > { %vm11753_vm8 = vmand %vm5093_vm5, %vm5118_vm10 }
 0xc33   : > { %5045 = vmatpush1.bf16.msra.mxu1 %v8899_v45  ;;  %v13613_v45 = vmov 0  ;;  %vm13271_vm6 = vmpackc.low %vm11753_vm8, %vm11749_vm9 }
 0xc34   : > { %5046 = vmatprep.subr.bf16.mxu1 %v8904_v22  ;;  %v13614_v45 = vsel %vm11749_vm9, 4294967295, %v13613_v45  ;;  %v13615_v22 = vmov 0  ;;  %8158 = vmatpush1.bf16.msk.msra.mxu0 %vm13271_vm6, %v13412_v1 }
 0xc35   : > { %v13616_v22 = vsel %vm11753_vm8, 4294967295, %v13615_v22  ;;  %8159 = vmatprep.subr.bf16.mxu0 %v13415_v44 }
 0xc37   : > { %5047 = vmatpush1.bf16.msra.mxu1 %v8902_v42  ;;  %v13617_v42 = vld [vmem:[#allocation22_spill] sm:$0xff] }
 0xc38   : > { %5048 = vmatprep.subr.bf16.mxu1 %v8907_v31  ;;  %vm5094_vm12 = vcmp.ge.s32.totalorder %v13617_v42, %v11298_v0  ;;  %v13618_v31 = vld [vmem:[#allocation23_spill] sm:$0xff]  ;;  %vm5119_vm7 = vcmp.lt.s32.totalorder %v13617_v42, %v11301_v9 }
 0xc39   : > { %vm5095_vm5 = vcmp.ge.s32.totalorder %v13618_v31, %v11298_v0  ;;  %vm5120_vm10 = vcmp.lt.s32.totalorder %v13618_v31, %v11301_v9  ;;  %vm11776_vm15 = vmand %vm5094_vm12, %vm5119_vm7 }
 0xc3a   : > { %vm11780_vm9 = vmand %vm5095_vm5, %vm5120_vm10 }
 0xc3b   : > { %5049 = vmatpush1.bf16.msra.mxu1 %v8905_v7  ;;  %v13619_v7 = vmov 0  ;;  %vm13274_vm6 = vmpackc.low %vm11780_vm9, %vm11776_vm15 }
 0xc3c   : > { %5050 = vmatprep.subr.bf16.mxu1 %v8910_v30  ;;  %v13620_v7 = vsel %vm11776_vm15, 4294967295, %v13619_v7  ;;  %8161 = vmatpush1.bf16.msk.msra.mxu0 %vm13274_vm6, %v13412_v1 }
 0xc3d   : > { %8162 = vmatprep.subr.bf16.mxu0 %v13415_v44 }
 0xc3f   : > { %5051 = vmatpush1.bf16.msra.mxu1 %v8908_v26  ;;  %v13623_v26 = vld [vmem:[#allocation24_spill] sm:$0xff] }
 0xc40   : > { %5052 = vmatprep.subr.bf16.mxu1 %v8913_v62  ;;  %vm5096_vm12 = vcmp.ge.s32.totalorder %v13623_v26, %v11298_v0  ;;  %v13624_v62 = vld [vmem:[#allocation25_spill] sm:$0xff]  ;;  %vm5121_vm7 = vcmp.lt.s32.totalorder %v13623_v26, %v11301_v9 }
 0xc41   : > { %vm5097_vm5 = vcmp.ge.s32.totalorder %v13624_v62, %v11298_v0  ;;  %vm5122_vm10 = vcmp.lt.s32.totalorder %v13624_v62, %v11301_v9  ;;  %vm11803_vm8 = vmand %vm5096_vm12, %vm5121_vm7  ;;  %vm5220_vm12 = vcmask 519168   ;;  %vm13630_vm7 = vcmask 523264  }
 0xc42   : > { %vm11807_vm15 = vmand %vm5097_vm5, %vm5122_vm10  ;;  %vm13629_vm5 = vcmask 1043456  }
 0xc43   : > { %5053 = vmatpush1.bf16.msra.mxu1 %v8911_v25  ;;  %v13625_v25 = vmov 0  ;;  %vm13298_vm6 = vmpackc.low %vm11807_vm15, %vm11803_vm8 }
 0xc44   : > { %v13626_v25 = vsel %vm11803_vm8, 4294967295, %v13625_v25  ;;  %8164 = vmatpush1.bf16.msk.msra.mxu0 %vm13298_vm6, %v13412_v1  ;;  %vm13631_vm10 = vmpackc.low %vm11325_vm2, %vm11317_vm0  ;;  %vm13634_vm6 = vnez %v13561_v21  ;;  %vm13638_vm2 = vnez %v13576_v14  ;;  %v5173_v14 = vmul.u32 6, %v9155_v6 }
 0xc45   : > { %8165 = vmatprep.subr.bf16.mxu0 %v13415_v44 }
 0xc46   : > { %5063 = vmatmul.mubr.bf16.vlgmr.msra.gmra.mrb[40].mxu1 %v4881_v28  ;;  %v8919_v28 = vld [vmem:[%s13129_s5 + $0xd4] ss:$8 sps:$4 sm:$0xff]  }
 0xd19   : > { %v11822_v0 = vpop.f32.mrb[40].mxu1 }
 0xd1a   : > { %v5213_v9 = vsel %vm13629_vm5, %v11822_v0, 0.0  ;;  %v11826_v62 = vpop.f32.mrb[41].mxu1  ;;  %vm13633_vm5 = vnez %v13564_v54  ;;  %v5186_v54 = vmul.u32 6, %v11107_v56 }
 0xd1b   : > { %v5214_v26 = vrot.slane %v5213_v9, 4  ;;  %v5221_v31 = vsel %vm5220_vm12, %v11826_v62, 0.0  ;;  %v5302_v42 = vmul.f32 %v11826_v62, %v11826_v62  ;;  %v5068_v11 = vpop.f32.mrb[42].mxu1  ;;  %vm13635_vm8 = vmpackc.low %vm13633_vm5, %vm13634_vm6  ;;  %vm13641_vm6 = vnez %v13579_v43 }
 0xd1c   : > { %v5222_v34 = vrot.slane %v5221_v31, 4  ;;  %v5069_v59 = vpop.f32.mrb[43].mxu1  ;;  %vm13644_vm5 = vcmask 1043456   ;;  %v5174_v43 = vmul.u32 6, %v13449_v51 }
 0xd1d   : > { %v5215_v13 = vadd.f32 %v5214_v26, %v5213_v9  ;;  %v5310_v63 = vsel %vm5220_vm12, %v5302_v42, 0.0  ;;  %vm13632_vm12 = vmmov %vm13630_vm7  ;;  %v8914_v26 = vld [vmem:[%s13129_s5 + $0xc0] ss:$8 sps:$4 sm:$0xff]   ;;  %v8917_v9 = vld [vmem:[%s13129_s5 + $0xd0] ss:$8 sps:$4 sm:$0xff]  }
 0xd1e   : > { %v5223_v46 = vadd.f32 %v5222_v34, %v5221_v31  ;;  %v5311_v12 = vrot.slane %v5310_v63, 4 }
 0xd1f   : > { %v5216_v10 = vrot.slane %v5215_v13, 2 }
 0xd20   : > { %v5224_v15 = vrot.slane %v5223_v46, 2  ;;  %v5312_v61 = vadd.f32 %v5311_v12, %v5310_v63 }
 0xd21   : > { %v5217_v50 = vadd.f32 %v5216_v10, %v5215_v13 }
 0xd22   : > { %v5225_v39 = vadd.f32 %v5224_v15, %v5223_v46  ;;  %v5313_v23 = vrot.slane %v5312_v61, 2  ;;  %v8938_v15 = vld [vmem:[%s13129_s5 + $0x140] ss:$8 sps:$4 sm:$0xff]  }
 0xd23   : > { %v5218_v19 = vrot.slane %v5217_v50, 1 }
 0xd24   : > { %v5226_v38 = vrot.slane %v5225_v39, 1  ;;  %v5314_v47 = vadd.f32 %v5313_v23, %v5312_v61  ;;  %v5188_v61 = vmul.u32 6, %v11916_v41 }
 0xd25   : > { %v5219_v57 = vadd.f32 %v5218_v19, %v5217_v50 }
 0xd26   : > { %v5227_v8 = vadd.f32 %v5226_v38, %v5225_v39  ;;  %v5315_v27 = vrot.slane %v5314_v47, 1  ;;  %v11897_v38 = vadd.s32 1, %v9155_v6 }
 0xd28   : > { %7665 = vmatprep.mubr.msk.f32.mxu0 %vm13630_vm7, %v5227_v8  ;;  %v5316_v11 = vadd.f32 %v5315_v27, %v5314_v47  ;;  %vm13636_vm7 = vnez %v13567_v48  ;;  %v5301_v8 = vmul.f32 %v11822_v0, %v11822_v0  ;;  %v5172_v47 = vmul.u32 6, %v9146_v3  ;;  %v8932_v48 = vld [vmem:[%s13129_s5 + $0x120] ss:$8 sps:$4 sm:$0xff]  }
 0xd29   : > { %5296 = vmatmul.mubr.f32.vlgmr.msra.gmra.mrb[56].mxu0 %v5219_v57  ;;  %vm13637_vm0 = vmpackc.low %vm11390_vm13, %vm13636_vm7  ;;  %vm13646_vm7 = vnez %v13602_v58  ;;  %v5187_v50 = vmul.u32 6, %v11897_v38 }
 0xd2a   : > { %8167 = vmatpush1.bf16.msk.msra.mxu0 %vm13631_vm10, %v13412_v1  ;;  %7690 = vmatprep.mubr.msk.f32.mxu0 %vm13632_vm12, %v5316_v11  ;;  %vm13639_vm10 = vnez %v13573_v40  ;;  %vm13643_vm13 = vmpackc.low %vm11473_vm1, %vm11468_vm11  ;;  %v5303_v57 = vsel %vm13644_vm5, %v5301_v8, 0.0  ;;  %vm13647_vm11 = vnez %v13600_v29  ;;  %vm13661_vm5 = vnez %v13614_v45  ;;  %v8922_v11 = vld [vmem:[%s13129_s5 + $0xe4] ss:$8 sps:$4 sm:$0xff]   ;;  %v8920_v8 = vld [vmem:[%s13129_s5 + $0xe0] ss:$8 sps:$4 sm:$0xff]  }
 0xd2b   : > { %8168 = vmatprep.subr.bf16.mxu0 %v13415_v44  ;;  %vm13640_vm12 = vmpackc.low %vm13638_vm2, %vm13639_vm10  ;;  %v5304_v27 = vrot.slane %v5303_v57, 4  ;;  %vm11906_vm2 = vcmp.ge.s32.totalorder %v10346_v36, %v5171_v55  ;;  %vm11911_vm10 = vcmp.lt.s32.totalorder %v10346_v36, %v5185_v4 }
 0xd2c   : > { %vm13648_vm1 = vmpackc.low %vm13646_vm7, %vm13647_vm11  ;;  %vm11949_vm11 = vcmp.ge.s32.totalorder %v9152_v5, %v5171_v55  ;;  %v8928_v55 = vld [vmem:[%s13129_s5 + $0x104] ss:$8 sps:$4 sm:$0xff]  }
 0xd2d   : > { %v5305_v21 = vadd.f32 %v5304_v27, %v5303_v57  ;;  %v8925_v57 = vld [vmem:[%s13129_s5 + $0xf4] ss:$8 sps:$4 sm:$0xff]   ;;  %v8923_v27 = vld [vmem:[%s13129_s5 + $0xf0] ss:$8 sps:$4 sm:$0xff]  }
 0xd2e   : > { %8170 = vmatpush1.bf16.msk.msra.mxu0 %vm13635_vm8, %v13412_v1  ;;  %vm13642_vm8 = vmpackc.low %vm11444_vm14, %vm13641_vm6  ;;  %vm11925_vm6 = vcmp.lt.s32.totalorder %v10346_v36, %v5186_v54 }
 0xd2f   : > { %8171 = vmatprep.subr.bf16.mxu0 %v13415_v44  ;;  %vm13645_vm14 = vmpackc.low %vm11506_vm3, %vm11501_vm4  ;;  %vm13649_vm4 = vnez %v13610_v35  ;;  %vm13650_vm3 = vnez %v13608_v49  ;;  %v5306_v23 = vrot.slane %v5305_v21, 2 }
 0xd31   : > { %v5307_v20 = vadd.f32 %v5306_v23, %v5305_v21  ;;  %v8931_v21 = vld [vmem:[%s13129_s5 + $0x114] ss:$8 sps:$4 sm:$0xff]  }
 0xd32   : > { %8173 = vmatpush1.bf16.msk.msra.mxu0 %vm13637_vm0, %v13412_v1  ;;  %vm13651_vm0 = vmpackc.low %vm13649_vm4, %vm13650_vm3  ;;  %vm11959_vm4 = vcmp.ge.s32.totalorder %v9152_v5, %v5172_v47  ;;  %vm11964_vm3 = vcmp.lt.s32.totalorder %v9152_v5, %v5186_v54  ;;  %v8934_v54 = vld [vmem:[%s13129_s5 + $0x124] ss:$8 sps:$4 sm:$0xff]   ;;  %v8937_v23 = vld [vmem:[%s13129_s5 + $0x134] ss:$8 sps:$4 sm:$0xff]  }
 0xd33   : > { %8174 = vmatprep.subr.bf16.mxu0 %v13415_v44  ;;  %v5308_v46 = vrot.slane %v5307_v20, 1 }
 0xd35   : > { %v5309_v63 = vadd.f32 %v5308_v46, %v5307_v20  ;;  %v8940_v20 = vld [vmem:[%s13129_s5 + $0x144] ss:$8 sps:$4 sm:$0xff]  }
 0xd36   : > { %8176 = vmatpush1.bf16.msk.msra.mxu0 %vm13640_vm12, %v13412_v1  ;;  %vm11920_vm12 = vcmp.ge.s32.totalorder %v10346_v36, %v5172_v47  ;;  %v8929_v47 = vld [vmem:[%s13129_s5 + $0x110] ss:$8 sps:$4 sm:$0xff]  }
 0xd37   : > { %8177 = vmatprep.subr.bf16.mxu0 %v13415_v44  ;;  %vm5200_vm7 = vmand %vm11920_vm12, %vm11925_vm6  ;;  %vm13677_vm12 = vnez %v13620_v7 }
 0xd38   : > { %vm13678_vm6 = vmpackc.low %vm11780_vm9, %vm13677_vm12 }
 0xd3a   : > { %8179 = vmatpush1.bf16.msk.msra.mxu0 %vm13642_vm8, %v13412_v1  ;;  %vm5198_vm8 = vmand %vm11906_vm2, %vm11911_vm10  ;;  %vm11973_vm2 = vcmp.ge.s32.totalorder %v10346_v36, %v5173_v14  ;;  %vm11978_vm10 = vcmp.lt.s32.totalorder %v10346_v36, %v5187_v50 }
 0xd3b   : > { %8180 = vmatprep.subr.bf16.mxu0 %v13415_v44  ;;  %vm5202_vm9 = vmand %vm11973_vm2, %vm11978_vm10  ;;  %vm5193_vm2 = vcmp.lt.s32.totalorder %v9152_v5, %v5187_v50  ;;  %vm5195_vm10 = vcmp.lt.s32.totalorder %v9152_v5, %v5188_v61 }
 0xd3e   : > { %8182 = vmatpush1.bf16.msk.msra.mxu0 %vm13643_vm13, %v13412_v1  ;;  %vm13660_vm13 = vnez %v13616_v22 }
 0xd3f   : > { %8183 = vmatprep.subr.bf16.mxu0 %v13415_v44 }
 0xd42   : > { %8185 = vmatpush1.bf16.msk.msra.mxu0 %vm13645_vm14, %v13412_v1  ;;  %vm13662_vm14 = vmpackc.low %vm13660_vm13, %vm13661_vm5  ;;  %vm5182_vm13 = vcmp.ge.s32.totalorder %v10346_v36, %v5174_v43  ;;  %vm5196_vm5 = vcmp.lt.s32.totalorder %v10346_v36, %v5188_v61 }
 0xd43   : > { %8186 = vmatprep.subr.bf16.mxu0 %v13415_v44 }
 0xd46   : > { %8188 = vmatpush1.bf16.msk.msra.mxu0 %vm13648_vm1, %v13412_v1  ;;  %vm11954_vm1 = vcmp.lt.s32.totalorder %v9152_v5, %v5185_v4  ;;  %v8926_v4 = vld [vmem:[%s13129_s5 + $0x100] ss:$8 sps:$4 sm:$0xff]  }
 0xd47   : > { %8189 = vmatprep.subr.bf16.mxu0 %v13415_v44 }
 0xd4a   : > { %8191 = vmatpush1.bf16.msk.msra.mxu0 %vm13651_vm0, %v13412_v1  ;;  %vm11968_vm0 = vmpackc.low %vm5200_vm7, %vm5198_vm8 }
 0xd4b   : > { %8192 = vmatprep.subr.bf16.mxu0 %v13415_v44  ;;  %vm5197_vm8 = vmand %vm11949_vm11, %vm11954_vm1  ;;  %vm13679_vm11 = vnez %v13626_v25  ;;  %v8916_v25 = vld [vmem:[%s13129_s5 + $0xc4] ss:$8 sps:$4 sm:$0xff]  }
 0xd4c   : > { %vm5204_vm7 = vmand %vm5182_vm13, %vm5196_vm5  ;;  %vm13685_vm5 = vcmask 261120   ;;  %5842 = vmatprep.subr.bf16.mxu1 %v8916_v25 }
 0xd4d   : > { %vm13680_vm1 = vmpackc.low %vm11807_vm15, %vm13679_vm11  ;;  %vm5179_vm15 = vcmp.ge.s32.totalorder %v9152_v5, %v5173_v14  ;;  %5843 = vmatpush1.bf16.msra.mxu1 %v8914_v26  ;;  %vm5573_vm11 = vcmask 31744  }
 0xd4e   : > { %8194 = vmatpush1.bf16.msk.msra.mxu0 %vm13662_vm14, %v13412_v1  ;;  %vm5199_vm14 = vmand %vm11959_vm4, %vm11964_vm3  ;;  %vm5181_vm3 = vcmp.ge.s32.totalorder %v9152_v5, %v5174_v43  ;;  %5844 = vmatprep.subr.bf16.mxu1 %v8919_v28  ;;  %v8935_v43 = vld [vmem:[%s13129_s5 + $0x130] ss:$8 sps:$4 sm:$0xff]  }
 0xd4f   : > { %8195 = vmatprep.subr.bf16.mxu0 %v13415_v44  ;;  %vm12012_vm12 = vmpackc.low %vm5199_vm14, %vm5197_vm8 }
 0xd50   : > { %vm12016_vm4 = vmpackc.low %vm5204_vm7, %vm5202_vm9  ;;  %vm13302_vm7 = vcmask 1041408  }
 0xd51   : > { %vm5203_vm8 = vmand %vm5181_vm3, %vm5195_vm10  ;;  %5845 = vmatpush1.bf16.msra.mxu1 %v8917_v9 }
 0xd52   : > { %8197 = vmatpush1.bf16.msk.msra.mxu0 %vm13678_vm6, %v13412_v1  ;;  %vm5201_vm6 = vmand %vm5179_vm15, %vm5193_vm2  ;;  %5846 = vmatprep.subr.bf16.mxu1 %v8922_v11  ;;  %v8950_v11 = vld [vmem:[%s13129_s5] ss:$8 sps:$4 sm:$0xff]  }
 0xd53   : > { %8198 = vmatprep.subr.bf16.mxu0 %v13415_v44  ;;  %vm8207_vm13 = vmpackc.low %vm5203_vm8, %vm5201_vm6 }
 0xd55   : > { %5847 = vmatpush1.bf16.msra.mxu1 %v8920_v8 }
 0xd56   : > { %8200 = vmatpush1.bf16.msk.msra.mxu0 %vm13680_vm1, %v13412_v1  ;;  %5848 = vmatprep.subr.bf16.mxu1 %v8925_v57  ;;  %vm13689_vm1 = vcmask 523264  }
 0xd57   : > { %8202 = vmatprep.subr.msk.bf16.mxu0 %vm11968_vm0, %v13412_v1 }
 0xd59   : > { %5385 = vmatmul.mubr.f32.vlgmr.msra.gmra.mrb[58].mxu0 %v5309_v63  ;;  %5849 = vmatpush1.bf16.msra.mxu1 %v8923_v27  ;;  %v8955_v27 = vld [vmem:[%s13129_s5 + $0x14] ss:$8 sps:$4 sm:$0xff]  }
 0xd5a   : > { %8204 = vmatpush1.bf16.msk.msra.mxu0 %vm12012_vm12, %v13412_v1  ;;  %5464 = vmatprep.mubr.f32.mxu0 %v13439_v32 }
 0xd5b   : > { %8206 = vmatprep.subr.msk.bf16.mxu0 %vm12016_vm4, %v13412_v1  ;;  %5850 = vmatprep.subr.bf16.mxu1 %v8928_v55 }
 0xd5d   : > { %5851 = vmatpush1.bf16.msra.mxu1 %v8926_v4  ;;  %v8953_v4 = vld [vmem:[%s13129_s5 + $0x10] ss:$8 sps:$4 sm:$0xff]  }
 0xd5e   : > { %8208 = vmatpush1.bf16.msk.msra.mxu0 %vm8207_vm13, %v13412_v1  ;;  %5852 = vmatprep.subr.bf16.mxu1 %v8931_v21  ;;  %v8958_v21 = vld [vmem:[%s13129_s5 + $0x24] ss:$8 sps:$4 sm:$0xff]  }
 0xd5f   : > { %8210 = vmatprep.subr.msk.bf16.mxu0 %vm11968_vm0, %v13412_v1  ;;  %vm13686_vm0 = vmmov %vm13685_vm5 }
 0xd61   : > { %5853 = vmatpush1.bf16.msra.mxu1 %v8929_v47 }
 0xd62   : > { %5854 = vmatprep.subr.bf16.mxu1 %v8934_v54 }
 0xd65   : > { %5855 = vmatpush1.bf16.msra.mxu1 %v8932_v48  ;;  %v8956_v48 = vld [vmem:[%s13129_s5 + $0x20] ss:$8 sps:$4 sm:$0xff]  }
 0xd66   : > { %5856 = vmatprep.subr.bf16.mxu1 %v8937_v23  ;;  %v8961_v23 = vld [vmem:[%s13129_s5 + $0x34] ss:$8 sps:$4 sm:$0xff]  }
 0xd69   : > { %5857 = vmatpush1.bf16.msra.mxu1 %v8935_v43 }
 0xd6a   : > { %5858 = vmatprep.subr.bf16.mxu1 %v8940_v20 }
 0xd6d   : > { %5859 = vmatpush1.bf16.msra.mxu1 %v8938_v15  ;;  %v8967_v15 = vld [vmem:[%s13129_s5 + $0x54] ss:$8 sps:$4 sm:$0xff]  }
 0xdfc   : > { %v5297_v13 = vpop.f32.mrb[56].mxu0 }
 0xdfd   : > { %v5390_v59 = vmul.f32 0.041666668, %v5297_v13  ;;  %v5299_v49 = vpop.f32.mrb[57].mxu0 }
 0xdfe   : > { %v8943_v49 = vld [vmem:[%s13129_s5 + $0x154] ss:$8 sps:$4 sm:$0xff]  }
 0xdff   : > { %7699 = vmatmul.mubr.msk.f32.vlgmr.msra.gmra.mrb[60].mxu0 %vm13685_vm5, %v5390_v59  ;;  %v5392_v34 = vmul.f32 %v5390_v59, %v5390_v59  ;;  %v13687_v59 = vld [vmem:[#allocation26_spill] sm:$0xff]  ;;  %5860 = vmatprep.subr.bf16.mxu1 %v8943_v49  ;;  %v13702_v49 = vmov 0 }
 0xe00   : > { %8212 = vmatpush1.bf16.msk.msra.mxu0 %vm12012_vm12, %v13412_v1  ;;  %5538 = vmatprep.mubr.f32.mxu0 %v13439_v32  ;;  %vm13690_vm12 = vmmov %vm13689_vm1 }
 0xe01   : > { %8214 = vmatprep.subr.msk.bf16.mxu0 %vm12016_vm4, %v13412_v1 }
 0xe04   : > { %8216 = vmatpush1.bf16.msk.msra.mxu0 %vm8207_vm13, %v13412_v1 }
 0xe2c   : > { %v5386_v35 = vpop.f32.mrb[58].mxu0 }
 0xe2d   : > { %v5391_v45 = vmul.f32 0.041666668, %v5386_v35  ;;  %v5388_v22 = vpop.f32.mrb[59].mxu0  ;;  %v8944_v35 = vld [vmem:[%s13129_s5 + $0x160] ss:$8 sps:$4 sm:$0xff]  }
 0xe2e   : > { %v8952_v22 = vld [vmem:[%s13129_s5 + $0x4] ss:$8 sps:$4 sm:$0xff]  }
 0xe2f   : > { %v5393_v42 = vsub.f32 %v5391_v45, %v5392_v34  ;;  %v8949_v34 = vld [vmem:[%s13129_s5 + $0x174] ss:$8 sps:$4 sm:$0xff]   ;;  %v8947_v45 = vld [vmem:[%s13129_s5 + $0x170] ss:$8 sps:$4 sm:$0xff]  }
 0xe31   : > { %v5394_v31 = vmax.f32 %v5393_v42, 0.0 }
 0xe33   : > { %v5395_v7 = vadd.f32 1e-05, %v5394_v31 }
 0xe35   : > { %9062 = vrsqrt.f32 %v5395_v7 }
 0xe3f   : > { %v9063_v30 = vpop.eup %9062 }
 0xe40   : > { %7708 = vmatmul.mubr.msk.f32.vlgmr.msra.gmra.mrb[62].mxu0 %vm13686_vm0, %v9063_v30 }
 0xe41   : > { %5615 = vmatprep.mubr.bf16.mxu0 %v13440_v37 }
 0xed2   : > { %v5466_v19 = vpop.f32.mrb[60].mxu0 }
 0xed3   : > { %v5548_v40 = vrot.slane %v5466_v19, %v9483_v17  ;;  %v5468_v39 = vpop.f32.mrb[61].mxu0 }
 0xed4   : > { %v5552_v14 = vrot.slane %v5468_v39, %v9483_v17  ;;  %v8959_v39 = vld [vmem:[%s13129_s5 + $0x30] ss:$8 sps:$4 sm:$0xff]  }
 0xed5   : > { %v5553_v50 = vsub.f32 %v11822_v0, %v5548_v40 }
 0xed6   : > { %v5554_v61 = vsub.f32 %v11826_v62, %v5552_v14  ;;  %v8964_v14 = vld [vmem:[%s13129_s5 + $0x44] ss:$8 sps:$4 sm:$0xff]  }
 0xf13   : > { %v5540_v0 = vpop.f32.mrb[62].mxu0 }
 0xf14   : > { %v5558_v53 = vrot.slane %v5540_v0, %v9483_v17  ;;  %v5542_v18 = vpop.f32.mrb[63].mxu0 }
 0xf15   : > { %v5562_v10 = vrot.slane %v5542_v18, %v9483_v17  ;;  %v13691_v18 = vld [vmem:[#allocation5_spill] sm:$0xff] }
 0xf16   : > { %v5563_v12 = vmul.f32 %v5558_v53, %v5553_v50  ;;  %v12183_v53 = vmul.u32 3, %v9152_v5 }
 0xf17   : > { %v5564_v62 = vmul.f32 %v5562_v10, %v5554_v61  ;;  %v8962_v61 = vld [vmem:[%s13129_s5 + $0x40] ss:$8 sps:$4 sm:$0xff]   ;;  %v12186_v10 = vmul.u32 3, %v13691_v18 }
 0xf18   : > { %vm5565_vm14 = vcmp.gt.f32.partialorder %v5563_v12, 0.0  ;;  %v5567_v52 = vmul.f32 0.2, %v5563_v12  ;;  %vm6518_vm4 = vcmp.ge.s32.totalorder %v9142_v2, %v12183_v53  ;;  %vm6519_vm15 = vcmp.ge.s32.totalorder %v9146_v3, %v12183_v53  ;;  %v8986_v18 = vld [vmem:[%s13129_s5 + $0x180] ss:$8 sps:$4 sm:$0xff]  }
 0xf19   : > { %vm5566_vm9 = vcmp.gt.f32.partialorder %v5564_v62, 0.0  ;;  %v5568_v24 = vmul.f32 0.2, %v5564_v62  ;;  %vm6543_vm3 = vcmp.lt.s32.totalorder %v9142_v2, %v12186_v10  ;;  %vm6544_vm2 = vcmp.lt.s32.totalorder %v9146_v3, %v12186_v10 }
 0xf1a   : > { %v5569_v46 = vsel %vm5565_vm14, %v5563_v12, %v5567_v52  ;;  %v8965_v12 = vld [vmem:[%s13129_s5 + $0x50] ss:$8 sps:$4 sm:$0xff]   ;;  %vm12202_vm10 = vmand %vm6518_vm4, %vm6543_vm3  ;;  %vm6520_vm6 = vcmp.ge.s32.totalorder %v9155_v6, %v12183_v53  ;;  %vm6545_vm8 = vcmp.lt.s32.totalorder %v9155_v6, %v12186_v10  ;;  %vm6521_vm5 = vcmp.ge.s32.totalorder %v13449_v51, %v12183_v53 }
 0xf1b   : > { %v5570_v63 = vsel %vm5566_vm9, %v5564_v62, %v5568_v24  ;;  %v5571_v29 = vpack.c.bf16 %v5569_v46, %v5569_v46  ;;  %v8970_v62 = vld [vmem:[%s13129_s5 + $0x64] ss:$8 sps:$4 sm:$0xff]   ;;  %vm12210_vm13 = vmand %vm6519_vm15, %vm6544_vm2  ;;  %vm6546_vm0 = vcmp.lt.s32.totalorder %v13449_v51, %v12186_v10  ;;  %v8968_v46 = vld [vmem:[%s13129_s5 + $0x60] ss:$8 sps:$4 sm:$0xff]   ;;  %v6615_v24 = vmul.u32 3, %v9142_v2 }
 0xf1c   : > { %v5572_v58 = vpack.c.bf16 %v5570_v63, %v5570_v63  ;;  %vm13300_vm14 = vmpackc.low %vm12210_vm13, %vm12202_vm10  ;;  %v8973_v63 = vld [vmem:[%s13129_s5 + $0x74] ss:$8 sps:$4 sm:$0xff]  }
 0xf1d   : > { %v5578_v13 = vsel %vm13302_vm7, %v5571_v29, 0  ;;  %vm12234_vm9 = vmand %vm6520_vm6, %vm6545_vm8  ;;  %v13696_v29 = vmov 0 }
 0xf1e   : > { %7709 = vmatprep.subr.msk.bf16.mxu0 %vm13302_vm7, %v5572_v58  ;;  %v13697_v29 = vsel %vm12234_vm9, 4294967295, %v13696_v29 }
 0xf1f   : > { %5584 = vmatpush1.bf16.msra.mxu0 %v5578_v13 }
 0xf20   : > { %7711 = vmatprep.subr.msk.bf16.mxu0 %vm13302_vm7, %v5572_v58 }
 0xf22   : > { %7710 = vmatmul.mubr.msk.bf16.vlgmr.msra.gmra.mrb[64].mxu0 %vm5573_vm11, %v10368_v60  ;;  %v13688_v60 = vld [vmem:[#allocation27_spill] sm:$0xff] }
 0xf23   : > { %5653 = vmatpush1.bf16.msra.mxu0 %v5578_v13  ;;  %5684 = vmatprep.mubr.bf16.mxu0 %v13440_v37 }
 0xf24   : > { %7763 = vmatprep.subr.msk.bf16.mxu0 %vm13302_vm7, %v5572_v58 }
 0xf2a   : > { %7712 = vmatmul.mubr.msk.bf16.vlgmr.msra.gmra.mrb[68].mxu0 %vm5573_vm11, %v10386_v16  ;;  %v8941_v16 = vld [vmem:[%s13129_s5 + $0x150] ss:$8 sps:$4 sm:$0xff]  }
 0xf2b   : > { %6050 = vmatpush1.bf16.msra.mxu0 %v5578_v13  ;;  %6081 = vmatprep.mubr.bf16.mxu0 %v13440_v37 }
 0xf2c   : > { %7790 = vmatprep.subr.msk.bf16.mxu0 %vm13302_vm7, %v5572_v58  ;;  %5861 = vmatpush1.bf16.msra.mxu1 %v8941_v16  ;;  %v13698_v58 = vld [vmem:[#allocation6_spill] sm:$0xff]  ;;  %v13704_v16 = vld [vmem:[#allocation8_spill] sm:$0xff] }
 0xf2d   : > { %vm6524_vm6 = vcmp.ge.s32.totalorder %v13704_v16, %v12183_v53  ;;  %vm6549_vm8 = vcmp.lt.s32.totalorder %v13704_v16, %v12186_v10 }
 0xf32   : > { %7764 = vmatmul.mubr.msk.bf16.vlgmr.msra.gmra.mrb[72].mxu0 %vm5573_vm11, %v13687_v59  ;;  %v13701_v59 = vld [vmem:[#allocation7_spill] sm:$0xff] }
 0xf33   : > { %6285 = vmatpush1.bf16.msra.mxu0 %v5578_v13  ;;  %6316 = vmatprep.mubr.bf16.mxu0 %v13440_v37  ;;  %v8946_v37 = vld [vmem:[%s13129_s5 + $0x164] ss:$8 sps:$4 sm:$0xff]   ;;  %v13699_v13 = vmov 0  ;;  %vm6523_vm4 = vcmp.ge.s32.totalorder %v13701_v59, %v12183_v53  ;;  %vm6548_vm15 = vcmp.lt.s32.totalorder %v13701_v59, %v12186_v10 }
 0xf34   : > { %8217 = vmatprep.subr.bf16.mxu0 %v13415_v44  ;;  %5862 = vmatprep.subr.bf16.mxu1 %v8946_v37 }
 0xf35   : > { %5863 = vmatpush1.bf16.msra.mxu1 %v8944_v35  ;;  %v8976_v35 = vld [vmem:[%s13129_s5 + $0x84] ss:$8 sps:$4 sm:$0xff]  }
 0xf36   : > { %5864 = vmatprep.subr.bf16.mxu1 %v8949_v34  ;;  %v13707_v34 = vld [vmem:[#allocation9_spill] sm:$0xff] }
 0xf39   : > { %5865 = vmatpush1.bf16.msra.mxu1 %v8947_v45  ;;  %v13708_v45 = vmov 0 }
 0xf3a   : > { %7791 = vmatmul.mubr.msk.bf16.vlgmr.msra.gmra.mrb[76].mxu0 %vm5573_vm11, %v13688_v60  ;;  %6006 = vmatprep.subr.bf16.mxu1 %v8952_v22  ;;  %vm6522_vm11 = vcmp.ge.s32.totalorder %v13698_v58, %v12183_v53  ;;  %v8971_v60 = vld [vmem:[%s13129_s5 + $0x70] ss:$8 sps:$4 sm:$0xff]  }
 0xf3b   : > { %8219 = vmatpush1.bf16.msk.msra.mxu0 %vm13300_vm14, %v13412_v1  ;;  %vm12288_vm14 = vmand %vm6524_vm6, %vm6549_vm8  ;;  %v13710_v22 = vld [vmem:[#allocation10_spill] sm:$0xff] }
 0xf3c   : > { %8220 = vmatprep.subr.bf16.mxu0 %v13415_v44  ;;  %v13709_v45 = vsel %vm12288_vm14, 4294967295, %v13708_v45 }
 0xff5   : > { %v12140_v42 = vpop.f32.mrb[64].mxu0 }
 0xff6   : > { %v5619_v31 = vpop.f32.mrb[65].mxu0 }
 0xff7   : > { %v5621_v7 = vpop.f32.mrb[66].mxu0  ;;  %v5625_v55 = vpack.c.bf16 %v5619_v31, %v5619_v31  ;;  %v8974_v31 = vld [vmem:[%s13129_s5 + $0x80] ss:$8 sps:$4 sm:$0xff]  }
 0xff8   : > { %v5622_v30 = vpop.f32.mrb[67].mxu0  ;;  %v13711_v7 = vmov 0 }
 0xff9   : > { %v13713_v30 = vld [vmem:[#allocation11_spill] sm:$0xff] }
 0xffa   : > { %vm6527_vm6 = vcmp.ge.s32.totalorder %v13713_v30, %v12183_v53  ;;  %vm6552_vm8 = vcmp.lt.s32.totalorder %v13713_v30, %v12186_v10  ;;  %v9003_v30 = vld [vmem:[%s13129_s5 + $0x1d4] ss:$8 sps:$4 sm:$0xff]  }
 0xffd   : > { %v5686_v26 = vpop.f32.mrb[68].mxu0 }
 0xffe   : > { %v5688_v25 = vpop.f32.mrb[69].mxu0  ;;  %v5693_v8 = vpack.c.bf16 %v5686_v26, %v5686_v26  ;;  %v8979_v26 = vld [vmem:[%s13129_s5 + $0x94] ss:$8 sps:$4 sm:$0xff]  }
 0xfff   : > { %v5694_v28 = vpack.c.bf16 %v5688_v25, %v5688_v25  ;;  %v5690_v9 = vpop.f32.mrb[70].mxu0  ;;  %v13714_v25 = vmov 0 }
0x1000   : > { %v5691_v57 = vpop.f32.mrb[71].mxu0  ;;  %v6617_v9 = vmul.u32 3, %v9155_v6  ;;  %v6645_v6 = vmul.u32 3, %v11897_v38 }
0x1001   : > { %7737 = vmatprep.mubr.msk.bf16.mxu1 %vm13689_vm1, %v5694_v28  ;;  %vm6547_vm1 = vcmp.lt.s32.totalorder %v13698_v58, %v12186_v10  ;;  %v13716_v28 = vld [vmem:[#allocation12_spill] sm:$0xff] }
0x1002   : > { %5875 = vmatmul.mubr.bf16.vlgmr.msra.gmra.mrb[44].mxu1 %v5693_v8  ;;  %vm12258_vm2 = vmand %vm6522_vm11, %vm6547_vm1  ;;  %vm6550_vm11 = vcmp.lt.s32.totalorder %v13707_v34, %v12186_v10  ;;  %vm6528_vm7 = vcmp.ge.s32.totalorder %v13716_v28, %v12183_v53  ;;  %v8977_v8 = vld [vmem:[%s13129_s5 + $0x90] ss:$8 sps:$4 sm:$0xff]   ;;  %v8982_v57 = vld [vmem:[%s13129_s5 + $0xa4] ss:$8 sps:$4 sm:$0xff]  }
0x1003   : > { %6007 = vmatpush1.bf16.msra.mxu1 %v8950_v11  ;;  %7762 = vmatprep.mubr.msk.bf16.mxu1 %vm13690_vm12, %v5625_v55  ;;  %vm12243_vm12 = vmand %vm6521_vm5, %vm6546_vm0  ;;  %v13703_v49 = vsel %vm12258_vm2, 4294967295, %v13702_v49  ;;  %vm6525_vm0 = vcmp.ge.s32.totalorder %v13707_v34, %v12183_v53  ;;  %v13719_v11 = vld [vmem:[#allocation13_spill] sm:$0xff]  ;;  %v6618_v55 = vmul.u32 3, %v13449_v51 }
0x1004   : > { %6008 = vmatprep.subr.bf16.mxu1 %v8955_v27  ;;  %v13700_v13 = vsel %vm12243_vm12, 4294967295, %v13699_v13  ;;  %vm13301_vm3 = vmpackc.low %vm12243_vm12, %vm12234_vm9  ;;  %vm6553_vm9 = vcmp.lt.s32.totalorder %v13716_v28, %v12186_v10  ;;  %v9006_v28 = vld [vmem:[%s13129_s5 + $0x1e4] ss:$8 sps:$4 sm:$0xff]  }
0x1005   : > { %v12156_v47 = vpop.f32.mrb[72].mxu0  ;;  %8222 = vmatpush1.bf16.msk.msra.mxu0 %vm13301_vm3, %v13412_v1  ;;  %vm12275_vm5 = vmand %vm6523_vm4, %vm6548_vm15  ;;  %vm6526_vm4 = vcmp.ge.s32.totalorder %v13710_v22, %v12183_v53  ;;  %vm6551_vm15 = vcmp.lt.s32.totalorder %v13710_v22, %v12186_v10  ;;  %v9000_v22 = vld [vmem:[%s13129_s5 + $0x1c4] ss:$8 sps:$4 sm:$0xff]  }
0x1006   : > { %v12158_v54 = vpop.f32.mrb[73].mxu0  ;;  %8223 = vmatprep.subr.bf16.mxu0 %v13415_v44  ;;  %vm13305_vm1 = vmpackc.low %vm12275_vm5, %vm12258_vm2 }
0x1007   : > { %6009 = vmatpush1.bf16.msra.mxu1 %v8953_v4  ;;  %v6087_v19 = vpop.f32.mrb[74].mxu0  ;;  %vm12299_vm3 = vmand %vm6525_vm0, %vm6550_vm11  ;;  %vm6554_vm0 = vcmp.lt.s32.totalorder %v13719_v11, %v12186_v10  ;;  %v13725_v4 = vld [vmem:[#allocation14_spill] sm:$0xff] }
0x1008   : > { %6010 = vmatprep.subr.bf16.mxu1 %v8958_v21  ;;  %v6088_v40 = vpop.f32.mrb[75].mxu0  ;;  %v13712_v7 = vsel %vm12299_vm3, 4294967295, %v13711_v7  ;;  %vm12321_vm11 = vmand %vm6526_vm4, %vm6551_vm15  ;;  %vm6530_vm4 = vcmp.ge.s32.totalorder %v13725_v4, %v12183_v53  ;;  %vm6555_vm2 = vcmp.lt.s32.totalorder %v13725_v4, %v12186_v10  ;;  %v13726_v21 = vld [vmem:[#allocation15_spill] sm:$0xff]  ;;  %v8985_v19 = vld [vmem:[%s13129_s5 + $0xb4] ss:$8 sps:$4 sm:$0xff]  }
0x1009   : > { %8225 = vmatpush1.bf16.msk.msra.mxu0 %vm13305_vm1, %v13412_v1  ;;  %v13715_v25 = vsel %vm12321_vm11, 4294967295, %v13714_v25  ;;  %vm12329_vm12 = vmand %vm6527_vm6, %vm6552_vm8  ;;  %vm6529_vm1 = vcmp.ge.s32.totalorder %v13719_v11, %v12183_v53  ;;  %v9004_v11 = vld [vmem:[%s13129_s5 + $0x1e0] ss:$8 sps:$4 sm:$0xff]   ;;  %v9012_v4 = vld [vmem:[%s13129_s5 + $0x204] ss:$8 sps:$4 sm:$0xff]  }
0x100a   : > { %8226 = vmatprep.subr.bf16.mxu0 %v13415_v44  ;;  %vm13720_vm15 = vmpackc.low %vm12299_vm3, %vm12288_vm14  ;;  %vm6531_vm14 = vcmp.ge.s32.totalorder %v13726_v21, %v12183_v53 }
0x100b   : > { %6011 = vmatpush1.bf16.msra.mxu1 %v8956_v48  ;;  %vm12353_vm6 = vmand %vm6528_vm7, %vm6553_vm9  ;;  %vm6556_vm7 = vcmp.lt.s32.totalorder %v13726_v21, %v12186_v10  ;;  %v8980_v48 = vld [vmem:[%s13129_s5 + $0xa0] ss:$8 sps:$4 sm:$0xff]  }
0x100c   : > { %6012 = vmatprep.subr.bf16.mxu1 %v8961_v23  ;;  %vm12358_vm8 = vmand %vm6529_vm1, %vm6554_vm0  ;;  %v9010_v21 = vld [vmem:[%s13129_s5 + $0x200] ss:$8 sps:$4 sm:$0xff]   ;;  %v6639_v23 = vadd.s32 1, %v13698_v58 }
0x100d   : > { %v12172_v50 = vpop.f32.mrb[76].mxu0  ;;  %8228 = vmatpush1.bf16.msk.msra.mxu0 %vm13720_vm15, %v13412_v1  ;;  %vm13727_vm1 = vmpackc.low %vm12329_vm12, %vm12321_vm11 }
0x100e   : > { %v12174_v43 = vpop.f32.mrb[77].mxu0  ;;  %8229 = vmatprep.subr.bf16.mxu0 %v13415_v44  ;;  %vm12386_vm0 = vmand %vm6530_vm4, %vm6555_vm2 }
0x100f   : > { %6013 = vmatpush1.bf16.msra.mxu1 %v8959_v39  ;;  %v6322_v20 = vpop.f32.mrb[78].mxu0  ;;  %vm12391_vm15 = vmand %vm6531_vm14, %vm6556_vm7  ;;  %v13732_v39 = vld [vmem:[#allocation16_spill] sm:$0xff] }
0x1010   : > { %6014 = vmatprep.subr.bf16.mxu1 %v8964_v14  ;;  %v6323_v0 = vpop.f32.mrb[79].mxu0  ;;  %vm6532_vm9 = vcmp.ge.s32.totalorder %v13732_v39, %v12183_v53  ;;  %vm6557_vm3 = vcmp.lt.s32.totalorder %v13732_v39, %v12186_v10  ;;  %v8983_v14 = vld [vmem:[%s13129_s5 + $0xb0] ss:$8 sps:$4 sm:$0xff]   ;;  %v8988_v20 = vld [vmem:[%s13129_s5 + $0x184] ss:$8 sps:$4 sm:$0xff]   ;;  %vm13734_vm4 = vmpackc.low %vm12358_vm8, %vm12353_vm6 }
0x1011   : > { %8231 = vmatpush1.bf16.msk.msra.mxu0 %vm13727_vm1, %v13412_v1  ;;  %vm13311_vm7 = vmpackc.low %vm12391_vm15, %vm12386_vm0  ;;  %v13737_v0 = vmov 0  ;;  %v9018_v39 = vld [vmem:[%s13129_s5 + $0x224] ss:$8 sps:$4 sm:$0xff]  }
0x1012   : > { %8232 = vmatprep.subr.bf16.mxu0 %v13415_v44  ;;  %vm12420_vm1 = vmand %vm6532_vm9, %vm6557_vm3  ;;  %vm13739_vm9 = vcmask 523264  }
0x1013   : > { %6015 = vmatpush1.bf16.msra.mxu1 %v8962_v61  ;;  %v13733_v61 = vld [vmem:[#allocation17_spill] sm:$0xff] }
0x1014   : > { %6016 = vmatprep.subr.bf16.mxu1 %v8967_v15  ;;  %vm6533_vm2 = vcmp.ge.s32.totalorder %v13733_v61, %v12183_v53  ;;  %vm6558_vm14 = vcmp.lt.s32.totalorder %v13733_v61, %v12186_v10  ;;  %v13735_v15 = vmov 0  ;;  %v9021_v61 = vld [vmem:[%s13129_s5 + $0x234] ss:$8 sps:$4 sm:$0xff]  }
0x1015   : > { %8234 = vmatpush1.bf16.msk.msra.mxu0 %vm13734_vm4, %v13412_v1  ;;  %v13736_v15 = vsel %vm12420_vm1, 4294967295, %v13735_v15  ;;  %vm12424_vm11 = vmand %vm6533_vm2, %vm6558_vm14 }
0x1016   : > { %8235 = vmatprep.subr.bf16.mxu0 %v13415_v44  ;;  %v13738_v0 = vsel %vm12424_vm11, 4294967295, %v13737_v0  ;;  %vm13310_vm3 = vmpackc.low %vm12424_vm11, %vm12420_vm1 }
0x1017   : > { %6017 = vmatpush1.bf16.msra.mxu1 %v8965_v12  ;;  %v6091_v12 = vpack.c.bf16 %v12158_v54, %v12158_v54  ;;  %v8994_v54 = vld [vmem:[%s13129_s5 + $0x1a4] ss:$8 sps:$4 sm:$0xff]   ;;  %vm13740_vm2 = vmmov %vm13739_vm9 }
0x1018   : > { %6018 = vmatprep.subr.bf16.mxu1 %v8970_v62  ;;  %v5624_v62 = vpack.c.bf16 %v12140_v42, %v12140_v42  ;;  %v8989_v42 = vld [vmem:[%s13129_s5 + $0x190] ss:$8 sps:$4 sm:$0xff]  }
0x1019   : > { %8237 = vmatpush1.bf16.msk.msra.mxu0 %vm13311_vm7, %v13412_v1 }
0x101a   : > { %8238 = vmatprep.subr.bf16.mxu0 %v13415_v44 }
0x101b   : > { %6019 = vmatpush1.bf16.msra.mxu1 %v8968_v46  ;;  %v8991_v46 = vld [vmem:[%s13129_s5 + $0x194] ss:$8 sps:$4 sm:$0xff]  }
0x101c   : > { %6020 = vmatprep.subr.bf16.mxu1 %v8973_v63  ;;  %v8992_v63 = vld [vmem:[%s13129_s5 + $0x1a0] ss:$8 sps:$4 sm:$0xff]  }
0x101d   : > { %8240 = vmatpush1.bf16.msk.msra.mxu0 %vm13310_vm3, %v13412_v1 }
0x101e   : > { %8241 = vmatprep.subr.bf16.mxu0 %v13415_v44 }
0x101f   : > { %6021 = vmatpush1.bf16.msra.mxu1 %v8971_v60  ;;  %v8997_v60 = vld [vmem:[%s13129_s5 + $0x1b4] ss:$8 sps:$4 sm:$0xff]  }
0x1020   : > { %6022 = vmatprep.subr.bf16.mxu1 %v8976_v35  ;;  %v8995_v35 = vld [vmem:[%s13129_s5 + $0x1b0] ss:$8 sps:$4 sm:$0xff]  }
0x1023   : > { %6023 = vmatpush1.bf16.msra.mxu1 %v8974_v31  ;;  %v8998_v31 = vld [vmem:[%s13129_s5 + $0x1c0] ss:$8 sps:$4 sm:$0xff]  }
0x1024   : > { %6024 = vmatprep.subr.bf16.mxu1 %v8979_v26  ;;  %v9001_v26 = vld [vmem:[%s13129_s5 + $0x1d0] ss:$8 sps:$4 sm:$0xff]  }
0x1027   : > { %6025 = vmatpush1.bf16.msra.mxu1 %v8977_v8  ;;  %v9009_v8 = vld [vmem:[%s13129_s5 + $0x1f4] ss:$8 sps:$4 sm:$0xff]  }
0x1028   : > { %6026 = vmatprep.subr.bf16.mxu1 %v8982_v57  ;;  %v9007_v57 = vld [vmem:[%s13129_s5 + $0x1f0] ss:$8 sps:$4 sm:$0xff]  }
0x102b   : > { %6027 = vmatpush1.bf16.msra.mxu1 %v8980_v48  ;;  %v9015_v48 = vld [vmem:[%s13129_s5 + $0x214] ss:$8 sps:$4 sm:$0xff]  }
0x102c   : > { %6028 = vmatprep.subr.bf16.mxu1 %v8985_v19  ;;  %v9013_v19 = vld [vmem:[%s13129_s5 + $0x210] ss:$8 sps:$4 sm:$0xff]  }
0x102f   : > { %6029 = vmatpush1.bf16.msra.mxu1 %v8983_v14  ;;  %v9016_v14 = vld [vmem:[%s13129_s5 + $0x220] ss:$8 sps:$4 sm:$0xff]  }
0x1030   : > { %6239 = vmatprep.subr.bf16.mxu1 %v8988_v20  ;;  %v9019_v20 = vld [vmem:[%s13129_s5 + $0x230] ss:$8 sps:$4 sm:$0xff]  }
0x1032   : > { %6039 = vmatmul.mubr.bf16.vlgmr.msra.gmra.mrb[44].mxu1 %v5624_v62  ;;  %v9022_v62 = vld [vmem:[%s13129_s5 + $0x240] ss:$8 sps:$4 sm:$0xff]  }
0x1033   : > { %6240 = vmatpush1.bf16.msra.mxu1 %v8986_v18  ;;  %7789 = vmatprep.mubr.msk.bf16.mxu1 %vm13739_vm9, %v6091_v12  ;;  %v9024_v18 = vld [vmem:[%s13129_s5 + $0x244] ss:$8 sps:$4 sm:$0xff]   ;;  %v6090_v12 = vpack.c.bf16 %v12156_v47, %v12156_v47 }
0x1034   : > { %6241 = vmatprep.subr.bf16.mxu1 %v8991_v46  ;;  %v6326_v46 = vpack.c.bf16 %v12174_v43, %v12174_v43  ;;  %v9030_v47 = vld [vmem:[%s13129_s5 + $0x264] ss:$8 sps:$4 sm:$0xff]   ;;  %v9028_v43 = vld [vmem:[%s13129_s5 + $0x260] ss:$8 sps:$4 sm:$0xff]  }
0x1037   : > { %6242 = vmatpush1.bf16.msra.mxu1 %v8989_v42  ;;  %v9027_v42 = vld [vmem:[%s13129_s5 + $0x254] ss:$8 sps:$4 sm:$0xff]  }
0x1038   : > { %6243 = vmatprep.subr.bf16.mxu1 %v8994_v54  ;;  %v9025_v54 = vld [vmem:[%s13129_s5 + $0x250] ss:$8 sps:$4 sm:$0xff]  }
0x103b   : > { %6244 = vmatpush1.bf16.msra.mxu1 %v8992_v63  ;;  %v9033_v63 = vld [vmem:[%s13129_s5 + $0x274] ss:$8 sps:$4 sm:$0xff]  }
0x103c   : > { %6245 = vmatprep.subr.bf16.mxu1 %v8997_v60  ;;  %v9031_v60 = vld [vmem:[%s13129_s5 + $0x270] ss:$8 sps:$4 sm:$0xff]  }
0x103f   : > { %6246 = vmatpush1.bf16.msra.mxu1 %v8995_v35  ;;  %v9036_v35 = vld [vmem:[%s13129_s5 + $0x284] ss:$8 sps:$4 sm:$0xff]  }
0x1040   : > { %6247 = vmatprep.subr.bf16.mxu1 %v9000_v22  ;;  %v9034_v22 = vld [vmem:[%s13129_s5 + $0x280] ss:$8 sps:$4 sm:$0xff]  }
0x1043   : > { %6248 = vmatpush1.bf16.msra.mxu1 %v8998_v31  ;;  %v9039_v31 = vld [vmem:[%s13129_s5 + $0x294] ss:$8 sps:$4 sm:$0xff]  }
0x1044   : > { %6249 = vmatprep.subr.bf16.mxu1 %v9003_v30  ;;  %v9037_v30 = vld [vmem:[%s13129_s5 + $0x290] ss:$8 sps:$4 sm:$0xff]  }
0x1047   : > { %6250 = vmatpush1.bf16.msra.mxu1 %v9001_v26  ;;  %v9042_v26 = vld [vmem:[%s13129_s5 + $0x2a4] ss:$8 sps:$4 sm:$0xff]  }
0x1048   : > { %6251 = vmatprep.subr.bf16.mxu1 %v9006_v28  ;;  %v9040_v28 = vld [vmem:[%s13129_s5 + $0x2a0] ss:$8 sps:$4 sm:$0xff]  }
0x104b   : > { %6252 = vmatpush1.bf16.msra.mxu1 %v9004_v11  ;;  %v9045_v11 = vld [vmem:[%s13129_s5 + $0x2b4] ss:$8 sps:$4 sm:$0xff]  }
0x104c   : > { %6253 = vmatprep.subr.bf16.mxu1 %v9009_v8  ;;  %v9043_v8 = vld [vmem:[%s13129_s5 + $0x2b0] ss:$8 sps:$4 sm:$0xff]  }
0x104f   : > { %6254 = vmatpush1.bf16.msra.mxu1 %v9007_v57  ;;  %v9048_v57 = vld [vmem:[%s13129_s5 + $0x2c4] ss:$8 sps:$4 sm:$0xff]  }
0x1050   : > { %6255 = vmatprep.subr.bf16.mxu1 %v9012_v4  ;;  %v9046_v4 = vld [vmem:[%s13129_s5 + $0x2c0] ss:$8 sps:$4 sm:$0xff]  }
0x1053   : > { %6256 = vmatpush1.bf16.msra.mxu1 %v9010_v21  ;;  %v9051_v21 = vld [vmem:[%s13129_s5 + $0x2d4] ss:$8 sps:$4 sm:$0xff]  }
0x1054   : > { %6257 = vmatprep.subr.bf16.mxu1 %v9015_v48  ;;  %v9049_v48 = vld [vmem:[%s13129_s5 + $0x2d0] ss:$8 sps:$4 sm:$0xff]  }
0x1057   : > { %6258 = vmatpush1.bf16.msra.mxu1 %v9013_v19  ;;  %v9054_v19 = vld [vmem:[%s13129_s5 + $0x2e4] ss:$8 sps:$4 sm:$0xff]  }
0x1058   : > { %6259 = vmatprep.subr.bf16.mxu1 %v9018_v39  ;;  %v9052_v39 = vld [vmem:[%s13129_s5 + $0x2e0] ss:$8 sps:$4 sm:$0xff]  }
0x105b   : > { %6260 = vmatpush1.bf16.msra.mxu1 %v9016_v14  ;;  %v9057_v14 = vld [vmem:[%s13129_s5 + $0x2f4] ss:$8 sps:$4 sm:$0xff]  }
0x105c   : > { %6261 = vmatprep.subr.bf16.mxu1 %v9021_v61  ;;  %v9055_v61 = vld [vmem:[%s13129_s5 + $0x2f0] ss:$8 sps:$4 sm:$0xff]  }
0x105f   : > { %6262 = vmatpush1.bf16.msra.mxu1 %v9019_v20  ;;  %v6325_v20 = vpack.c.bf16 %v12172_v50, %v12172_v50  ;;  %v13747_v50 = vld [vmem:[#allocation20_spill] sm:$0xff] }
0x1060   : > { %6474 = vmatprep.subr.bf16.mxu1 %v9024_v18  ;;  %v13741_v18 = vld [vmem:[#allocation18_spill] sm:$0xff] }
0x1061   : > { %vm6534_vm14 = vcmp.ge.s32.totalorder %v13741_v18, %v12183_v53  ;;  %vm6559_vm9 = vcmp.lt.s32.totalorder %v13741_v18, %v12186_v10 }
0x1062   : > { %6272 = vmatmul.mubr.bf16.vlgmr.msra.gmra.mrb[44].mxu1 %v6090_v12  ;;  %v13742_v12 = vld [vmem:[#allocation19_spill] sm:$0xff]  ;;  %vm12607_vm3 = vmand %vm6534_vm14, %vm6559_vm9  ;;  %vm6536_vm14 = vcmp.ge.s32.totalorder %v13747_v50, %v12183_v53  ;;  %vm6561_vm9 = vcmp.lt.s32.totalorder %v13747_v50, %v12186_v10 }
0x1063   : > { %6475 = vmatpush1.bf16.msra.mxu1 %v9022_v62  ;;  %7816 = vmatprep.mubr.msk.bf16.mxu1 %vm13740_vm2, %v6326_v46  ;;  %vm6535_vm4 = vcmp.ge.s32.totalorder %v13742_v12, %v12183_v53  ;;  %vm6560_vm2 = vcmp.lt.s32.totalorder %v13742_v12, %v12186_v10  ;;  %v13743_v62 = vmov 0  ;;  %v13745_v46 = vmov 0  ;;  %vm12634_vm11 = vmand %vm6536_vm14, %vm6561_vm9 }
0x1064   : > { %6476 = vmatprep.subr.bf16.mxu1 %v9027_v42  ;;  %v13744_v62 = vsel %vm12607_vm3, 4294967295, %v13743_v62  ;;  %vm12611_vm7 = vmand %vm6535_vm4, %vm6560_vm2  ;;  %v13748_v42 = vld [vmem:[#allocation21_spill] sm:$0xff] }
0x1065   : > { %v13746_v46 = vsel %vm12611_vm7, 4294967295, %v13745_v46  ;;  %vm13315_vm1 = vmpackc.low %vm12611_vm7, %vm12607_vm3  ;;  %vm6537_vm4 = vcmp.ge.s32.totalorder %v13748_v42, %v12183_v53  ;;  %vm6562_vm2 = vcmp.lt.s32.totalorder %v13748_v42, %v12186_v10 }
0x1066   : > { %8243 = vmatpush1.bf16.msk.msra.mxu0 %vm13315_vm1, %v13412_v1  ;;  %vm12638_vm3 = vmand %vm6537_vm4, %vm6562_vm2 }
0x1067   : > { %6477 = vmatpush1.bf16.msra.mxu1 %v9025_v54  ;;  %8244 = vmatprep.subr.bf16.mxu0 %v13415_v44  ;;  %v13749_v54 = vmov 0  ;;  %vm13318_vm1 = vmpackc.low %vm12638_vm3, %vm12634_vm11 }
0x1068   : > { %6478 = vmatprep.subr.bf16.mxu1 %v9030_v47  ;;  %v13750_v54 = vsel %vm12634_vm11, 4294967295, %v13749_v54  ;;  %v13751_v47 = vmov 0 }
0x1069   : > { %v13752_v47 = vsel %vm12638_vm3, 4294967295, %v13751_v47 }
0x106a   : > { %8246 = vmatpush1.bf16.msk.msra.mxu0 %vm13318_vm1, %v13412_v1 }
0x106b   : > { %6479 = vmatpush1.bf16.msra.mxu1 %v9028_v43  ;;  %v13753_v43 = vld [vmem:[#allocation22_spill] sm:$0xff]  ;;  %8247 = vmatprep.subr.bf16.mxu0 %v13415_v44 }
0x106c   : > { %6480 = vmatprep.subr.bf16.mxu1 %v9033_v63  ;;  %vm6538_vm14 = vcmp.ge.s32.totalorder %v13753_v43, %v12183_v53  ;;  %v13754_v63 = vld [vmem:[#allocation23_spill] sm:$0xff]  ;;  %vm6563_vm9 = vcmp.lt.s32.totalorder %v13753_v43, %v12186_v10 }
0x106d   : > { %vm6539_vm4 = vcmp.ge.s32.totalorder %v13754_v63, %v12183_v53  ;;  %vm6564_vm2 = vcmp.lt.s32.totalorder %v13754_v63, %v12186_v10  ;;  %vm12661_vm7 = vmand %vm6538_vm14, %vm6563_vm9 }
0x106e   : > { %vm12665_vm11 = vmand %vm6539_vm4, %vm6564_vm2 }
0x106f   : > { %6481 = vmatpush1.bf16.msra.mxu1 %v9031_v60  ;;  %v13755_v60 = vmov 0  ;;  %vm13321_vm1 = vmpackc.low %vm12665_vm11, %vm12661_vm7 }
0x1070   : > { %6482 = vmatprep.subr.bf16.mxu1 %v9036_v35  ;;  %v13756_v60 = vsel %vm12661_vm7, 4294967295, %v13755_v60  ;;  %8249 = vmatpush1.bf16.msk.msra.mxu0 %vm13321_vm1, %v13412_v1  ;;  %v6642_v35 = vadd.s32 1, %v13707_v34 }
0x1071   : > { %8250 = vmatprep.subr.bf16.mxu0 %v13415_v44 }
0x1073   : > { %6483 = vmatpush1.bf16.msra.mxu1 %v9034_v22  ;;  %v13759_v22 = vld [vmem:[#allocation24_spill] sm:$0xff] }
0x1074   : > { %6484 = vmatprep.subr.bf16.mxu1 %v9039_v31  ;;  %vm6540_vm14 = vcmp.ge.s32.totalorder %v13759_v22, %v12183_v53  ;;  %v13760_v31 = vld [vmem:[#allocation25_spill] sm:$0xff]  ;;  %vm6565_vm9 = vcmp.lt.s32.totalorder %v13759_v22, %v12186_v10 }
0x1075   : > { %vm6541_vm4 = vcmp.ge.s32.totalorder %v13760_v31, %v12183_v53  ;;  %vm6566_vm2 = vcmp.lt.s32.totalorder %v13760_v31, %v12186_v10  ;;  %vm12688_vm3 = vmand %vm6540_vm14, %vm6565_vm9  ;;  %vm13326_vm14 = vcmask 517120   ;;  %vm13767_vm9 = vcmask 523264  }
0x1076   : > { %vm12692_vm7 = vmand %vm6541_vm4, %vm6566_vm2  ;;  %vm13765_vm4 = vcmask 1041408  }
0x1077   : > { %6485 = vmatpush1.bf16.msra.mxu1 %v9037_v30  ;;  %v13761_v30 = vmov 0  ;;  %vm13327_vm1 = vmpackc.low %vm12692_vm7, %vm12688_vm3 }
0x1078   : > { %6486 = vmatprep.subr.bf16.mxu1 %v9042_v26  ;;  %v13762_v30 = vsel %vm12688_vm3, 4294967295, %v13761_v30  ;;  %8252 = vmatpush1.bf16.msk.msra.mxu0 %vm13327_vm1, %v13412_v1  ;;  %vm13768_vm2 = vmpackc.low %vm12210_vm13, %vm12202_vm10  ;;  %vm13771_vm1 = vnez %v13697_v29  ;;  %vm13775_vm13 = vnez %v13712_v7  ;;  %v6643_v29 = vmul.u32 3, %v10343_v33  ;;  %v13871_v33 = vld [vmem:[#allocation4_spill] sm:$0xff] }
0x1079   : > { %8253 = vmatprep.subr.bf16.mxu0 %v13415_v44 }
0x107b   : > { %6487 = vmatpush1.bf16.msra.mxu1 %v9040_v28 }
0x107c   : > { %6488 = vmatprep.subr.bf16.mxu1 %v9045_v11 }
0x107f   : > { %6489 = vmatpush1.bf16.msra.mxu1 %v9043_v8 }
0x1080   : > { %6490 = vmatprep.subr.bf16.mxu1 %v9048_v57 }
0x1083   : > { %6491 = vmatpush1.bf16.msra.mxu1 %v9046_v4 }
0x1084   : > { %6492 = vmatprep.subr.bf16.mxu1 %v9051_v21 }
0x1087   : > { %6493 = vmatpush1.bf16.msra.mxu1 %v9049_v48 }
0x1088   : > { %6494 = vmatprep.subr.bf16.mxu1 %v9054_v19 }
0x108b   : > { %6495 = vmatpush1.bf16.msra.mxu1 %v9052_v39 }
0x108c   : > { %6496 = vmatprep.subr.bf16.mxu1 %v9057_v14 }
0x108f   : > { %6497 = vmatpush1.bf16.msra.mxu1 %v9055_v61 }
0x1092   : > { %6507 = vmatmul.mubr.bf16.vlgmr.msra.gmra.mrb[44].mxu1 %v6325_v20 }
0x1165   : > { %v12707_v53 = vpop.f32.mrb[44].mxu1 }
0x1166   : > { %v6699_v10 = vsel %vm13765_vm4, %v12707_v53, 0.0  ;;  %v12711_v28 = vpop.f32.mrb[45].mxu1  ;;  %vm13769_vm4 = vmmov %vm13767_vm9 }
0x1167   : > { %13766 = vst [vmem:[#allocation3_spill] sm:$0xff] %v12711_v28  ;;  %v6700_v11 = vrot.slane %v6699_v10, 4  ;;  %v6707_v8 = vsel %vm13326_vm14, %v12711_v28, 0.0  ;;  %v6788_v57 = vmul.f32 %v12711_v28, %v12711_v28  ;;  %v6512_v4 = vpop.f32.mrb[46].mxu1 }
0x1168   : > { %v6708_v21 = vrot.slane %v6707_v8, 4  ;;  %v6513_v48 = vpop.f32.mrb[47].mxu1 }
0x1169   : > { %v6701_v19 = vadd.f32 %v6700_v11, %v6699_v10  ;;  %v6796_v39 = vsel %vm13326_vm14, %v6788_v57, 0.0  ;;  %vm13770_vm14 = vnez %v13700_v13  ;;  %v6616_v13 = vmul.u32 3, %v9146_v3 }
0x116a   : > { %v6709_v14 = vadd.f32 %v6708_v21, %v6707_v8  ;;  %v6797_v61 = vrot.slane %v6796_v39, 4  ;;  %vm13772_vm3 = vmpackc.low %vm13770_vm14, %vm13771_vm1  ;;  %vm13778_vm1 = vnez %v13715_v25  ;;  %vm13781_vm14 = vcmask 1041408  }
0x116b   : > { %v6702_v20 = vrot.slane %v6701_v19, 2  ;;  %v13819_v11 = vmov 0  ;;  %v13821_v8 = vmov 0  ;;  %v13823_v57 = vmov 0 }
0x116c   : > { %v6710_v18 = vrot.slane %v6709_v14, 2  ;;  %v6798_v12 = vadd.f32 %v6797_v61, %v6796_v39  ;;  %v6641_v48 = vadd.s32 1, %v13704_v16  ;;  %v7083_v39 = vld [vmem:[#allocation2] sm:$0x1] }
0x116d   : > { %v6703_v50 = vadd.f32 %v6702_v20, %v6701_v19 }
0x116e   : > { %v6711_v42 = vadd.f32 %v6710_v18, %v6709_v14  ;;  %v6799_v43 = vrot.slane %v6798_v12, 2  ;;  %v6649_v20 = vmul.u32 3, %v6641_v48  ;;  %v6622_v18 = vmul.u32 3, %v13707_v34 }
0x116f   : > { %v6704_v63 = vrot.slane %v6703_v50, 1 }
0x1170   : > { %v6712_v22 = vrot.slane %v6711_v42, 1  ;;  %v6800_v31 = vadd.f32 %v6799_v43, %v6798_v12  ;;  %v6650_v12 = vmul.u32 3, %v6642_v35 }
0x1171   : > { %v6705_v28 = vadd.f32 %v6704_v63, %v6703_v50 }
0x1172   : > { %v6713_v17 = vadd.f32 %v6712_v22, %v6711_v42  ;;  %v6801_v32 = vrot.slane %v6800_v31, 1 }
0x1174   : > { %7841 = vmatprep.mubr.msk.f32.mxu0 %vm13767_vm9, %v6713_v17  ;;  %v6802_v4 = vadd.f32 %v6801_v32, %v6800_v31  ;;  %vm13773_vm9 = vnez %v13703_v49  ;;  %v6787_v17 = vmul.f32 %v12707_v53, %v12707_v53  ;;  %v6644_v49 = vmul.u32 3, %v11107_v56 }
0x1175   : > { %6782 = vmatmul.mubr.f32.vlgmr.msra.gmra.mrb[80].mxu0 %v6705_v28  ;;  %vm13774_vm10 = vmpackc.low %vm12275_vm5, %vm13773_vm9  ;;  %v13863_v31 = vmov 0.0  }
0x1176   : > { %8255 = vmatpush1.bf16.msk.msra.mxu0 %vm13768_vm2, %v13412_v1  ;;  %7866 = vmatprep.mubr.msk.f32.mxu0 %vm13769_vm4, %v6802_v4  ;;  %vm13776_vm2 = vnez %v13709_v45  ;;  %vm13780_vm5 = vmpackc.low %vm12358_vm8, %vm12353_vm6  ;;  %v6789_v32 = vsel %vm13781_vm14, %v6787_v17, 0.0  ;;  %vm13783_vm6 = vnez %v13738_v0  ;;  %vm13784_vm8 = vnez %v13736_v15 }
0x1177   : > { %8256 = vmatprep.subr.bf16.mxu0 %v13415_v44  ;;  %vm13777_vm4 = vmpackc.low %vm13775_vm13, %vm13776_vm2  ;;  %v6790_v52 = vrot.slane %v6789_v32, 4  ;;  %vm12799_vm13 = vcmp.lt.s32.totalorder %v10346_v36, %v6644_v49  ;;  %vm12804_vm2 = vcmp.ge.s32.totalorder %v9152_v5, %v6615_v24  ;;  %v6646_v15 = vmul.u32 3, %v11916_v41 }
0x1178   : > { %vm13785_vm9 = vmpackc.low %vm13783_vm6, %vm13784_vm8  ;;  %vm12830_vm6 = vcmp.lt.s32.totalorder %v9152_v5, %v6644_v49  ;;  %v6640_v0 = vadd.s32 1, %v13701_v59 }
0x1179   : > { %v6791_v37 = vadd.f32 %v6790_v52, %v6789_v32 }
0x117a   : > { %8258 = vmatpush1.bf16.msk.msra.mxu0 %vm13772_vm3, %v13412_v1  ;;  %vm13779_vm3 = vmpackc.low %vm12329_vm12, %vm13778_vm1  ;;  %vm12814_vm1 = vcmp.lt.s32.totalorder %v9152_v5, %v6643_v29  ;;  %v6648_v28 = vmul.u32 3, %v6640_v0 }
0x117b   : > { %8259 = vmatprep.subr.bf16.mxu0 %v13415_v44  ;;  %vm13782_vm12 = vmpackc.low %vm12391_vm15, %vm12386_vm0  ;;  %vm12784_vm0 = vcmp.ge.s32.totalorder %v10346_v36, %v6615_v24  ;;  %vm12789_vm15 = vcmp.lt.s32.totalorder %v10346_v36, %v6643_v29  ;;  %v6792_v40 = vrot.slane %v6791_v37, 2 }
0x117d   : > { %v6793_v10 = vadd.f32 %v6792_v40, %v6791_v37 }
0x117e   : > { %8261 = vmatpush1.bf16.msk.msra.mxu0 %vm13774_vm10, %v13412_v1  ;;  %vm12794_vm10 = vcmp.ge.s32.totalorder %v10346_v36, %v6616_v13 }
0x117f   : > { %8262 = vmatprep.subr.bf16.mxu0 %v13415_v44  ;;  %vm6670_vm8 = vmand %vm12794_vm10, %vm12799_vm13  ;;  %vm13807_vm10 = vnez %v13752_v47  ;;  %vm13808_vm13 = vnez %v13750_v54 }
0x1182   : > { %8264 = vmatpush1.bf16.msk.msra.mxu0 %vm13777_vm4, %v13412_v1  ;;  %vm12809_vm4 = vcmp.ge.s32.totalorder %v9152_v5, %v6616_v13 }
0x1183   : > { %8265 = vmatprep.subr.bf16.mxu0 %v13415_v44 }
0x1186   : > { %8267 = vmatpush1.bf16.msk.msra.mxu0 %vm13779_vm3, %v13412_v1  ;;  %vm13800_vm3 = vnez %v13746_v46  ;;  %v6647_v46 = vmul.u32 3, %v6639_v23 }
0x1187   : > { %8268 = vmatprep.subr.bf16.mxu0 %v13415_v44 }
0x118a   : > { %8270 = vmatpush1.bf16.msk.msra.mxu0 %vm13780_vm5, %v13412_v1  ;;  %vm13801_vm5 = vnez %v13744_v62  ;;  %v6619_v62 = vmul.u32 3, %v13698_v58  ;;  %v6620_v58 = vmul.u32 3, %v13701_v59 }
0x118b   : > { %8271 = vmatprep.subr.bf16.mxu0 %v13415_v44  ;;  %vm13802_vm14 = vmpackc.low %vm13800_vm3, %vm13801_vm5  ;;  %vm12853_vm5 = vcmp.ge.s32.totalorder %v10346_v36, %v6617_v9 }
0x118c   : > { %vm6669_vm3 = vmand %vm12809_vm4, %vm12830_vm6  ;;  %vm12885_vm6 = vcmp.lt.s32.totalorder %v10346_v36, %v6646_v15 }
0x118d   : > { %vm13814_vm4 = vmand %vm12784_vm0, %vm12789_vm15  ;;  %vm12900_vm0 = vcmp.lt.s32.totalorder %v9152_v5, %v6645_v6  ;;  %vm12930_vm15 = vcmp.ge.s32.totalorder %v10346_v36, %v6619_v62 }
0x118e   : > { %8273 = vmatpush1.bf16.msk.msra.mxu0 %vm13782_vm12, %v13412_v1  ;;  %vm12864_vm12 = vcmp.ge.s32.totalorder %v10346_v36, %v6618_v55  ;;  %v13824_v57 = vsel %vm12900_vm0, 4294967295, %v13823_v57  ;;  %vm13839_vm0 = vnez %v13762_v30 }
0x118f   : > { %8274 = vmatprep.subr.bf16.mxu0 %v13415_v44 }
0x1192   : > { %8276 = vmatpush1.bf16.msk.msra.mxu0 %vm13785_vm9, %v13412_v1  ;;  %vm6667_vm9 = vmand %vm12804_vm2, %vm12814_vm1  ;;  %vm12869_vm2 = vcmp.lt.s32.totalorder %v10346_v36, %v6645_v6 }
0x1193   : > { %8277 = vmatprep.subr.bf16.mxu0 %v13415_v44  ;;  %vm12880_vm1 = vmpackc.low %vm6670_vm8, %vm13814_vm4  ;;  %vm12909_vm8 = vcmp.ge.s32.totalorder %v9152_v5, %v6618_v55 }
0x1196   : > { %8279 = vmatpush1.bf16.msk.msra.mxu0 %vm13802_vm14, %v13412_v1  ;;  %vm13809_vm14 = vmpackc.low %vm13807_vm10, %vm13808_vm13  ;;  %vm12895_vm13 = vcmp.ge.s32.totalorder %v9152_v5, %v6617_v9 }
0x1197   : > { %8280 = vmatprep.subr.bf16.mxu0 %v13415_v44  ;;  %vm12890_vm10 = vmpackc.low %vm6669_vm3, %vm6667_vm9  ;;  %v13822_v8 = vsel %vm12895_vm13, 4294967295, %v13821_v8  ;;  %vm12914_vm9 = vcmp.lt.s32.totalorder %v9152_v5, %v6646_v15  ;;  %vm13829_vm3 = vnez %v13756_v60  ;;  %v6794_v60 = vrot.slane %v6793_v10, 1  ;;  %v7901_v15 = vld.sshfl [vmem:[%s13131_s7] sm:$0x33 pattern:$0x76325410] }
0x1198   : > { %v13820_v11 = vsel %vm12890_vm10, 4294967295, %v13819_v11  ;;  %vm12935_vm10 = vcmp.lt.s32.totalorder %v10346_v36, %v6647_v46  ;;  %vm6673_vm4 = vmand %vm12909_vm8, %vm12914_vm9  ;;  %v7066_v41 = vcombine.high %v7901_v15, %v7901_v15 }
0x1199   : > { %vm13840_vm13 = vmpackc.low %vm12692_vm7, %vm13839_vm0  ;;  %v6795_v50 = vadd.f32 %v6794_v60, %v6793_v10  ;;  %vm12993_vm0 = vcmp.ge.s32.totalorder %v9152_v5, %v6619_v62 }
0x119a   : > { %8282 = vmatpush1.bf16.msk.msra.mxu0 %vm13809_vm14, %v13412_v1  ;;  %vm13830_vm14 = vmpackc.low %vm12665_vm11, %vm13829_vm3  ;;  %vm12946_vm3 = vcmp.ge.s32.totalorder %v10346_v36, %v6620_v58 }
0x119b   : > { %8283 = vmatprep.subr.bf16.mxu0 %v13415_v44  ;;  %vm6676_vm11 = vmand %vm12930_vm15, %vm12935_vm10  ;;  %vm6638_vm15 = vcmp.ge.s32.totalorder %v10346_v36, %v6622_v18 }
0x119c   : > { %vm13841_vm9 = vmand %vm12853_vm5, %vm12869_vm2  ;;  %vm13849_vm5 = vnez %v13822_v8  ;;  %vm13850_vm2 = vnez %v13824_v57 }
0x119d   : > { %vm13842_vm7 = vmand %vm12864_vm12, %vm12885_vm6  ;;  %vm13012_vm6 = vcmp.ge.s32.totalorder %v9152_v5, %v6620_v58 }
0x119e   : > { %8285 = vmatpush1.bf16.msk.msra.mxu0 %vm13830_vm14, %v13412_v1  ;;  %vm12951_vm14 = vcmp.lt.s32.totalorder %v10346_v36, %v6648_v28 }
0x119f   : > { %8286 = vmatprep.subr.bf16.mxu0 %v13415_v44  ;;  %v6621_v44 = vmul.u32 3, %v13704_v16  ;;  %vm6678_vm8 = vmand %vm12946_vm3, %vm12951_vm14  ;;  %vm12998_vm3 = vcmp.lt.s32.totalorder %v9152_v5, %v6647_v46 }
0x11a0   : > { %vm13851_vm14 = vmand %vm13849_vm5, %vm13850_vm2  ;;  %vm6664_vm5 = vcmp.lt.s32.totalorder %v10346_v36, %v6649_v20  ;;  %vm13862_vm2 = vnez %v13820_v11 }
0x11a1   : > { %vm13007_vm12 = vmpackc.low %vm6673_vm4, %vm13851_vm14 }
0x11a2   : > { %8288 = vmatpush1.bf16.msk.msra.mxu0 %vm13840_vm13, %v13412_v1  ;;  %vm12988_vm13 = vmpackc.low %vm13842_vm7, %vm13841_vm9  ;;  %vm13017_vm9 = vcmp.lt.s32.totalorder %v9152_v5, %v6648_v28  ;;  %vm13031_vm7 = vcmp.ge.s32.totalorder %v10346_v36, %v6621_v44 }
0x11a3   : > { %8290 = vmatprep.subr.msk.bf16.mxu0 %vm12880_vm1, %v13412_v1  ;;  %vm13026_vm4 = vmpackc.low %vm6678_vm8, %vm6676_vm11  ;;  %vm6666_vm11 = vcmp.lt.s32.totalorder %v10346_v36, %v6650_v12 }
0x11a4   : > { %vm6675_vm10 = vmand %vm12993_vm0, %vm12998_vm3 }
0x11a5   : > { %6871 = vmatmul.mubr.f32.vlgmr.msra.gmra.mrb[82].mxu0 %v6795_v50  ;;  %vm6677_vm8 = vmand %vm13012_vm6, %vm13017_vm9  ;;  %vm6635_vm6 = vcmp.ge.s32.totalorder %v9152_v5, %v6621_v44  ;;  %vm6637_vm9 = vcmp.ge.s32.totalorder %v9152_v5, %v6622_v18 }
0x11a6   : > { %8292 = vmatpush1.bf16.msk.msra.mxu0 %vm13862_vm2, %v13412_v1  ;;  %6950 = vmatprep.mubr.f32.mxu0 %v13863_v31  ;;  %vm6680_vm14 = vmand %vm13031_vm7, %vm6664_vm5  ;;  %vm6663_vm7 = vcmp.lt.s32.totalorder %v9152_v5, %v6649_v20  ;;  %vm6665_vm5 = vcmp.lt.s32.totalorder %v9152_v5, %v6650_v12 }
0x11a7   : > { %8294 = vmatprep.subr.msk.bf16.mxu0 %vm12988_vm13, %v13412_v1  ;;  %vm6682_vm2 = vmand %vm6638_vm15, %vm6666_vm11  ;;  %vm13868_vm11 = vcmask 523264  }
0x11a8   : > { %vm13061_vm0 = vmpackc.low %vm6677_vm8, %vm6675_vm10  ;;  %vm13869_vm8 = vnez %v13820_v11 }
0x11a9   : > { %vm13065_vm3 = vmpackc.low %vm6682_vm2, %vm6680_vm14  ;;  %vm13874_vm14 = vcmask 517120  }
0x11aa   : > { %8296 = vmatpush1.bf16.msk.msra.mxu0 %vm13007_vm12, %v13412_v1  ;;  %vm6679_vm2 = vmand %vm6635_vm6, %vm6663_vm7 }
0x11ab   : > { %8298 = vmatprep.subr.msk.bf16.mxu0 %vm13026_vm4, %v13412_v1  ;;  %vm6681_vm10 = vmand %vm6637_vm9, %vm6665_vm5 }
0x11ac   : > { %vm8303_vm15 = vmpackc.low %vm6681_vm10, %vm6679_vm2 }
0x11ae   : > { %8300 = vmatpush1.bf16.msk.msra.mxu0 %vm13061_vm0, %v13412_v1 }
0x11af   : > { %8302 = vmatprep.subr.msk.bf16.mxu0 %vm13065_vm3, %v13412_v1 }
0x11b2   : > { %8304 = vmatpush1.bf16.msk.msra.mxu0 %vm8303_vm15, %v13412_v1 }
0x11b3   : > { %8306 = vmatprep.subr.msk.bf16.mxu0 %vm12880_vm1, %v13412_v1  ;;  %vm13870_vm1 = vmmov %vm13868_vm11 }
0x1248   : > { %v6783_v17 = vpop.f32.mrb[80].mxu0 }
0x1249   : > { %v6876_v32 = vmul.f32 0.16666667, %v6783_v17  ;;  %v6785_v52 = vpop.f32.mrb[81].mxu0 }
0x124b   : > { %7883 = vmatmul.mubr.msk.f32.vlgmr.msra.gmra.mrb[84].mxu0 %vm13868_vm11, %v6876_v32  ;;  %v6878_v24 = vmul.f32 %v6876_v32, %v6876_v32 }
0x124c   : > { %8308 = vmatpush1.bf16.msk.msra.mxu0 %vm13869_vm8, %v13412_v1  ;;  %7024 = vmatprep.mubr.f32.mxu0 %v13863_v31 }
0x124d   : > { %8310 = vmatprep.subr.msk.bf16.mxu0 %vm12988_vm13, %v13412_v1 }
0x1250   : > { %8312 = vmatpush1.bf16.msk.msra.mxu0 %vm13007_vm12, %v13412_v1 }
0x1251   : > { %8314 = vmatprep.subr.msk.bf16.mxu0 %vm13026_vm4, %v13412_v1  ;;  %vm13873_vm4 = vcmask 1041408  }
0x1254   : > { %8316 = vmatpush1.bf16.msk.msra.mxu0 %vm13061_vm0, %v13412_v1  ;;  %vm13875_vm0 = vmmov %vm13873_vm4 }
0x1255   : > { %8318 = vmatprep.subr.msk.bf16.mxu0 %vm13065_vm3, %v13412_v1  ;;  %vm7085_vm3 = vcmask 0  }
0x1258   : > { %8320 = vmatpush1.bf16.msk.msra.mxu0 %vm8303_vm15, %v13412_v1  ;;  %v13872_v1 = vld [vmem:[#allocation3_spill] sm:$0xff] }
0x1278   : > { %v6872_v5 = vpop.f32.mrb[82].mxu0 }
0x1279   : > { %v6877_v29 = vmul.f32 0.16666667, %v6872_v5  ;;  %v6874_v13 = vpop.f32.mrb[83].mxu0 }
0x127b   : > { %v6879_v49 = vsub.f32 %v6877_v29, %v6878_v24 }
0x127d   : > { %v6880_v37 = vmax.f32 %v6879_v49, 0.0 }
0x127f   : > { %v6881_v45 = vadd.f32 1e-05, %v6880_v37 }
0x1281   : > { %9064 = vrsqrt.f32 %v6881_v45 }
0x128b   : > { %v9065_v2 = vpop.eup %9064 }
0x128c   : > { %7900 = vmatmul.mubr.msk.f32.vlgmr.msra.gmra.mrb[86].mxu0 %vm13870_vm1, %v9065_v2 }
0x131e   : > { %v6952_v3 = vpop.f32.mrb[84].mxu0 }
0x131f   : > { %v7034_v56 = vrot.slane %v6952_v3, %v13871_v33  ;;  %v6954_v7 = vpop.f32.mrb[85].mxu0 }
0x1320   : > { %v7038_v25 = vrot.slane %v6954_v7, %v13871_v33 }
0x1321   : > { %v7039_v9 = vsub.f32 %v12707_v53, %v7034_v56 }
0x1322   : > { %v7040_v27 = vsub.f32 %v13872_v1, %v7038_v25 }
0x135f   : > { %v7026_v55 = vpop.f32.mrb[86].mxu0 }
0x1360   : > { %v7044_v6 = vrot.slane %v7026_v55, %v13871_v33  ;;  %v7028_v23 = vpop.f32.mrb[87].mxu0 }
0x1361   : > { %v7048_v40 = vrot.slane %v7028_v23, %v13871_v33 }
0x1362   : > { %v7049_v0 = vmul.f32 %v7044_v6, %v7039_v9 }
0x1363   : > { %v7050_v51 = vmul.f32 %v7048_v40, %v7040_v27 }
0x1364   : > { %v7053_v38 = vmul.f32 0.2, %v7049_v0  ;;  %vm7051_vm13 = vcmp.gt.f32.partialorder %v7049_v0, 0.0 }
0x1365   : > { %v7054_v62 = vmul.f32 0.2, %v7050_v51  ;;  %vm7052_vm12 = vcmp.gt.f32.partialorder %v7050_v51, 0.0 }
0x1366   : > { %v7055_v53 = vsel %vm7051_vm13, %v7049_v0, %v7053_v38 }
0x1367   : > { %v7056_v46 = vsel %vm7052_vm12, %v7050_v51, %v7054_v62  ;;  %v7069_v10 = vmul.f32 %v7901_v15, %v7055_v53 }
0x1368   : > { %v7070_v54 = vmul.f32 %v7066_v41, %v7056_v46 }
0x1369   : > { %v7071_v47 = vsel %vm13873_vm4, %v7069_v10, 0.0 }
0x136a   : > { %v7072_v58 = vsel %vm13874_vm14, %v7070_v54, 0.0 }
0x136b   : > { %v7073_v28 = vadd.f32 %v7072_v58, %v7071_v47 }
0x136d   : > { %7074 = vadd.xlane.f32.xlu0 %v7073_v28 }
0x13fa   : > { %v7075_v11 = vpop.xlane.xlu0 %7074 }
0x13fb   : > { %v7076_v8 = vsel %vm13875_vm0, %v7075_v11, 0.0 }
0x13fc   : > { %v7077_v57 = vrot.slane %v7076_v8, 4 }
0x13fe   : > { %v7078_v59 = vadd.f32 %v7077_v57, %v7076_v8 }
0x1400   : > { %v7079_v21 = vrot.slane %v7078_v59, 2 }
0x1402   : > { %v7080_v48 = vadd.f32 %v7079_v21, %v7078_v59 }
0x1404   : > { %v7081_v19 = vrot.slane %v7080_v48, 1 }
0x1406   : > { %v7082_v35 = vadd.f32 %v7081_v19, %v7080_v48 }
0x1408   : > { %v7084_v60 = vadd.f32 %v7083_v39, %v7082_v35 }
0x140a   : > { %7086 = vst.msk [vmem:[%s330_s26] sm:$0x1] %vm7085_vm3, %v7084_v60 }
0x140b PF: > { %s21_s11 = sadd.s32 1, %s9072_s11  }
0x140c   : > { %p18_p4 = scmp.ge.s32.totalorder %s21_s11, 4  }
0x140e   :  { %20 = sbr.rel (!%p18_p4) target bundleno = 3 (0x3), region = 86 }

</bundles_post_ra>
